<compile_context>
chip_gen: v5e
topology: v5e:2x2
jax: 0.10.0
libtpu: 0.0.40
codegen_flags: <defaults>
</compile_context>

<pallas_src>
import functools

import jax
import jax.numpy as jnp
from jax import lax
from jax.experimental import pallas as pl
from jax.experimental.pallas import tpu as pltpu


def _round_up(x, m):
    return (x + m - 1) // m * m


_VMEM_BUDGET = 24 * 1024 * 1024
_VMEM_LIMIT = 32 * 1024 * 1024


# ---------------------------------------------------------------------------
# Fused matmul kernel: O = A @ B (+bias) (+tanh), plus optional fused per-column
# partial BatchNorm statistics (sum / sum-of-squares of the f32 accumulator).
# ---------------------------------------------------------------------------

def _make_matmul_kernel(add_bias, tanh_out, want_stats):
    def kernel(*refs):
        i = 0
        a_ref = refs[i]; i += 1
        b_ref = refs[i]; i += 1
        bias_ref = None
        if add_bias:
            bias_ref = refs[i]; i += 1
        o_ref = refs[i]; i += 1
        if want_stats:
            s1_ref = refs[i]; s2_ref = refs[i + 1]; i += 2

        acc = jnp.dot(a_ref[...], b_ref[...], preferred_element_type=jnp.float32)
        if want_stats:
            s1_ref[...] = jnp.sum(acc, axis=0, keepdims=True)
            s2_ref[...] = jnp.sum(acc * acc, axis=0, keepdims=True)
        if add_bias:
            acc = acc + bias_ref[...]
        if tanh_out:
            acc = jnp.tanh(acc)
        o_ref[...] = acc.astype(o_ref.dtype)

    return kernel


def _pick_tiles(M, Np, K, out_bytes):
    """Pick (tm, tn).  tm divides M exactly (no A padding copy) and prefers >=2 row
    blocks so v7x can shard the parallel grid across its two TensorCores."""
    tms = [t for t in (512, 256, 128) if M % t == 0 and t <= max(M // 2, 128)]
    if not tms and M <= 512 and M % 8 == 0:
        tms = [M]
    if not tms:
        return None
    tns = ([Np] if Np <= 512 else []) + \
          [t for t in (512, 384, 256, 128) if t <= Np and Np % t == 0]

    def vmem(tm, tn):
        # double-buffered A and B blocks + output block + stats blocks
        return 2 * tm * K * 2 + 2 * K * tn * 2 + 2 * tm * tn * out_bytes + 8 * tn * 4

    for tm in tms:
        for tn in tns:
            if vmem(tm, tn) <= _VMEM_BUDGET:
                return tm, tn
    return None


def fused_matmul(a, b_pad, bias_pad=None, *, tanh_out=False, want_stats=False,
                 out_dtype=jnp.bfloat16):
    """a: (M, K); b_pad: (K, Np) bf16, Np % 128 == 0 (padded at init);
    bias_pad: (1, Np) f32 or None.
    Returns (out (M, Np), col_sum (Np,) or None, col_sumsq (Np,) or None)."""
    a = a.astype(jnp.bfloat16)
    M, K = a.shape
    Kb, Np = b_pad.shape
    assert K == Kb and Np % 128 == 0
    out_bytes = jnp.dtype(out_dtype).itemsize
    add_bias = bias_pad is not None
    tiles = _pick_tiles(M, Np, K, out_bytes) if M >= 128 else None

    if tiles is None:
        # TODO(synk): tiny / awkward shapes (innermost U-Net levels) go through
        # plain XLA -- a padded Pallas call there is <5% MXU utilisation and pure
        # launch overhead (perf-review item 11).
        acc = jnp.dot(a, b_pad, preferred_element_type=jnp.float32)
        s1 = jnp.sum(acc, axis=0) if want_stats else None
        s2 = jnp.sum(acc * acc, axis=0) if want_stats else None
        if add_bias:
            acc = acc + bias_pad
        if tanh_out:
            acc = jnp.tanh(acc)
        return acc.astype(out_dtype), s1, s2

    tm, tn = tiles
    n_i, n_j = M // tm, Np // tn
    grid = (n_i, n_j)

    inputs = [a, b_pad]
    in_specs = [
        pl.BlockSpec((tm, K), lambda i, j: (i, 0)),
        pl.BlockSpec((K, tn), lambda i, j: (0, j)),
    ]
    if add_bias:
        inputs.append(bias_pad)
        in_specs.append(pl.BlockSpec((1, tn), lambda i, j: (0, j)))

    out_shape = [jax.ShapeDtypeStruct((M, Np), out_dtype)]
    out_specs = [pl.BlockSpec((tm, tn), lambda i, j: (i, j))]
    if want_stats:
        # Lane-dense partial-stat outputs: one (1, tn) block per grid step laid out
        # along the lane axis; the tiny cross-tile reduction happens in XLA.
        out_shape += [jax.ShapeDtypeStruct((1, n_i * Np), jnp.float32)] * 2
        out_specs += [pl.BlockSpec((1, tn), lambda i, j: (0, i * n_j + j))] * 2

    kernel = _make_matmul_kernel(add_bias, tanh_out, want_stats)
    res = pl.pallas_call(
        kernel,
        grid=grid,
        in_specs=in_specs,
        out_specs=tuple(out_specs) if want_stats else out_specs[0],
        out_shape=tuple(out_shape) if want_stats else out_shape[0],
        compiler_params=pltpu.CompilerParams(
            dimension_semantics=("parallel", "parallel"),
            vmem_limit_bytes=_VMEM_LIMIT),
    )(*inputs)

    if want_stats:
        out, s1p, s2p = res
        s1 = s1p.reshape(n_i, Np).sum(axis=0)
        s2 = s2p.reshape(n_i, Np).sum(axis=0)
        return out, s1, s2
    return res, None, None


# ---------------------------------------------------------------------------
# Deferred BatchNorm affine + activation (applied once per raw element, XLA-side,
# BEFORE the conv's zero padding so borders stay correct), patch construction,
# and the conv / conv-transpose wrappers.
# ---------------------------------------------------------------------------

def _apply_affine_act(x, affine, act):
    if affine is None and act is None:
        return x.astype(jnp.bfloat16)
    x = x.astype(jnp.float32)
    if affine is not None:
        scale, shift = affine
        x = x * scale + shift
    if act == "leaky_relu":
        x = jnp.maximum(x, 0.2 * x)
    elif act == "relu":
        x = jnp.maximum(x, 0.0)
    return x.astype(jnp.bfloat16)


def conv2d_s2(x, affine, wm_pad, cout, *, act, want_stats,
              out_dtype=jnp.bfloat16):
    """Conv2d(k=4, s=2, p=1, bias=False).  x: (N,H,W,Cin); wm_pad: (16*Cin, Np)."""
    N, H, W, Cin = x.shape
    Ho, Wo = H // 2, W // 2
    xa = _apply_affine_act(x, affine, act)
    xp = jnp.pad(xa, ((0, 0), (1, 1), (1, 1), (0, 0)))
    # TODO(synk): 16-tap im2col still materialised by XLA (perf-review item 1).
    taps = [xp[:, ky:ky + 2 * Ho:2, kx:kx + 2 * Wo:2, :]
            for ky in range(4) for kx in range(4)]
    p = jnp.stack(taps, axis=3).reshape(N * Ho * Wo, 16 * Cin)
    out, s1, s2 = fused_matmul(p, wm_pad, None, want_stats=want_stats,
                               out_dtype=out_dtype)
    out = out[:, :cout].reshape(N, Ho, Wo, cout)
    if want_stats:
        return out, (s1[:cout], s2[:cout], N * Ho * Wo)
    return out, None


def conv_transpose2d_s2(x, affine, wm_pad, cout, bias_pad=None, *, act,
                        tanh_out=False, want_stats=False,
                        out_dtype=jnp.bfloat16):
    """ConvTranspose2d(k=4, s=2, p=1) via the 2x2 sub-pixel phase decomposition
    (single 3x3-tap stride-1 patch matmul producing all 4 phases)."""
    N, H, W, Cin = x.shape
    xa = _apply_affine_act(x, affine, act)
    xp = jnp.pad(xa, ((0, 0), (1, 1), (1, 1), (0, 0)))
    taps = [xp[:, dy:dy + H, dx:dx + W, :] for dy in range(3) for dx in range(3)]
    p = jnp.stack(taps, axis=3).reshape(N * H * W, 9 * Cin)
    out, s1, s2 = fused_matmul(p, wm_pad, bias_pad, tanh_out=tanh_out,
                               want_stats=want_stats, out_dtype=out_dtype)
    out = out[:, :4 * cout].reshape(N, H, W, 2, 2, cout)
    # TODO(synk): phase interleave is an XLA transpose (one extra pass over the
    # up-sampled activation); an in-kernel phase-scatter would remove it (item 8).
    out = out.transpose(0, 1, 3, 2, 4, 5).reshape(N, 2 * H, 2 * W, cout)
    if want_stats:
        s1 = s1[:4 * cout].reshape(4, cout).sum(0)
        s2 = s2[:4 * cout].reshape(4, cout).sum(0)
        return out, (s1, s2, 4 * N * H * W)
    return out, None


def bn_affine_from_stats(stats, gamma, beta, eps=1e-5):
    """Training-mode BatchNorm from fused conv-epilogue statistics, returned as a
    deferred per-channel (scale, shift) applied by the consuming conv."""
    s1, s2, count = stats
    mean = s1 / count
    var = jnp.maximum(s2 / count - mean * mean, 0.0)   # biased variance
    scale = gamma * lax.rsqrt(var + eps)
    shift = beta - mean * scale
    # TODO(synk): running_mean / running_var buffer updates (training side effect
    # of nn.BatchNorm2d) are not tracked; forward output is unaffected.
    return scale, shift


def _concat_deferred(x, ax, u, au):
    def mat(a, c):
        if a is None:
            return jnp.ones((c,), jnp.float32), jnp.zeros((c,), jnp.float32)
        return a
    xs, xt = mat(ax, x.shape[-1])
    us, ut = mat(au, u.shape[-1])
    return (jnp.concatenate([x, u], axis=-1),
            (jnp.concatenate([xs, us]), jnp.concatenate([xt, ut])))


# ---------------------------------------------------------------------------
# Parameters (matmul-ready, lane-padded, bf16) and the UnetBlock/Unet forward.
# ---------------------------------------------------------------------------

def build_unet_params(key, input_c=1, output_c=2, n_down=8, num_filters=64):
    keys = iter(jax.random.split(key, 8 * n_down + 32))

    def pad_cols(m):
        k, n = m.shape
        npad = _round_up(n, 128)
        if npad != n:
            m = jnp.concatenate([m, jnp.zeros((k, npad - n), m.dtype)], axis=1)
        return m

    def down_wm(cin, cout):
        w = 0.02 * jax.random.normal(next(keys), (cout, cin, 4, 4), jnp.float32)
        # K index = (ky*4+kx)*cin + ci  ->  wm[k, co] = w[co, ci, ky, kx]
        wm = w.transpose(2, 3, 1, 0).reshape(16 * cin, cout)
        return pad_cols(wm).astype(jnp.bfloat16)

    def up_wm(cin, cout):
        # TODO(synk): 3x3-tap/4-phase layout keeps structural zeros (only 4 of 9
        # taps feed each phase); per-phase K=4*Cin matmuls (review item 7) would
        # cut MXU FLOPs 2.25x for large-Cout configs.
        w = 0.02 * jax.random.normal(next(keys), (cin, cout, 4, 4), jnp.float32)
        m = jnp.zeros((3, 3, cin, 2, 2, cout), jnp.float32)
        for py in range(2):
            for px in range(2):
                for da in range(2):
                    for db in range(2):
                        dy, dx = py + da, px + db
                        ky, kx = 3 + py - 2 * dy, 3 + px - 2 * dx
                        m = m.at[dy, dx, :, py, px, :].set(w[:, :, ky, kx])
        wm = m.reshape(9 * cin, 4 * cout)
        return pad_cols(wm).astype(jnp.bfloat16)

    def up_bias(cout):
        b = jnp.tile(jnp.zeros((cout,), jnp.float32), 4)
        b = jnp.pad(b, (0, _round_up(4 * cout, 128) - 4 * cout))
        return b.reshape(1, -1)

    def bn(c):
        return jnp.ones((c,), jnp.float32), jnp.zeros((c,), jnp.float32)

    def make_block(nf, ni, submodule=None, in_c=None, dropout=False,
                   innermost=False, outermost=False):
        if in_c is None:
            in_c = nf
        if outermost:
            return {"kind": "outermost", "ni": ni, "nf": nf,
                    "down_wm": down_wm(in_c, ni),
                    "up_wm": up_wm(ni * 2, nf), "up_bias": up_bias(nf),
                    "sub": submodule}
        if innermost:
            g, b = bn(nf)
            return {"kind": "innermost", "ni": ni, "nf": nf,
                    "down_wm": down_wm(in_c, ni),
                    "up_wm": up_wm(ni, nf),
                    "up_gamma": g, "up_beta": b}
        dg, dbe = bn(ni)
        ug, ube = bn(nf)
        return {"kind": "middle", "ni": ni, "nf": nf,
                "down_wm": down_wm(in_c, ni),
                "down_gamma": dg, "down_beta": dbe,
                "up_wm": up_wm(ni * 2, nf),
                "up_gamma": ug, "up_beta": ube,
                "sub": submodule, "dropout": dropout}

    block = make_block(num_filters * 8, num_filters * 8, innermost=True)
    for _ in range(n_down - 5):
        block = make_block(num_filters * 8, num_filters * 8, submodule=block,
                           dropout=True)
    out_f = num_filters * 8
    for _ in range(3):
        block = make_block(out_f // 2, out_f, submodule=block)
        out_f //= 2
    return make_block(output_c, out_f, submodule=block, in_c=input_c,
                      outermost=True)


def _apply_block(p, x, affine):
    """x: NHWC data; affine: None or per-channel (scale, shift) s.t. the actual
    activation equals x*scale + shift (deferred BatchNorm of the producer)."""
    kind = p["kind"]
    if kind == "outermost":
        h, _ = conv2d_s2(x, affine, p["down_wm"], p["ni"], act=None,
                         want_stats=False)
        m, m_affine = _apply_block(p["sub"], h, None)
        y, _ = conv_transpose2d_s2(m, m_affine, p["up_wm"], p["nf"],
                                   bias_pad=p["up_bias"], act="relu",
                                   tanh_out=True, want_stats=False,
                                   out_dtype=jnp.float32)
        return y
    if kind == "innermost":
        h, _ = conv2d_s2(x, affine, p["down_wm"], p["ni"], act="leaky_relu",
                         want_stats=False)
        u, ustats = conv_transpose2d_s2(h, None, p["up_wm"], p["nf"],
                                        act="relu", want_stats=True)
        u_affine = bn_affine_from_stats(ustats, p["up_gamma"], p["up_beta"])
        return _concat_deferred(x, affine, u, u_affine)
    # middle block
    h, dstats = conv2d_s2(x, affine, p["down_wm"], p["ni"], act="leaky_relu",
                          want_stats=True)
    h_affine = bn_affine_from_stats(dstats, p["down_gamma"], p["down_beta"])
    m, m_affine = _apply_block(p["sub"], h, h_affine)
    u, ustats = conv_transpose2d_s2(m, m_affine, p["up_wm"], p["nf"],
                                    act="relu", want_stats=True)
    u_affine = bn_affine_from_stats(ustats, p["up_gamma"], p["up_beta"])
    # TODO(synk): training-mode nn.Dropout(0.5) for dropout=True blocks is not
    # applied (no such blocks exist for n_down=5).
    return _concat_deferred(x, affine, u, u_affine)


def apply_unet(params, x_nchw):
    x = x_nchw.astype(jnp.bfloat16).transpose(0, 2, 3, 1)   # NCHW -> NHWC (once)
    y = _apply_block(params, x, None)
    return y.transpose(0, 3, 1, 2)                           # NHWC -> NCHW (once)


# ---------------------------------------------------------------------------
if __name__ == "__main__":
    key = jax.random.PRNGKey(0)
    kp, kx = jax.random.split(key)

    # Small-but-consistent instantiation: Unet(input_c=1, output_c=2, n_down=5,
    # num_filters=8) on a 64x64 input (5 downs -> innermost 2x2 spatial).
    params = build_unet_params(kp, input_c=1, output_c=2, n_down=5,
                               num_filters=8)
    x = jax.random.normal(kx, (2, 1, 64, 64), jnp.float32)

    fwd = jax.jit(functools.partial(apply_unet, params))
    y = fwd(x)
    jax.block_until_ready(y)

    assert y.shape == (2, 2, 64, 64), y.shape
    assert bool(jnp.all(jnp.isfinite(y)))
    assert float(jnp.max(jnp.abs(y))) <= 1.0 + 1e-3   # final Tanh range
    print("KERNEL_OK")
</pallas_src>

<mosaic_0001>
module attributes {stable_mosaic.version = 11 : i64} {
  func.func @kernel(%arg0: i32, %arg1: i32, %arg2: memref<512x16xbf16, #tpu.memory_space<vmem>>, %arg3: memref<16x128xbf16, #tpu.memory_space<vmem>>, %arg4: memref<512x128xbf16, #tpu.memory_space<vmem>>) attributes {dimension_semantics = [#tpu.dimension_semantics<parallel>, #tpu.dimension_semantics<parallel>], iteration_bounds = array<i64: 4, 1>, scalar_prefetch = 0 : i64, scratch_operands = 0 : i64, tpu.core_type = #tpu.core_type<tc>, window_params = [{transform_indices = @transform_0, window_bounds = array<i64: 512, 16>}, {transform_indices = @transform_1, window_bounds = array<i64: 16, 128>}, {transform_indices = @transform_2, window_bounds = array<i64: 512, 128>}]} {
    %c0 = arith.constant 0 : index
    %c0_0 = arith.constant 0 : index
    %0 = vector.load %arg2[%c0, %c0_0] : memref<512x16xbf16, #tpu.memory_space<vmem>>, vector<512x16xbf16>
    %c0_1 = arith.constant 0 : index
    %c0_2 = arith.constant 0 : index
    %1 = vector.load %arg3[%c0_1, %c0_2] : memref<16x128xbf16, #tpu.memory_space<vmem>>, vector<16x128xbf16>
    %cst = arith.constant dense<0.000000e+00> : vector<512x128xf32>
    %2 = tpu.matmul %0, %1, %cst {dimension_numbers = #tpu.dot_dimension_numbers<[1], [0], [0], [1], [0, 0, 1, 1], [], []>} : vector<512x16xbf16>, vector<16x128xbf16>, vector<512x128xf32> -> vector<512x128xf32>
    %3 = arith.truncf %2 : vector<512x128xf32> to vector<512x128xbf16>
    %c0_3 = arith.constant 0 : index
    %c0_4 = arith.constant 0 : index
    %4 = vector.load %arg4[%c0_3, %c0_4] : memref<512x128xbf16, #tpu.memory_space<vmem>>, vector<512x128xbf16>
    tpu.vector_store %arg4[%c0_3, %c0_4], %3 {strides = array<i32>} : memref<512x128xbf16, #tpu.memory_space<vmem>>, vector<512x128xbf16>,
    return
  }
  func.func @transform_0(%arg0: i32, %arg1: i32) -> (i32, i32) {
    %c0_i32 = arith.constant 0 : i32
    %c0_i32_0 = arith.constant 0 : i32
    return %arg0, %c0_i32 : i32, i32
  }
  func.func @transform_1(%arg0: i32, %arg1: i32) -> (i32, i32) {
    %c0_i32 = arith.constant 0 : i32
    %c0_i32_0 = arith.constant 0 : i32
    return %c0_i32, %arg1 : i32, i32
  }
  func.func @transform_2(%arg0: i32, %arg1: i32) -> (i32, i32) {
    %c0_i32 = arith.constant 0 : i32
    return %arg0, %arg1 : i32, i32
  }
}

module attributes {stable_mosaic.version = 11 : i64} {
  func.func @kernel(%arg0: i32, %arg1: i32, %arg2: memref<256x128xbf16, #tpu.memory_space<vmem>>, %arg3: memref<128x128xbf16, #tpu.memory_space<vmem>>, %arg4: memref<256x128xbf16, #tpu.memory_space<vmem>>, %arg5: memref<1x128xf32, #tpu.memory_space<vmem>>, %arg6: memref<1x128xf32, #tpu.memory_space<vmem>>) attributes {dimension_semantics = [#tpu.dimension_semantics<parallel>, #tpu.dimension_semantics<parallel>], iteration_bounds = array<i64: 2, 1>, scalar_prefetch = 0 : i64, scratch_operands = 0 : i64, tpu.core_type = #tpu.core_type<tc>, window_params = [{transform_indices = @transform_0, window_bounds = array<i64: 256, 128>}, {transform_indices = @transform_1, window_bounds = array<i64: 128, 128>}, {transform_indices = @transform_2, window_bounds = array<i64: 256, 128>}, {transform_indices = @transform_3, window_bounds = array<i64: 1, 128>}, {transform_indices = @transform_4, window_bounds = array<i64: 1, 128>}]} {
    %c0 = arith.constant 0 : index
    %c0_0 = arith.constant 0 : index
    %0 = vector.load %arg2[%c0, %c0_0] : memref<256x128xbf16, #tpu.memory_space<vmem>>, vector<256x128xbf16>
    %c0_1 = arith.constant 0 : index
    %c0_2 = arith.constant 0 : index
    %1 = vector.load %arg3[%c0_1, %c0_2] : memref<128x128xbf16, #tpu.memory_space<vmem>>, vector<128x128xbf16>
    %cst = arith.constant dense<0.000000e+00> : vector<256x128xf32>
    %2 = tpu.matmul %0, %1, %cst {dimension_numbers = #tpu.dot_dimension_numbers<[1], [0], [0], [1], [0, 0, 1, 1], [], []>} : vector<256x128xbf16>, vector<128x128xbf16>, vector<256x128xf32> -> vector<256x128xf32>
    %cst_3 = arith.constant dense<0.000000e+00> : vector<128xf32>
    %3 = vector.multi_reduction <add>, %2, %cst_3 [0] : vector<256x128xf32> to vector<128xf32>
    %4 = vector.shape_cast %3 : vector<128xf32> to vector<1x128xf32>
    %c0_4 = arith.constant 0 : index
    %c0_5 = arith.constant 0 : index
    %5 = vector.load %arg5[%c0_4, %c0_5] : memref<1x128xf32, #tpu.memory_space<vmem>>, vector<1x128xf32>
    tpu.vector_store %arg5[%c0_4, %c0_5], %4 {strides = array<i32>} : memref<1x128xf32, #tpu.memory_space<vmem>>, vector<1x128xf32>,
    %6 = arith.mulf %2, %2 : vector<256x128xf32>
    %cst_6 = arith.constant dense<0.000000e+00> : vector<128xf32>
    %7 = vector.multi_reduction <add>, %6, %cst_6 [0] : vector<256x128xf32> to vector<128xf32>
    %8 = vector.shape_cast %7 : vector<128xf32> to vector<1x128xf32>
    %c0_7 = arith.constant 0 : index
    %c0_8 = arith.constant 0 : index
    %9 = vector.load %arg6[%c0_7, %c0_8] : memref<1x128xf32, #tpu.memory_space<vmem>>, vector<1x128xf32>
    tpu.vector_store %arg6[%c0_7, %c0_8], %8 {strides = array<i32>} : memref<1x128xf32, #tpu.memory_space<vmem>>, vector<1x128xf32>,
    %10 = arith.truncf %2 : vector<256x128xf32> to vector<256x128xbf16>
    %c0_9 = arith.constant 0 : index
    %c0_10 = arith.constant 0 : index
    %11 = vector.load %arg4[%c0_9, %c0_10] : memref<256x128xbf16, #tpu.memory_space<vmem>>, vector<256x128xbf16>
    tpu.vector_store %arg4[%c0_9, %c0_10], %10 {strides = array<i32>} : memref<256x128xbf16, #tpu.memory_space<vmem>>, vector<256x128xbf16>,
    return
  }
  func.func @transform_0(%arg0: i32, %arg1: i32) -> (i32, i32) {
    %c0_i32 = arith.constant 0 : i32
    %c0_i32_0 = arith.constant 0 : i32
    return %arg0, %c0_i32 : i32, i32
  }
  func.func @transform_1(%arg0: i32, %arg1: i32) -> (i32, i32) {
    %c0_i32 = arith.constant 0 : i32
    %c0_i32_0 = arith.constant 0 : i32
    return %c0_i32, %arg1 : i32, i32
  }
  func.func @transform_2(%arg0: i32, %arg1: i32) -> (i32, i32) {
    %c0_i32 = arith.constant 0 : i32
    return %arg0, %arg1 : i32, i32
  }
  func.func @transform_3(%arg0: i32, %arg1: i32) -> (i32, i32) {
    %c1_i32 = arith.constant 1 : i32
    %0 = arith.muli %arg0, %c1_i32 : i32
    %1 = arith.addi %0, %arg1 : i32
    %c0_i32 = arith.constant 0 : i32
    %c0_i32_0 = arith.constant 0 : i32
    return %c0_i32, %1 : i32, i32
  }
  func.func @transform_4(%arg0: i32, %arg1: i32) -> (i32, i32) {
    %c1_i32 = arith.constant 1 : i32
    %0 = arith.muli %arg0, %c1_i32 : i32
    %1 = arith.addi %0, %arg1 : i32
    %c0_i32 = arith.constant 0 : i32
    %c0_i32_0 = arith.constant 0 : i32
    return %c0_i32, %1 : i32, i32
  }
}

module attributes {stable_mosaic.version = 11 : i64} {
  func.func @kernel(%arg0: i32, %arg1: i32, %arg2: memref<128x256xbf16, #tpu.memory_space<vmem>>, %arg3: memref<256x128xbf16, #tpu.memory_space<vmem>>, %arg4: memref<128x128xbf16, #tpu.memory_space<vmem>>, %arg5: memref<1x128xf32, #tpu.memory_space<vmem>>, %arg6: memref<1x128xf32, #tpu.memory_space<vmem>>) attributes {dimension_semantics = [#tpu.dimension_semantics<parallel>, #tpu.dimension_semantics<parallel>], iteration_bounds = array<i64: 1, 1>, scalar_prefetch = 0 : i64, scratch_operands = 0 : i64, tpu.core_type = #tpu.core_type<tc>, window_params = [{transform_indices = @transform_0, window_bounds = array<i64: 128, 256>}, {transform_indices = @transform_1, window_bounds = array<i64: 256, 128>}, {transform_indices = @transform_2, window_bounds = array<i64: 128, 128>}, {transform_indices = @transform_3, window_bounds = array<i64: 1, 128>}, {transform_indices = @transform_4, window_bounds = array<i64: 1, 128>}]} {
    %c0 = arith.constant 0 : index
    %c0_0 = arith.constant 0 : index
    %0 = vector.load %arg2[%c0, %c0_0] : memref<128x256xbf16, #tpu.memory_space<vmem>>, vector<128x256xbf16>
    %c0_1 = arith.constant 0 : index
    %c0_2 = arith.constant 0 : index
    %1 = vector.load %arg3[%c0_1, %c0_2] : memref<256x128xbf16, #tpu.memory_space<vmem>>, vector<256x128xbf16>
    %cst = arith.constant dense<0.000000e+00> : vector<128x128xf32>
    %2 = tpu.matmul %0, %1, %cst {dimension_numbers = #tpu.dot_dimension_numbers<[1], [0], [0], [1], [0, 0, 1, 1], [], []>} : vector<128x256xbf16>, vector<256x128xbf16>, vector<128x128xf32> -> vector<128x128xf32>
    %cst_3 = arith.constant dense<0.000000e+00> : vector<128xf32>
    %3 = vector.multi_reduction <add>, %2, %cst_3 [0] : vector<128x128xf32> to vector<128xf32>
    %4 = vector.shape_cast %3 : vector<128xf32> to vector<1x128xf32>
    %c0_4 = arith.constant 0 : index
    %c0_5 = arith.constant 0 : index
    %5 = vector.load %arg5[%c0_4, %c0_5] : memref<1x128xf32, #tpu.memory_space<vmem>>, vector<1x128xf32>
    tpu.vector_store %arg5[%c0_4, %c0_5], %4 {strides = array<i32>} : memref<1x128xf32, #tpu.memory_space<vmem>>, vector<1x128xf32>,
    %6 = arith.mulf %2, %2 : vector<128x128xf32>
    %cst_6 = arith.constant dense<0.000000e+00> : vector<128xf32>
    %7 = vector.multi_reduction <add>, %6, %cst_6 [0] : vector<128x128xf32> to vector<128xf32>
    %8 = vector.shape_cast %7 : vector<128xf32> to vector<1x128xf32>
    %c0_7 = arith.constant 0 : index
    %c0_8 = arith.constant 0 : index
    %9 = vector.load %arg6[%c0_7, %c0_8] : memref<1x128xf32, #tpu.memory_space<vmem>>, vector<1x128xf32>
    tpu.vector_store %arg6[%c0_7, %c0_8], %8 {strides = array<i32>} : memref<1x128xf32, #tpu.memory_space<vmem>>, vector<1x128xf32>,
    %10 = arith.truncf %2 : vector<128x128xf32> to vector<128x128xbf16>
    %c0_9 = arith.constant 0 : index
    %c0_10 = arith.constant 0 : index
    %11 = vector.load %arg4[%c0_9, %c0_10] : memref<128x128xbf16, #tpu.memory_space<vmem>>, vector<128x128xbf16>
    tpu.vector_store %arg4[%c0_9, %c0_10], %10 {strides = array<i32>} : memref<128x128xbf16, #tpu.memory_space<vmem>>, vector<128x128xbf16>,
    return
  }
  func.func @transform_0(%arg0: i32, %arg1: i32) -> (i32, i32) {
    %c0_i32 = arith.constant 0 : i32
    %c0_i32_0 = arith.constant 0 : i32
    return %arg0, %c0_i32 : i32, i32
  }
  func.func @transform_1(%arg0: i32, %arg1: i32) -> (i32, i32) {
    %c0_i32 = arith.constant 0 : i32
    %c0_i32_0 = arith.constant 0 : i32
    return %c0_i32, %arg1 : i32, i32
  }
  func.func @transform_2(%arg0: i32, %arg1: i32) -> (i32, i32) {
    %c0_i32 = arith.constant 0 : i32
    return %arg0, %arg1 : i32, i32
  }
  func.func @transform_3(%arg0: i32, %arg1: i32) -> (i32, i32) {
    %c1_i32 = arith.constant 1 : i32
    %0 = arith.muli %arg0, %c1_i32 : i32
    %1 = arith.addi %0, %arg1 : i32
    %c0_i32 = arith.constant 0 : i32
    %c0_i32_0 = arith.constant 0 : i32
    return %c0_i32, %1 : i32, i32
  }
  func.func @transform_4(%arg0: i32, %arg1: i32) -> (i32, i32) {
    %c1_i32 = arith.constant 1 : i32
    %0 = arith.muli %arg0, %c1_i32 : i32
    %1 = arith.addi %0, %arg1 : i32
    %c0_i32 = arith.constant 0 : i32
    %c0_i32_0 = arith.constant 0 : i32
    return %c0_i32, %1 : i32, i32
  }
}

module attributes {stable_mosaic.version = 11 : i64} {
  func.func @kernel(%arg0: i32, %arg1: i32, %arg2: memref<128x576xbf16, #tpu.memory_space<vmem>>, %arg3: memref<576x128xbf16, #tpu.memory_space<vmem>>, %arg4: memref<128x128xbf16, #tpu.memory_space<vmem>>, %arg5: memref<1x128xf32, #tpu.memory_space<vmem>>, %arg6: memref<1x128xf32, #tpu.memory_space<vmem>>) attributes {dimension_semantics = [#tpu.dimension_semantics<parallel>, #tpu.dimension_semantics<parallel>], iteration_bounds = array<i64: 1, 1>, scalar_prefetch = 0 : i64, scratch_operands = 0 : i64, tpu.core_type = #tpu.core_type<tc>, window_params = [{transform_indices = @transform_0, window_bounds = array<i64: 128, 576>}, {transform_indices = @transform_1, window_bounds = array<i64: 576, 128>}, {transform_indices = @transform_2, window_bounds = array<i64: 128, 128>}, {transform_indices = @transform_3, window_bounds = array<i64: 1, 128>}, {transform_indices = @transform_4, window_bounds = array<i64: 1, 128>}]} {
    %c0 = arith.constant 0 : index
    %c0_0 = arith.constant 0 : index
    %0 = vector.load %arg2[%c0, %c0_0] : memref<128x576xbf16, #tpu.memory_space<vmem>>, vector<128x576xbf16>
    %c0_1 = arith.constant 0 : index
    %c0_2 = arith.constant 0 : index
    %1 = vector.load %arg3[%c0_1, %c0_2] : memref<576x128xbf16, #tpu.memory_space<vmem>>, vector<576x128xbf16>
    %cst = arith.constant dense<0.000000e+00> : vector<128x128xf32>
    %2 = tpu.matmul %0, %1, %cst {dimension_numbers = #tpu.dot_dimension_numbers<[1], [0], [0], [1], [0, 0, 1, 1], [], []>} : vector<128x576xbf16>, vector<576x128xbf16>, vector<128x128xf32> -> vector<128x128xf32>
    %cst_3 = arith.constant dense<0.000000e+00> : vector<128xf32>
    %3 = vector.multi_reduction <add>, %2, %cst_3 [0] : vector<128x128xf32> to vector<128xf32>
    %4 = vector.shape_cast %3 : vector<128xf32> to vector<1x128xf32>
    %c0_4 = arith.constant 0 : index
    %c0_5 = arith.constant 0 : index
    %5 = vector.load %arg5[%c0_4, %c0_5] : memref<1x128xf32, #tpu.memory_space<vmem>>, vector<1x128xf32>
    tpu.vector_store %arg5[%c0_4, %c0_5], %4 {strides = array<i32>} : memref<1x128xf32, #tpu.memory_space<vmem>>, vector<1x128xf32>,
    %6 = arith.mulf %2, %2 : vector<128x128xf32>
    %cst_6 = arith.constant dense<0.000000e+00> : vector<128xf32>
    %7 = vector.multi_reduction <add>, %6, %cst_6 [0] : vector<128x128xf32> to vector<128xf32>
    %8 = vector.shape_cast %7 : vector<128xf32> to vector<1x128xf32>
    %c0_7 = arith.constant 0 : index
    %c0_8 = arith.constant 0 : index
    %9 = vector.load %arg6[%c0_7, %c0_8] : memref<1x128xf32, #tpu.memory_space<vmem>>, vector<1x128xf32>
    tpu.vector_store %arg6[%c0_7, %c0_8], %8 {strides = array<i32>} : memref<1x128xf32, #tpu.memory_space<vmem>>, vector<1x128xf32>,
    %10 = arith.truncf %2 : vector<128x128xf32> to vector<128x128xbf16>
    %c0_9 = arith.constant 0 : index
    %c0_10 = arith.constant 0 : index
    %11 = vector.load %arg4[%c0_9, %c0_10] : memref<128x128xbf16, #tpu.memory_space<vmem>>, vector<128x128xbf16>
    tpu.vector_store %arg4[%c0_9, %c0_10], %10 {strides = array<i32>} : memref<128x128xbf16, #tpu.memory_space<vmem>>, vector<128x128xbf16>,
    return
  }
  func.func @transform_0(%arg0: i32, %arg1: i32) -> (i32, i32) {
    %c0_i32 = arith.constant 0 : i32
    %c0_i32_0 = arith.constant 0 : i32
    return %arg0, %c0_i32 : i32, i32
  }
  func.func @transform_1(%arg0: i32, %arg1: i32) -> (i32, i32) {
    %c0_i32 = arith.constant 0 : i32
    %c0_i32_0 = arith.constant 0 : i32
    return %c0_i32, %arg1 : i32, i32
  }
  func.func @transform_2(%arg0: i32, %arg1: i32) -> (i32, i32) {
    %c0_i32 = arith.constant 0 : i32
    return %arg0, %arg1 : i32, i32
  }
  func.func @transform_3(%arg0: i32, %arg1: i32) -> (i32, i32) {
    %c1_i32 = arith.constant 1 : i32
    %0 = arith.muli %arg0, %c1_i32 : i32
    %1 = arith.addi %0, %arg1 : i32
    %c0_i32 = arith.constant 0 : i32
    %c0_i32_0 = arith.constant 0 : i32
    return %c0_i32, %1 : i32, i32
  }
  func.func @transform_4(%arg0: i32, %arg1: i32) -> (i32, i32) {
    %c1_i32 = arith.constant 1 : i32
    %0 = arith.muli %arg0, %c1_i32 : i32
    %1 = arith.addi %0, %arg1 : i32
    %c0_i32 = arith.constant 0 : i32
    %c0_i32_0 = arith.constant 0 : i32
    return %c0_i32, %1 : i32, i32
  }
}

module attributes {stable_mosaic.version = 11 : i64} {
  func.func @kernel(%arg0: i32, %arg1: i32, %arg2: memref<256x288xbf16, #tpu.memory_space<vmem>>, %arg3: memref<288x128xbf16, #tpu.memory_space<vmem>>, %arg4: memref<256x128xbf16, #tpu.memory_space<vmem>>, %arg5: memref<1x128xf32, #tpu.memory_space<vmem>>, %arg6: memref<1x128xf32, #tpu.memory_space<vmem>>) attributes {dimension_semantics = [#tpu.dimension_semantics<parallel>, #tpu.dimension_semantics<parallel>], iteration_bounds = array<i64: 2, 1>, scalar_prefetch = 0 : i64, scratch_operands = 0 : i64, tpu.core_type = #tpu.core_type<tc>, window_params = [{transform_indices = @transform_0, window_bounds = array<i64: 256, 288>}, {transform_indices = @transform_1, window_bounds = array<i64: 288, 128>}, {transform_indices = @transform_2, window_bounds = array<i64: 256, 128>}, {transform_indices = @transform_3, window_bounds = array<i64: 1, 128>}, {transform_indices = @transform_4, window_bounds = array<i64: 1, 128>}]} {
    %c0 = arith.constant 0 : index
    %c0_0 = arith.constant 0 : index
    %0 = vector.load %arg2[%c0, %c0_0] : memref<256x288xbf16, #tpu.memory_space<vmem>>, vector<256x288xbf16>
    %c0_1 = arith.constant 0 : index
    %c0_2 = arith.constant 0 : index
    %1 = vector.load %arg3[%c0_1, %c0_2] : memref<288x128xbf16, #tpu.memory_space<vmem>>, vector<288x128xbf16>
    %cst = arith.constant dense<0.000000e+00> : vector<256x128xf32>
    %2 = tpu.matmul %0, %1, %cst {dimension_numbers = #tpu.dot_dimension_numbers<[1], [0], [0], [1], [0, 0, 1, 1], [], []>} : vector<256x288xbf16>, vector<288x128xbf16>, vector<256x128xf32> -> vector<256x128xf32>
    %cst_3 = arith.constant dense<0.000000e+00> : vector<128xf32>
    %3 = vector.multi_reduction <add>, %2, %cst_3 [0] : vector<256x128xf32> to vector<128xf32>
    %4 = vector.shape_cast %3 : vector<128xf32> to vector<1x128xf32>
    %c0_4 = arith.constant 0 : index
    %c0_5 = arith.constant 0 : index
    %5 = vector.load %arg5[%c0_4, %c0_5] : memref<1x128xf32, #tpu.memory_space<vmem>>, vector<1x128xf32>
    tpu.vector_store %arg5[%c0_4, %c0_5], %4 {strides = array<i32>} : memref<1x128xf32, #tpu.memory_space<vmem>>, vector<1x128xf32>,
    %6 = arith.mulf %2, %2 : vector<256x128xf32>
    %cst_6 = arith.constant dense<0.000000e+00> : vector<128xf32>
    %7 = vector.multi_reduction <add>, %6, %cst_6 [0] : vector<256x128xf32> to vector<128xf32>
    %8 = vector.shape_cast %7 : vector<128xf32> to vector<1x128xf32>
    %c0_7 = arith.constant 0 : index
    %c0_8 = arith.constant 0 : index
    %9 = vector.load %arg6[%c0_7, %c0_8] : memref<1x128xf32, #tpu.memory_space<vmem>>, vector<1x128xf32>
    tpu.vector_store %arg6[%c0_7, %c0_8], %8 {strides = array<i32>} : memref<1x128xf32, #tpu.memory_space<vmem>>, vector<1x128xf32>,
    %10 = arith.truncf %2 : vector<256x128xf32> to vector<256x128xbf16>
    %c0_9 = arith.constant 0 : index
    %c0_10 = arith.constant 0 : index
    %11 = vector.load %arg4[%c0_9, %c0_10] : memref<256x128xbf16, #tpu.memory_space<vmem>>, vector<256x128xbf16>
    tpu.vector_store %arg4[%c0_9, %c0_10], %10 {strides = array<i32>} : memref<256x128xbf16, #tpu.memory_space<vmem>>, vector<256x128xbf16>,
    return
  }
  func.func @transform_0(%arg0: i32, %arg1: i32) -> (i32, i32) {
    %c0_i32 = arith.constant 0 : i32
    %c0_i32_0 = arith.constant 0 : i32
    return %arg0, %c0_i32 : i32, i32
  }
  func.func @transform_1(%arg0: i32, %arg1: i32) -> (i32, i32) {
    %c0_i32 = arith.constant 0 : i32
    %c0_i32_0 = arith.constant 0 : i32
    return %c0_i32, %arg1 : i32, i32
  }
  func.func @transform_2(%arg0: i32, %arg1: i32) -> (i32, i32) {
    %c0_i32 = arith.constant 0 : i32
    return %arg0, %arg1 : i32, i32
  }
  func.func @transform_3(%arg0: i32, %arg1: i32) -> (i32, i32) {
    %c1_i32 = arith.constant 1 : i32
    %0 = arith.muli %arg0, %c1_i32 : i32
    %1 = arith.addi %0, %arg1 : i32
    %c0_i32 = arith.constant 0 : i32
    %c0_i32_0 = arith.constant 0 : i32
    return %c0_i32, %1 : i32, i32
  }
  func.func @transform_4(%arg0: i32, %arg1: i32) -> (i32, i32) {
    %c1_i32 = arith.constant 1 : i32
    %0 = arith.muli %arg0, %c1_i32 : i32
    %1 = arith.addi %0, %arg1 : i32
    %c0_i32 = arith.constant 0 : i32
    %c0_i32_0 = arith.constant 0 : i32
    return %c0_i32, %1 : i32, i32
  }
}

module attributes {stable_mosaic.version = 11 : i64} {
  func.func @kernel(%arg0: i32, %arg1: i32, %arg2: memref<512x144xbf16, #tpu.memory_space<vmem>>, %arg3: memref<144x128xbf16, #tpu.memory_space<vmem>>, %arg4: memref<1x128xf32, #tpu.memory_space<vmem>>, %arg5: memref<512x128xf32, #tpu.memory_space<vmem>>) attributes {dimension_semantics = [#tpu.dimension_semantics<parallel>, #tpu.dimension_semantics<parallel>], iteration_bounds = array<i64: 4, 1>, scalar_prefetch = 0 : i64, scratch_operands = 0 : i64, tpu.core_type = #tpu.core_type<tc>, window_params = [{transform_indices = @transform_0, window_bounds = array<i64: 512, 144>}, {transform_indices = @transform_1, window_bounds = array<i64: 144, 128>}, {transform_indices = @transform_2, window_bounds = array<i64: 1, 128>}, {transform_indices = @transform_3, window_bounds = array<i64: 512, 128>}]} {
    %c0 = arith.constant 0 : index
    %c0_0 = arith.constant 0 : index
    %0 = vector.load %arg2[%c0, %c0_0] : memref<512x144xbf16, #tpu.memory_space<vmem>>, vector<512x144xbf16>
    %c0_1 = arith.constant 0 : index
    %c0_2 = arith.constant 0 : index
    %1 = vector.load %arg3[%c0_1, %c0_2] : memref<144x128xbf16, #tpu.memory_space<vmem>>, vector<144x128xbf16>
    %cst = arith.constant dense<0.000000e+00> : vector<512x128xf32>
    %2 = tpu.matmul %0, %1, %cst {dimension_numbers = #tpu.dot_dimension_numbers<[1], [0], [0], [1], [0, 0, 1, 1], [], []>} : vector<512x144xbf16>, vector<144x128xbf16>, vector<512x128xf32> -> vector<512x128xf32>
    %c0_3 = arith.constant 0 : index
    %c0_4 = arith.constant 0 : index
    %3 = vector.load %arg4[%c0_3, %c0_4] : memref<1x128xf32, #tpu.memory_space<vmem>>, vector<1x128xf32>
    %4 = vector.broadcast %3 : vector<1x128xf32> to vector<512x128xf32>
    %5 = arith.addf %2, %4 : vector<512x128xf32>
    %6 = math.tanh %5 : vector<512x128xf32>
    %c0_5 = arith.constant 0 : index
    %c0_6 = arith.constant 0 : index
    %7 = vector.load %arg5[%c0_5, %c0_6] : memref<512x128xf32, #tpu.memory_space<vmem>>, vector<512x128xf32>
    tpu.vector_store %arg5[%c0_5, %c0_6], %6 {strides = array<i32>} : memref<512x128xf32, #tpu.memory_space<vmem>>, vector<512x128xf32>,
    return
  }
  func.func @transform_0(%arg0: i32, %arg1: i32) -> (i32, i32) {
    %c0_i32 = arith.constant 0 : i32
    %c0_i32_0 = arith.constant 0 : i32
    return %arg0, %c0_i32 : i32, i32
  }
  func.func @transform_1(%arg0: i32, %arg1: i32) -> (i32, i32) {
    %c0_i32 = arith.constant 0 : i32
    %c0_i32_0 = arith.constant 0 : i32
    return %c0_i32, %arg1 : i32, i32
  }
  func.func @transform_2(%arg0: i32, %arg1: i32) -> (i32, i32) {
    %c0_i32 = arith.constant 0 : i32
    %c0_i32_0 = arith.constant 0 : i32
    return %c0_i32, %arg1 : i32, i32
  }
  func.func @transform_3(%arg0: i32, %arg1: i32) -> (i32, i32) {
    %c0_i32 = arith.constant 0 : i32
    return %arg0, %arg1 : i32, i32
  }
}

</mosaic_0001>

<bundles_post_ra>
// kernel: apply_unet.6
= control target key start
LH: loop header
LB: loop body
LE: loop exit
PB: predicated region body
PF: predicated region fallthrough
CT: control target
= control target key end

     0   :  { %7 = vsyncpa [#allocation3], 0  ;;  %s1424_s9 = smov 0   ;;  %s1426_s10 = smov 0   ;;  %s1568_s0 = inlined_call_operand.vmem [shape: bf16[2048,16], index: 0, kind: input, shape index: {}]   ;;  %s1569_s1 = inlined_call_operand.hbm [shape: bf16[16,128], index: 1, kind: input, shape index: {}]   ;;  %s1570_s2 = inlined_call_operand.vmem [shape: bf16[2048,128], index: 2, kind: output, shape index: {}]  }
   0x1   :  { %s1428_s11 = smov 0  }
   0x2 LB: > { %s907_s12 = sadd.s32 4294967295, %s1404_s11   ;;  %s25_s13 = sadd.s32 1, %s1400_s10  ;;  %s1404_s11 = sphi %s1428_s11, %s13_s11   ;;  %s1400_s10 = sphi %s1426_s10, %s1572_s10   ;;  %s1396_s9 = sphi %s1424_s9, %s1571_s9  }
   0x3   : > { %p27_p0 = scmp.ge.s32.totalorder %s25_s13, 4  ;;  %p909_p1 = scmp.ge.s32.totalorder %s1404_s11, 1 }
   0x4   : > { %p110_p2 = scmp.lt.s32.totalorder %s1404_s11, 5  ;;  %p1319_p4 = scmp.eq.s32.totalorder %s907_s12, 0 }
   0x5   : > { %s1574_s13 = smov (%p27_p0, %s25_s13), 0  ;;  %s123_s16 = sshll.u32 %s1569_s1, 4  ;;  %s124_s16 = int_to_ptr.hbm [resolvable:$true] %s123_s16 }
   0x6   : > { %p111_p3 = pnand %p909_p1, %p110_p2  ;;  %s1406_s17 = smov [#allocation2]  }
   0x7   : > { %s125_s18 = sshll.u32 %s1406_s17, 4  ;;  %s1407_s19 = smov 64   ;;  %s126_s18 = int_to_ptr.vmem [resolvable:$true] %s125_s18 }
   0x8   : > { %p1315_p5 = pneg %p111_p3  ;;  %s1408_s20 = smov 4  }
   0x9   : > { %150 = sbr.rel (%p111_p3) target bundleno = 280 (0x118), region = 28 }
   0xa   : > { %p1316_p6 = pnand %p1319_p4, %p1315_p5 }
   0xc   : > { %1318 = dma.hbm_to_vmem [thread:$0]  (!%p1316_p6), %s124_s16, 128, %s126_s18, [#allocation3], %s1407_s19, %s1407_s19, %s1408_s20  }
   0xe   : > { %1391 = dma.done.wait (%p1319_p4), [#allocation3], 128  }
   0xf   : > { %1393 = vsyncadd (%p1319_p4), [#allocation3], 4294967168  ;;  %s914_s21 = sshll.u32 %s1396_s9, 6  ;;  %v1116_v0 = vld [vmem:[#allocation2] sm:$0xff]  ;;  %vm424_vm0 = vcmask 130048  }
  0x10   : > { %p177_p7 = scmp.lt.s32.totalorder %s914_s21, 255  ;;  %528 = vmatpush.bf16.msra.mxu0 %v1116_v0  ;;  %1308 = vmatpush.bf16.msra.mxu1 %v1116_v0 }
  0x11   : > { %1309 = vmatpush.bf16.msra.mxu2 %v1116_v0  ;;  %1310 = vmatpush.bf16.msra.mxu3 %v1116_v0 }
  0x12   : > { %s1576_s21 = smov (!%p177_p7, %s914_s21), 255 }
  0x13   : > { %s915_s22 = sshll.u32 %s1576_s21, 2 }
  0x14   : > { %s1454_s25 = scalar_lea.vmem %s1568_s0, %s915_s22  ;;  %s1525_s28 = scalar_lea.vmem %s1570_s2, %s915_s22 }
  0x15   : > { %v1084_v1 = vld [vmem:[%s1454_s25] sm:$0xff]  ;;  %v1085_v5 = vld [vmem:[%s1454_s25 + $0x8] sm:$0xff]  ;;  %v1086_v9 = vld [vmem:[%s1454_s25 + $0x10] sm:$0xff] }
  0x16   : > { %v1092_v2 = vld [vmem:[%s1454_s25 + $0x40] sm:$0xff]  ;;  %1050 = vmatmul.msk.bf16.vlgmr.msra.gmra.mxu0 %vm424_vm0, %v1084_v1  ;;  %v1093_v6 = vld [vmem:[%s1454_s25 + $0x48] sm:$0xff]  ;;  %v1094_v10 = vld [vmem:[%s1454_s25 + $0x50] sm:$0xff] }
  0x17   : > { %v1100_v3 = vld [vmem:[%s1454_s25 + $0x80] sm:$0xff]  ;;  %1058 = vmatmul.msk.bf16.vlgmr.msra.gmra.mxu1 %vm424_vm0, %v1092_v2  ;;  %v1101_v7 = vld [vmem:[%s1454_s25 + $0x88] sm:$0xff]  ;;  %v1102_v11 = vld [vmem:[%s1454_s25 + $0x90] sm:$0xff] }
  0x18   : > { %v1108_v4 = vld [vmem:[%s1454_s25 + $0xc0] sm:$0xff]  ;;  %1066 = vmatmul.msk.bf16.vlgmr.msra.gmra.mxu2 %vm424_vm0, %v1100_v3  ;;  %v1109_v8 = vld [vmem:[%s1454_s25 + $0xc8] sm:$0xff]  ;;  %v1110_v12 = vld [vmem:[%s1454_s25 + $0xd0] sm:$0xff] }
  0x19   : > { %1074 = vmatmul.msk.bf16.vlgmr.msra.gmra.mxu3 %vm424_vm0, %v1108_v4  ;;  %v1087_v13 = vld [vmem:[%s1454_s25 + $0x18] sm:$0xff]  ;;  %v1088_v17 = vld [vmem:[%s1454_s25 + $0x20] sm:$0xff]  ;;  %v1089_v21 = vld [vmem:[%s1454_s25 + $0x28] sm:$0xff] }
  0x1a   : > { %v1095_v14 = vld [vmem:[%s1454_s25 + $0x58] sm:$0xff]  ;;  %v1096_v18 = vld [vmem:[%s1454_s25 + $0x60] sm:$0xff]  ;;  %v1097_v22 = vld [vmem:[%s1454_s25 + $0x68] sm:$0xff] }
  0x1b   : > { %v1103_v15 = vld [vmem:[%s1454_s25 + $0x98] sm:$0xff]  ;;  %v1104_v19 = vld [vmem:[%s1454_s25 + $0xa0] sm:$0xff]  ;;  %v1105_v23 = vld [vmem:[%s1454_s25 + $0xa8] sm:$0xff] }
  0x1c   : > { %v1111_v16 = vld [vmem:[%s1454_s25 + $0xd8] sm:$0xff]  ;;  %v1112_v20 = vld [vmem:[%s1454_s25 + $0xe0] sm:$0xff]  ;;  %v1113_v24 = vld [vmem:[%s1454_s25 + $0xe8] sm:$0xff] }
  0x1d   : > { %v1090_v25 = vld [vmem:[%s1454_s25 + $0x30] sm:$0xff]  ;;  %v1091_v29 = vld [vmem:[%s1454_s25 + $0x38] sm:$0xff] }
  0x1e   : > { %v1098_v26 = vld [vmem:[%s1454_s25 + $0x70] sm:$0xff]  ;;  %v1099_v30 = vld [vmem:[%s1454_s25 + $0x78] sm:$0xff] }
  0x1f   : > { %v1106_v27 = vld [vmem:[%s1454_s25 + $0xb0] sm:$0xff]  ;;  %v1107_v31 = vld [vmem:[%s1454_s25 + $0xb8] sm:$0xff] }
  0x20   : > { %v1114_v28 = vld [vmem:[%s1454_s25 + $0xf0] sm:$0xff]  ;;  %v1115_v32 = vld [vmem:[%s1454_s25 + $0xf8] sm:$0xff] }
  0x26   : > { %1051 = vmatmul.msk.bf16.gmra.mxu0 %vm424_vm0, %v1085_v5 }
  0x27   : > { %1059 = vmatmul.msk.bf16.gmra.mxu1 %vm424_vm0, %v1093_v6 }
  0x28   : > { %1067 = vmatmul.msk.bf16.gmra.mxu2 %vm424_vm0, %v1101_v7 }
  0x29   : > { %1075 = vmatmul.msk.bf16.gmra.mxu3 %vm424_vm0, %v1109_v8 }
  0x36   : > { %1052 = vmatmul.msk.bf16.gmra.mxu0 %vm424_vm0, %v1086_v9 }
  0x37   : > { %1060 = vmatmul.msk.bf16.gmra.mxu1 %vm424_vm0, %v1094_v10 }
  0x38   : > { %1068 = vmatmul.msk.bf16.gmra.mxu2 %vm424_vm0, %v1102_v11 }
  0x39   : > { %1076 = vmatmul.msk.bf16.gmra.mxu3 %vm424_vm0, %v1110_v12 }
  0x46   : > { %1053 = vmatmul.msk.bf16.gmra.mxu0 %vm424_vm0, %v1087_v13 }
  0x47   : > { %1061 = vmatmul.msk.bf16.gmra.mxu1 %vm424_vm0, %v1095_v14 }
  0x48   : > { %1069 = vmatmul.msk.bf16.gmra.mxu2 %vm424_vm0, %v1103_v15 }
  0x49   : > { %1077 = vmatmul.msk.bf16.gmra.mxu3 %vm424_vm0, %v1111_v16 }
  0x56   : > { %1054 = vmatmul.msk.bf16.gmra.mxu0 %vm424_vm0, %v1088_v17 }
  0x57   : > { %1062 = vmatmul.msk.bf16.gmra.mxu1 %vm424_vm0, %v1096_v18 }
  0x58   : > { %1070 = vmatmul.msk.bf16.gmra.mxu2 %vm424_vm0, %v1104_v19 }
  0x59   : > { %1078 = vmatmul.msk.bf16.gmra.mxu3 %vm424_vm0, %v1112_v20 }
  0x66   : > { %1055 = vmatmul.msk.bf16.gmra.mxu0 %vm424_vm0, %v1089_v21 }
  0x67   : > { %1063 = vmatmul.msk.bf16.gmra.mxu1 %vm424_vm0, %v1097_v22 }
  0x68   : > { %1071 = vmatmul.msk.bf16.gmra.mxu2 %vm424_vm0, %v1105_v23 }
  0x69   : > { %1079 = vmatmul.msk.bf16.gmra.mxu3 %vm424_vm0, %v1113_v24 }
  0x76   : > { %1056 = vmatmul.msk.bf16.gmra.mxu0 %vm424_vm0, %v1090_v25 }
  0x77   : > { %1064 = vmatmul.msk.bf16.gmra.mxu1 %vm424_vm0, %v1098_v26 }
  0x78   : > { %1072 = vmatmul.msk.bf16.gmra.mxu2 %vm424_vm0, %v1106_v27 }
  0x79   : > { %1080 = vmatmul.msk.bf16.gmra.mxu3 %vm424_vm0, %v1114_v28 }
  0x86   : > { %1057 = vmatmul.msk.bf16.gmra.mxu0 %vm424_vm0, %v1091_v29 }
  0x87   : > { %1065 = vmatmul.msk.bf16.gmra.mxu1 %vm424_vm0, %v1099_v30 }
  0x88   : > { %1073 = vmatmul.msk.bf16.gmra.mxu2 %vm424_vm0, %v1107_v31 }
  0x89   : > { %1081 = vmatmul.msk.bf16.gmra.mxu3 %vm424_vm0, %v1115_v32 }
  0x93   : > { %v530_v33 = vpop.f32.mrf.mxu0 }
  0x94   : > { %v570_v34 = vpop.f32.mrf.mxu1 }
  0x9b   : > { %v610_v35 = vpop.f32.mrf.mxu2  ;;  %v532_v37 = vpop.f32.mrf.mxu0 }
  0x9c   : > { %v650_v36 = vpop.f32.mrf.mxu3  ;;  %v572_v38 = vpop.f32.mrf.mxu1  ;;  %v1120_v39 = vpack.c.bf16 %v532_v37, %v530_v33 }
  0x9d   : > { %v1160_v40 = vpack.c.bf16 %v572_v38, %v570_v34 }
  0x9e   : > { %1121 = vst [vmem:[%s1525_s28] sm:$0xff] %v1120_v39  }
  0x9f   : > { %1284 = vst [vmem:[%s1525_s28 + $0x40] sm:$0xff] %v1160_v40  }
  0xa3   : > { %v612_v41 = vpop.f32.mrf.mxu2  ;;  %v535_v45 = vpop.f32.mrf.mxu0 }
  0xa4   : > { %v652_v42 = vpop.f32.mrf.mxu3  ;;  %v1200_v43 = vpack.c.bf16 %v612_v41, %v610_v35  ;;  %v575_v46 = vpop.f32.mrf.mxu1 }
  0xa5   : > { %v1240_v44 = vpack.c.bf16 %v652_v42, %v650_v36 }
  0xa6   : > { %1292 = vst [vmem:[%s1525_s28 + $0x80] sm:$0xff] %v1200_v43  }
  0xa7   : > { %1300 = vst [vmem:[%s1525_s28 + $0xc0] sm:$0xff] %v1240_v44  }
  0xab   : > { %v615_v47 = vpop.f32.mrf.mxu2  ;;  %v537_v49 = vpop.f32.mrf.mxu0 }
  0xac   : > { %v655_v48 = vpop.f32.mrf.mxu3  ;;  %v577_v50 = vpop.f32.mrf.mxu1  ;;  %v1125_v51 = vpack.c.bf16 %v537_v49, %v535_v45 }
  0xad   : > { %v1165_v52 = vpack.c.bf16 %v577_v50, %v575_v46 }
  0xae   : > { %1277 = vst [vmem:[%s1525_s28 + $0x8] sm:$0xff] %v1125_v51  }
  0xaf   : > { %1285 = vst [vmem:[%s1525_s28 + $0x48] sm:$0xff] %v1165_v52  }
  0xb3   : > { %v617_v53 = vpop.f32.mrf.mxu2  ;;  %v540_v57 = vpop.f32.mrf.mxu0 }
  0xb4   : > { %v657_v54 = vpop.f32.mrf.mxu3  ;;  %v1205_v55 = vpack.c.bf16 %v617_v53, %v615_v47  ;;  %v580_v58 = vpop.f32.mrf.mxu1 }
  0xb5   : > { %v1245_v56 = vpack.c.bf16 %v657_v54, %v655_v48 }
  0xb6   : > { %1293 = vst [vmem:[%s1525_s28 + $0x88] sm:$0xff] %v1205_v55  }
  0xb7   : > { %1301 = vst [vmem:[%s1525_s28 + $0xc8] sm:$0xff] %v1245_v56  }
  0xbb   : > { %v620_v59 = vpop.f32.mrf.mxu2  ;;  %v542_v61 = vpop.f32.mrf.mxu0 }
  0xbc   : > { %v660_v60 = vpop.f32.mrf.mxu3  ;;  %v582_v62 = vpop.f32.mrf.mxu1  ;;  %v1130_v63 = vpack.c.bf16 %v542_v61, %v540_v57 }
  0xbd   : > { %v1170_v0 = vpack.c.bf16 %v582_v62, %v580_v58 }
  0xbe   : > { %1278 = vst [vmem:[%s1525_s28 + $0x10] sm:$0xff] %v1130_v63  }
  0xbf   : > { %1286 = vst [vmem:[%s1525_s28 + $0x50] sm:$0xff] %v1170_v0  }
  0xc3   : > { %v622_v1 = vpop.f32.mrf.mxu2  ;;  %v545_v5 = vpop.f32.mrf.mxu0 }
  0xc4   : > { %v662_v2 = vpop.f32.mrf.mxu3  ;;  %v1210_v3 = vpack.c.bf16 %v622_v1, %v620_v59  ;;  %v585_v6 = vpop.f32.mrf.mxu1 }
  0xc5   : > { %v1250_v4 = vpack.c.bf16 %v662_v2, %v660_v60 }
  0xc6   : > { %1294 = vst [vmem:[%s1525_s28 + $0x90] sm:$0xff] %v1210_v3  }
  0xc7   : > { %1302 = vst [vmem:[%s1525_s28 + $0xd0] sm:$0xff] %v1250_v4  }
  0xcb   : > { %v625_v7 = vpop.f32.mrf.mxu2  ;;  %v547_v9 = vpop.f32.mrf.mxu0 }
  0xcc   : > { %v665_v8 = vpop.f32.mrf.mxu3  ;;  %v587_v10 = vpop.f32.mrf.mxu1  ;;  %v1135_v11 = vpack.c.bf16 %v547_v9, %v545_v5 }
  0xcd   : > { %v1175_v12 = vpack.c.bf16 %v587_v10, %v585_v6 }
  0xce   : > { %1279 = vst [vmem:[%s1525_s28 + $0x18] sm:$0xff] %v1135_v11  }
  0xcf   : > { %1287 = vst [vmem:[%s1525_s28 + $0x58] sm:$0xff] %v1175_v12  }
  0xd3   : > { %v627_v13 = vpop.f32.mrf.mxu2  ;;  %v550_v17 = vpop.f32.mrf.mxu0 }
  0xd4   : > { %v667_v14 = vpop.f32.mrf.mxu3  ;;  %v1215_v15 = vpack.c.bf16 %v627_v13, %v625_v7  ;;  %v590_v18 = vpop.f32.mrf.mxu1 }
  0xd5   : > { %v1255_v16 = vpack.c.bf16 %v667_v14, %v665_v8 }
  0xd6   : > { %1295 = vst [vmem:[%s1525_s28 + $0x98] sm:$0xff] %v1215_v15  }
  0xd7   : > { %1303 = vst [vmem:[%s1525_s28 + $0xd8] sm:$0xff] %v1255_v16  }
  0xdb   : > { %v630_v19 = vpop.f32.mrf.mxu2  ;;  %v552_v21 = vpop.f32.mrf.mxu0 }
  0xdc   : > { %v670_v20 = vpop.f32.mrf.mxu3  ;;  %v592_v22 = vpop.f32.mrf.mxu1  ;;  %v1140_v23 = vpack.c.bf16 %v552_v21, %v550_v17 }
  0xdd   : > { %v1180_v24 = vpack.c.bf16 %v592_v22, %v590_v18 }
  0xde   : > { %1280 = vst [vmem:[%s1525_s28 + $0x20] sm:$0xff] %v1140_v23  }
  0xdf   : > { %1288 = vst [vmem:[%s1525_s28 + $0x60] sm:$0xff] %v1180_v24  }
  0xe3   : > { %v632_v25 = vpop.f32.mrf.mxu2  ;;  %v555_v29 = vpop.f32.mrf.mxu0 }
  0xe4   : > { %v672_v26 = vpop.f32.mrf.mxu3  ;;  %v1220_v27 = vpack.c.bf16 %v632_v25, %v630_v19  ;;  %v595_v30 = vpop.f32.mrf.mxu1 }
  0xe5   : > { %v1260_v28 = vpack.c.bf16 %v672_v26, %v670_v20 }
  0xe6   : > { %1296 = vst [vmem:[%s1525_s28 + $0xa0] sm:$0xff] %v1220_v27  }
  0xe7   : > { %1304 = vst [vmem:[%s1525_s28 + $0xe0] sm:$0xff] %v1260_v28  }
  0xeb   : > { %v635_v31 = vpop.f32.mrf.mxu2  ;;  %v557_v33 = vpop.f32.mrf.mxu0 }
  0xec   : > { %v675_v32 = vpop.f32.mrf.mxu3  ;;  %v597_v34 = vpop.f32.mrf.mxu1  ;;  %v1145_v35 = vpack.c.bf16 %v557_v33, %v555_v29 }
  0xed   : > { %v1185_v36 = vpack.c.bf16 %v597_v34, %v595_v30 }
  0xee   : > { %1281 = vst [vmem:[%s1525_s28 + $0x28] sm:$0xff] %v1145_v35  }
  0xef   : > { %1289 = vst [vmem:[%s1525_s28 + $0x68] sm:$0xff] %v1185_v36  }
  0xf3   : > { %v637_v37 = vpop.f32.mrf.mxu2  ;;  %v560_v41 = vpop.f32.mrf.mxu0 }
  0xf4   : > { %v677_v38 = vpop.f32.mrf.mxu3  ;;  %v1225_v39 = vpack.c.bf16 %v637_v37, %v635_v31  ;;  %v600_v42 = vpop.f32.mrf.mxu1 }
  0xf5   : > { %v1265_v40 = vpack.c.bf16 %v677_v38, %v675_v32 }
  0xf6   : > { %1297 = vst [vmem:[%s1525_s28 + $0xa8] sm:$0xff] %v1225_v39  }
  0xf7   : > { %1305 = vst [vmem:[%s1525_s28 + $0xe8] sm:$0xff] %v1265_v40  }
  0xfb   : > { %v640_v43 = vpop.f32.mrf.mxu2  ;;  %v562_v45 = vpop.f32.mrf.mxu0 }
  0xfc   : > { %v680_v44 = vpop.f32.mrf.mxu3  ;;  %v602_v46 = vpop.f32.mrf.mxu1  ;;  %v1150_v47 = vpack.c.bf16 %v562_v45, %v560_v41 }
  0xfd   : > { %v1190_v48 = vpack.c.bf16 %v602_v46, %v600_v42 }
  0xfe   : > { %1282 = vst [vmem:[%s1525_s28 + $0x30] sm:$0xff] %v1150_v47  }
  0xff   : > { %1290 = vst [vmem:[%s1525_s28 + $0x70] sm:$0xff] %v1190_v48  }
 0x103   : > { %v642_v49 = vpop.f32.mrf.mxu2  ;;  %v565_v53 = vpop.f32.mrf.mxu0 }
 0x104   : > { %v682_v50 = vpop.f32.mrf.mxu3  ;;  %v1230_v51 = vpack.c.bf16 %v642_v49, %v640_v43  ;;  %v605_v54 = vpop.f32.mrf.mxu1 }
 0x105   : > { %v1270_v52 = vpack.c.bf16 %v682_v50, %v680_v44 }
 0x106   : > { %1298 = vst [vmem:[%s1525_s28 + $0xb0] sm:$0xff] %v1230_v51  }
 0x107   : > { %1306 = vst [vmem:[%s1525_s28 + $0xf0] sm:$0xff] %v1270_v52  }
 0x10b   : > { %v645_v55 = vpop.f32.mrf.mxu2  ;;  %v567_v57 = vpop.f32.mrf.mxu0 }
 0x10c   : > { %v685_v56 = vpop.f32.mrf.mxu3  ;;  %v607_v58 = vpop.f32.mrf.mxu1  ;;  %v1155_v59 = vpack.c.bf16 %v567_v57, %v565_v53 }
 0x10d   : > { %v1195_v60 = vpack.c.bf16 %v607_v58, %v605_v54 }
 0x10e   : > { %1283 = vst [vmem:[%s1525_s28 + $0x38] sm:$0xff] %v1155_v59  }
 0x10f   : > { %1291 = vst [vmem:[%s1525_s28 + $0x78] sm:$0xff] %v1195_v60  }
 0x113   : > { %v647_v61 = vpop.f32.mrf.mxu2 }
 0x114   : > { %v687_v62 = vpop.f32.mrf.mxu3  ;;  %v1235_v63 = vpack.c.bf16 %v647_v61, %v645_v55 }
 0x115   : > { %v1275_v0 = vpack.c.bf16 %v687_v62, %v685_v56 }
 0x116   : > { %1299 = vst [vmem:[%s1525_s28 + $0xb8] sm:$0xff] %v1235_v63  }
 0x117   : > { %1307 = vst [vmem:[%s1525_s28 + $0xf8] sm:$0xff] %v1275_v0  }
 0x118 PF: > { %s13_s11 = sadd.s32 1, %s1404_s11   ;;  %s1571_s9 = smov %s1400_s10 }
 0x119   : > { %p10_p8 = scmp.ge.s32.totalorder %s13_s11, 6   ;;  %s1572_s10 = smov %s1574_s13 }
 0x11b   :  { %12 = sbr.rel (!%p10_p8) target bundleno = 2 (0x2), region = 64 }
 0x120   :  { %846 = vsyncpa [#allocation3], 1 }
 0x121   :  { %848 = vsyncpa [#allocation3 + $0x1], 1 }

// kernel: apply_unet.7
= control target key start
LH: loop header
LB: loop body
LE: loop exit
PB: predicated region body
PF: predicated region fallthrough
CT: control target
= control target key end

     0   :  { %s1188_s15 = smov 0   ;;  %s1190_s16 = smov 0   ;;  %s1413_s0 = inlined_call_operand.vmem [shape: bf16[512,128], index: 0, kind: input, shape index: {}]   ;;  %s1414_s1 = inlined_call_operand.vmem [shape: bf16[128,128], index: 1, kind: input, shape index: {}]   ;;  %s1415_s2 = inlined_call_operand.vmem [shape: bf16[512,128], index: 2, kind: output, shape index: {0}]   ;;  %s1416_s3 = inlined_call_operand.vmem [shape: f32[1,256], index: 3, kind: output, shape index: {1}]   ;;  %s1417_s4 = inlined_call_operand.vmem [shape: f32[1,256], index: 4, kind: output, shape index: {2}]  }
   0x1   :  { %s1192_s17 = smov 0  }
   0x2 LB: > { %s27_s18 = sadd.s32 1, %s1157_s16  ;;  %p869_p0 = scmp.ge.s32.totalorder %s1161_s17, 1  ;;  %s1161_s17 = sphi %s1192_s17, %s15_s17   ;;  %s1157_s16 = sphi %s1190_s16, %s1419_s16   ;;  %s1153_s15 = sphi %s1188_s15, %s1418_s15  }
   0x3   : > { %p29_p1 = scmp.ge.s32.totalorder %s27_s18, 2  ;;  %p195_p2 = scmp.lt.s32.totalorder %s1161_s17, 3 }
   0x5   : > { %s1421_s18 = smov (%p29_p1, %s27_s18), 0  ;;  %p196_p3 = pnand %p869_p0, %p195_p2 }
   0x6   : > { %s870_s27 = sshll.u32 (!%p196_p3), %s1153_s15, 5  ;;  %p256_p5 = scmp.lt.s32.totalorder (!%p196_p3), %s1153_s15, 1 }
   0x7   : > { %199 = sbr.rel (%p196_p3) target bundleno = 291 (0x123), region = 28  ;;  %p237_p4 = scmp.lt.s32.totalorder (!%p196_p3), %s870_s27, 63 }
   0xc   : > { %v995_v0 = vld [vmem:[%s1414_s1 + $0x38] sm:$0xff]  ;;  %v994_v1 = vld [vmem:[%s1414_s1 + $0x30] sm:$0xff]  ;;  %v993_v2 = vld [vmem:[%s1414_s1 + $0x28] sm:$0xff]  ;;  %s1423_s27 = smov (!%p237_p4, %s870_s27), 63  ;;  %s1425_s15 = smov (!%p256_p5, %s1153_s15), 1 }
   0xd   : > { %457 = vmatpush.bf16.msra.mxu0 %v995_v0  ;;  %1091 = vmatpush.bf16.msra.mxu1 %v995_v0  ;;  %v992_v3 = vld [vmem:[%s1414_s1 + $0x20] sm:$0xff]  ;;  %v991_v4 = vld [vmem:[%s1414_s1 + $0x18] sm:$0xff]  ;;  %v990_v5 = vld [vmem:[%s1414_s1 + $0x10] sm:$0xff]  ;;  %s871_s8 = sshll.u32 %s1423_s27, 2  ;;  %s258_s23 = scalar_lea.vmem %s1416_s3, %s1425_s15 }
   0xe   : > { %1092 = vmatpush.bf16.msra.mxu2 %v995_v0  ;;  %1093 = vmatpush.bf16.msra.mxu3 %v995_v0  ;;  %v989_v6 = vld [vmem:[%s1414_s1 + $0x8] sm:$0xff]  ;;  %v988_v7 = vld [vmem:[%s1414_s1] sm:$0xff]  ;;  %s1241_s13 = scalar_lea.vmem %s1413_s0, %s871_s8  ;;  %s1268_s20 = scalar_lea.vmem %s1415_s2, %s871_s8 }
   0xf   : > { %v972_v8 = vld [vmem:[%s1241_s13] sm:$0xff]  ;;  %v973_v12 = vld [vmem:[%s1241_s13 + $0x8] sm:$0xff]  ;;  %v974_v16 = vld [vmem:[%s1241_s13 + $0x10] sm:$0xff]  ;;  %s263_s26 = scalar_lea.vmem %s1417_s4, %s1425_s15 }
  0x10   : > { %v976_v9 = vld [vmem:[%s1241_s13 + $0x20] sm:$0xff]  ;;  %v977_v13 = vld [vmem:[%s1241_s13 + $0x28] sm:$0xff]  ;;  %v978_v17 = vld [vmem:[%s1241_s13 + $0x30] sm:$0xff] }
  0x11   : > { %458 = vmatpush.bf16.msra.mxu0 %v994_v1  ;;  %1094 = vmatpush.bf16.msra.mxu1 %v994_v1  ;;  %v980_v10 = vld [vmem:[%s1241_s13 + $0x40] sm:$0xff]  ;;  %v981_v14 = vld [vmem:[%s1241_s13 + $0x48] sm:$0xff]  ;;  %v982_v18 = vld [vmem:[%s1241_s13 + $0x50] sm:$0xff] }
  0x12   : > { %1095 = vmatpush.bf16.msra.mxu2 %v994_v1  ;;  %1096 = vmatpush.bf16.msra.mxu3 %v994_v1  ;;  %v984_v11 = vld [vmem:[%s1241_s13 + $0x60] sm:$0xff]  ;;  %v985_v15 = vld [vmem:[%s1241_s13 + $0x68] sm:$0xff]  ;;  %v986_v19 = vld [vmem:[%s1241_s13 + $0x70] sm:$0xff] }
  0x13   : > { %v975_v20 = vld [vmem:[%s1241_s13 + $0x18] sm:$0xff] }
  0x14   : > { %v979_v21 = vld [vmem:[%s1241_s13 + $0x38] sm:$0xff] }
  0x15   : > { %459 = vmatpush.bf16.msra.mxu0 %v993_v2  ;;  %1097 = vmatpush.bf16.msra.mxu1 %v993_v2  ;;  %v983_v22 = vld [vmem:[%s1241_s13 + $0x58] sm:$0xff] }
  0x16   : > { %1098 = vmatpush.bf16.msra.mxu2 %v993_v2  ;;  %1099 = vmatpush.bf16.msra.mxu3 %v993_v2  ;;  %v987_v23 = vld [vmem:[%s1241_s13 + $0x78] sm:$0xff] }
  0x19   : > { %460 = vmatpush.bf16.msra.mxu0 %v992_v3  ;;  %1100 = vmatpush.bf16.msra.mxu1 %v992_v3 }
  0x1a   : > { %1101 = vmatpush.bf16.msra.mxu2 %v992_v3  ;;  %1102 = vmatpush.bf16.msra.mxu3 %v992_v3 }
  0x1d   : > { %461 = vmatpush.bf16.msra.mxu0 %v991_v4  ;;  %1103 = vmatpush.bf16.msra.mxu1 %v991_v4 }
  0x1e   : > { %1104 = vmatpush.bf16.msra.mxu2 %v991_v4  ;;  %1105 = vmatpush.bf16.msra.mxu3 %v991_v4 }
  0x21   : > { %462 = vmatpush.bf16.msra.mxu0 %v990_v5  ;;  %1106 = vmatpush.bf16.msra.mxu1 %v990_v5 }
  0x22   : > { %1107 = vmatpush.bf16.msra.mxu2 %v990_v5  ;;  %1108 = vmatpush.bf16.msra.mxu3 %v990_v5 }
  0x25   : > { %463 = vmatpush.bf16.msra.mxu0 %v989_v6  ;;  %1109 = vmatpush.bf16.msra.mxu1 %v989_v6 }
  0x26   : > { %1110 = vmatpush.bf16.msra.mxu2 %v989_v6  ;;  %1111 = vmatpush.bf16.msra.mxu3 %v989_v6 }
  0x29   : > { %464 = vmatpush.bf16.msra.mxu0 %v988_v7  ;;  %1112 = vmatpush.bf16.msra.mxu1 %v988_v7 }
  0x2a   : > { %1113 = vmatpush.bf16.msra.mxu2 %v988_v7  ;;  %1114 = vmatpush.bf16.msra.mxu3 %v988_v7 }
  0x2c   : > { %465 = vmatmul.bf16.vlgmr.msra.gmra.mxu0 %v972_v8  ;;  %485 = vmatmul.bf16.vlgmr.msra.gmra.mxu1 %v976_v9 }
  0x2d   : > { %505 = vmatmul.bf16.vlgmr.msra.gmra.mxu2 %v980_v10  ;;  %525 = vmatmul.bf16.vlgmr.msra.gmra.mxu3 %v984_v11 }
  0x3c   : > { %470 = vmatmul.bf16.gmra.mxu0 %v973_v12  ;;  %490 = vmatmul.bf16.gmra.mxu1 %v977_v13 }
  0x3d   : > { %510 = vmatmul.bf16.gmra.mxu2 %v981_v14  ;;  %530 = vmatmul.bf16.gmra.mxu3 %v985_v15 }
  0x4c   : > { %475 = vmatmul.bf16.gmra.mxu0 %v974_v16  ;;  %495 = vmatmul.bf16.gmra.mxu1 %v978_v17 }
  0x4d   : > { %515 = vmatmul.bf16.gmra.mxu2 %v982_v18  ;;  %535 = vmatmul.bf16.gmra.mxu3 %v986_v19 }
  0x5c   : > { %480 = vmatmul.bf16.gmra.mxu0 %v975_v20  ;;  %500 = vmatmul.bf16.gmra.mxu1 %v979_v21 }
  0x5d   : > { %520 = vmatmul.bf16.gmra.mxu2 %v983_v22  ;;  %540 = vmatmul.bf16.gmra.mxu3 %v987_v23 }
  0xa9   : > { %v466_v24 = vpop.f32.mrf.mxu0  ;;  %v1259_v25 = vpop.f32.mrf.mxu1 }
  0xaa   : > { %v584_v57 = vmul.f32 %v466_v24, %v466_v24 }
  0xb0   : > { %v1261_v26 = vpop.f32.mrf.mxu2  ;;  %v1272_v30 = vpop.f32.mrf.mxu3 }
  0xb1   : > { %v468_v27 = vpop.f32.mrf.mxu0  ;;  %v1270_v28 = vpop.f32.mrf.mxu1 }
  0xb2   : > { %v999_v29 = vpack.c.bf16 %v468_v27, %v466_v24  ;;  %v1019_v31 = vpack.c.bf16 %v1270_v28, %v1259_v25  ;;  %v585_v56 = vmul.f32 %v468_v27, %v468_v27  ;;  %v546_v58 = vadd.f32 %v468_v27, %v466_v24 }
  0xb3   : > { %v592_v27 = vmul.f32 %v1259_v25, %v1259_v25 }
  0xb4   : > { %1000 = vst [vmem:[%s1268_s20] sm:$0xff] %v999_v29   ;;  %v616_v60 = vadd.f32 %v585_v56, %v584_v57 }
  0xb5   : > { %1079 = vst [vmem:[%s1268_s20 + $0x20] sm:$0xff] %v1019_v31  }
  0xb8   : > { %v1278_v32 = vpop.f32.mrf.mxu2  ;;  %v1284_v36 = vpop.f32.mrf.mxu3 }
  0xb9   : > { %v471_v33 = vpop.f32.mrf.mxu0  ;;  %v1280_v34 = vpop.f32.mrf.mxu1  ;;  %v1039_v35 = vpack.c.bf16 %v1278_v32, %v1261_v26  ;;  %v1059_v37 = vpack.c.bf16 %v1284_v36, %v1272_v30 }
  0xba   : > { %v586_v59 = vmul.f32 %v471_v33, %v471_v33  ;;  %v547_v61 = vadd.f32 %v546_v58, %v471_v33 }
  0xbb   : > { %1083 = vst [vmem:[%s1268_s20 + $0x40] sm:$0xff] %v1039_v35  }
  0xbc   : > { %1087 = vst [vmem:[%s1268_s20 + $0x60] sm:$0xff] %v1059_v37   ;;  %v617_v3 = vadd.f32 %v616_v60, %v586_v59 }
  0xc0   : > { %v1290_v38 = vpop.f32.mrf.mxu2  ;;  %v1294_v42 = vpop.f32.mrf.mxu3 }
  0xc1   : > { %v473_v39 = vpop.f32.mrf.mxu0  ;;  %v1292_v40 = vpop.f32.mrf.mxu1 }
  0xc2   : > { %v1004_v41 = vpack.c.bf16 %v473_v39, %v471_v33  ;;  %v1024_v43 = vpack.c.bf16 %v1292_v40, %v1280_v34  ;;  %v587_v62 = vmul.f32 %v473_v39, %v473_v39  ;;  %v548_v4 = vadd.f32 %v547_v61, %v473_v39 }
  0xc3   : > { %v593_v33 = vmul.f32 %v1270_v28, %v1270_v28  ;;  %v594_v39 = vmul.f32 %v1280_v34, %v1280_v34 }
  0xc4   : > { %1076 = vst [vmem:[%s1268_s20 + $0x8] sm:$0xff] %v1004_v41   ;;  %v618_v8 = vadd.f32 %v617_v3, %v587_v62  ;;  %v600_v3 = vmul.f32 %v1261_v26, %v1261_v26 }
  0xc5   : > { %1080 = vst [vmem:[%s1268_s20 + $0x28] sm:$0xff] %v1024_v43  }
  0xc8   : > { %v1300_v44 = vpop.f32.mrf.mxu2  ;;  %v1306_v48 = vpop.f32.mrf.mxu3 }
  0xc9   : > { %v476_v45 = vpop.f32.mrf.mxu0  ;;  %v1302_v46 = vpop.f32.mrf.mxu1  ;;  %v1044_v47 = vpack.c.bf16 %v1300_v44, %v1290_v38  ;;  %v1064_v49 = vpack.c.bf16 %v1306_v48, %v1294_v42 }
  0xca   : > { %v588_v5 = vmul.f32 %v476_v45, %v476_v45  ;;  %v549_v9 = vadd.f32 %v548_v4, %v476_v45 }
  0xcb   : > { %1084 = vst [vmem:[%s1268_s20 + $0x48] sm:$0xff] %v1044_v47  }
  0xcc   : > { %1088 = vst [vmem:[%s1268_s20 + $0x68] sm:$0xff] %v1064_v49   ;;  %v619_v11 = vadd.f32 %v618_v8, %v588_v5  ;;  %v601_v5 = vmul.f32 %v1278_v32, %v1278_v32 }
  0xd0   : > { %v1312_v50 = vpop.f32.mrf.mxu2  ;;  %v1316_v54 = vpop.f32.mrf.mxu3 }
  0xd1   : > { %v478_v51 = vpop.f32.mrf.mxu0  ;;  %v1314_v52 = vpop.f32.mrf.mxu1 }
  0xd2   : > { %v1009_v53 = vpack.c.bf16 %v478_v51, %v476_v45  ;;  %v1029_v55 = vpack.c.bf16 %v1314_v52, %v1302_v46  ;;  %v589_v10 = vmul.f32 %v478_v51, %v478_v51  ;;  %v550_v12 = vadd.f32 %v549_v9, %v478_v51 }
  0xd4   : > { %1077 = vst [vmem:[%s1268_s20 + $0x10] sm:$0xff] %v1009_v53   ;;  %v620_v14 = vadd.f32 %v619_v11, %v589_v10  ;;  %v603_v10 = vmul.f32 %v1300_v44, %v1300_v44 }
  0xd5   : > { %1081 = vst [vmem:[%s1268_s20 + $0x30] sm:$0xff] %v1029_v55   ;;  %v596_v55 = vmul.f32 %v1302_v46, %v1302_v46 }
  0xd8   : > { %v1322_v63 = vpop.f32.mrf.mxu2  ;;  %v1326_v6 = vpop.f32.mrf.mxu3 }
  0xd9   : > { %v481_v0 = vpop.f32.mrf.mxu0  ;;  %v501_v1 = vpop.f32.mrf.mxu1  ;;  %v1049_v2 = vpack.c.bf16 %v1322_v63, %v1312_v50  ;;  %v1069_v7 = vpack.c.bf16 %v1326_v6, %v1316_v54 }
  0xda   : > { %v590_v13 = vmul.f32 %v481_v0, %v481_v0  ;;  %v551_v15 = vadd.f32 %v550_v12, %v481_v0  ;;  %v598_v61 = vmul.f32 %v501_v1, %v501_v1 }
  0xdb   : > { %1085 = vst [vmem:[%s1268_s20 + $0x50] sm:$0xff] %v1049_v2  }
  0xdc   : > { %1089 = vst [vmem:[%s1268_s20 + $0x70] sm:$0xff] %v1069_v7   ;;  %v621_v19 = vadd.f32 %v620_v14, %v590_v13 }
  0xe0   : > { %v521_v16 = vpop.f32.mrf.mxu2  ;;  %v1332_v23 = vpop.f32.mrf.mxu3 }
  0xe1   : > { %v483_v17 = vpop.f32.mrf.mxu0  ;;  %v503_v18 = vpop.f32.mrf.mxu1 }
  0xe2   : > { %v552_v20 = vadd.f32 %v551_v15, %v483_v17  ;;  %v591_v21 = vmul.f32 %v483_v17, %v483_v17  ;;  %v1014_v22 = vpack.c.bf16 %v483_v17, %v481_v0  ;;  %v1034_v24 = vpack.c.bf16 %v503_v18, %v501_v1 }
  0xe3   : > { %v599_v2 = vmul.f32 %v503_v18, %v503_v18  ;;  %v605_v15 = vmul.f32 %v1322_v63, %v1322_v63 }
  0xe4   : > { %v553_v29 = vadd.f32 %v552_v20, %v1259_v25  ;;  %v622_v31 = vadd.f32 %v621_v19, %v591_v21  ;;  %1078 = vst [vmem:[%s1268_s20 + $0x18] sm:$0xff] %v1014_v22   ;;  %v595_v25 = vmul.f32 %v1292_v40, %v1292_v40  ;;  %v606_v19 = vmul.f32 %v521_v16, %v521_v16 }
  0xe5   : > { %1082 = vst [vmem:[%s1268_s20 + $0x38] sm:$0xff] %v1034_v24  }
  0xe6   : > { %v554_v35 = vadd.f32 %v553_v29, %v1270_v28  ;;  %v623_v37 = vadd.f32 %v622_v31, %v592_v27 }
  0xe8   : > { %v555_v41 = vadd.f32 %v554_v35, %v1280_v34  ;;  %v624_v43 = vadd.f32 %v623_v37, %v593_v33  ;;  %v523_v45 = vpop.f32.mrf.mxu2  ;;  %v543_v53 = vpop.f32.mrf.mxu3  ;;  %v597_v34 = vmul.f32 %v1314_v52, %v1314_v52  ;;  %v611_v35 = vmul.f32 %v1306_v48, %v1306_v48 }
  0xe9   : > { %v1054_v47 = vpack.c.bf16 %v523_v45, %v521_v16  ;;  %v1074_v28 = vpack.c.bf16 %v543_v53, %v1332_v23  ;;  %v607_v22 = vmul.f32 %v523_v45, %v523_v45 }
  0xea   : > { %v625_v49 = vadd.f32 %v624_v43, %v594_v39  ;;  %v556_v51 = vadd.f32 %v555_v41, %v1292_v40  ;;  %v612_v39 = vmul.f32 %v1316_v54, %v1316_v54 }
  0xeb   : > { %1086 = vst [vmem:[%s1268_s20 + $0x58] sm:$0xff] %v1054_v47  }
  0xec   : > { %v557_v56 = vadd.f32 %v556_v51, %v1302_v46  ;;  %v626_v57 = vadd.f32 %v625_v49, %v595_v25  ;;  %1090 = vst [vmem:[%s1268_s20 + $0x78] sm:$0xff] %v1074_v28   ;;  %v614_v49 = vmul.f32 %v1332_v23, %v1332_v23  ;;  %v615_v28 = vmul.f32 %v543_v53, %v543_v53 }
  0xee   : > { %v558_v58 = vadd.f32 %v557_v56, %v1314_v52  ;;  %v627_v59 = vadd.f32 %v626_v57, %v596_v55  ;;  %v602_v52 = vmul.f32 %v1290_v38, %v1290_v38 }
  0xf0   : > { %v559_v60 = vadd.f32 %v558_v58, %v501_v1  ;;  %v628_v40 = vadd.f32 %v627_v59, %v597_v34 }
  0xf2   : > { %v629_v62 = vadd.f32 %v628_v40, %v598_v61  ;;  %v560_v0 = vadd.f32 %v559_v60, %v503_v18 }
  0xf4   : > { %v561_v4 = vadd.f32 %v560_v0, %v1261_v26  ;;  %v630_v46 = vadd.f32 %v629_v62, %v599_v2  ;;  %v604_v26 = vmul.f32 %v1312_v50, %v1312_v50 }
  0xf6   : > { %v562_v7 = vadd.f32 %v561_v4, %v1278_v32  ;;  %v631_v8 = vadd.f32 %v630_v46, %v600_v3 }
  0xf8   : > { %v563_v1 = vadd.f32 %v562_v7, %v1290_v38  ;;  %v632_v9 = vadd.f32 %v631_v8, %v601_v5 }
  0xfa   : > { %v633_v11 = vadd.f32 %v632_v9, %v602_v52  ;;  %v564_v12 = vadd.f32 %v563_v1, %v1300_v44  ;;  %v608_v44 = vmul.f32 %v1272_v30, %v1272_v30 }
  0xfc   : > { %v565_v13 = vadd.f32 %v564_v12, %v1312_v50  ;;  %v634_v14 = vadd.f32 %v633_v11, %v603_v10  ;;  %v609_v50 = vmul.f32 %v1284_v36, %v1284_v36 }
  0xfe   : > { %v566_v32 = vadd.f32 %v565_v13, %v1322_v63  ;;  %v635_v17 = vadd.f32 %v634_v14, %v604_v26  ;;  %v610_v63 = vmul.f32 %v1294_v42, %v1294_v42 }
 0x100   : > { %v636_v38 = vadd.f32 %v635_v17, %v605_v15  ;;  %v567_v18 = vadd.f32 %v566_v32, %v521_v16 }
 0x102   : > { %v637_v20 = vadd.f32 %v636_v38, %v606_v19  ;;  %v568_v21 = vadd.f32 %v567_v18, %v523_v45 }
 0x104   : > { %v569_v24 = vadd.f32 %v568_v21, %v1272_v30  ;;  %v638_v27 = vadd.f32 %v637_v20, %v607_v22 }
 0x106   : > { %v570_v29 = vadd.f32 %v569_v24, %v1284_v36  ;;  %v639_v31 = vadd.f32 %v638_v27, %v608_v44 }
 0x108   : > { %v571_v16 = vadd.f32 %v570_v29, %v1294_v42  ;;  %v640_v33 = vadd.f32 %v639_v31, %v609_v50  ;;  %v613_v42 = vmul.f32 %v1326_v6, %v1326_v6 }
 0x10a   : > { %v641_v37 = vadd.f32 %v640_v33, %v610_v63  ;;  %v572_v30 = vadd.f32 %v571_v16, %v1306_v48 }
 0x10c   : > { %v573_v41 = vadd.f32 %v572_v30, %v1316_v54  ;;  %v642_v36 = vadd.f32 %v641_v37, %v611_v35 }
 0x10e   : > { %v574_v43 = vadd.f32 %v573_v41, %v1326_v6  ;;  %v643_v45 = vadd.f32 %v642_v36, %v612_v39 }
 0x110   : > { %v644_v47 = vadd.f32 %v643_v45, %v613_v42  ;;  %v575_v25 = vadd.f32 %v574_v43, %v1332_v23 }
 0x112   : > { %v645_v48 = vadd.f32 %v644_v47, %v614_v49  ;;  %v576_v51 = vadd.f32 %v575_v25, %v543_v53 }
 0x114   : > { %v577_v55 = vrot.slane %v576_v51, 4  ;;  %v646_v56 = vadd.f32 %v645_v48, %v615_v28 }
 0x116   : > { %v578_v54 = vadd.f32 %v577_v55, %v576_v51  ;;  %v647_v57 = vrot.slane %v646_v56, 4 }
 0x118   : > { %v579_v34 = vrot.slane %v578_v54, 2  ;;  %v648_v58 = vadd.f32 %v647_v57, %v646_v56 }
 0x11a   : > { %v580_v59 = vadd.f32 %v579_v34, %v578_v54  ;;  %v649_v6 = vrot.slane %v648_v58, 2 }
 0x11c   : > { %v581_v60 = vrot.slane %v580_v59, 1  ;;  %v650_v61 = vadd.f32 %v649_v6, %v648_v58 }
 0x11e   : > { %v582_v23 = vadd.f32 %v581_v60, %v580_v59  ;;  %v651_v40 = vrot.slane %v650_v61, 1 }
 0x120   : > { %583 = vst [vmem:[%s258_s23] sm:$0x1] %v582_v23  ;;  %v652_v53 = vadd.f32 %v651_v40, %v650_v61 }
 0x122   : > { %653 = vst [vmem:[%s263_s26] sm:$0x1] %v652_v53 }
 0x123 PF: > { %s15_s17 = sadd.s32 1, %s1161_s17   ;;  %s1418_s15 = smov %s1157_s16 }
 0x124   : > { %p12_p6 = scmp.ge.s32.totalorder %s15_s17, 4   ;;  %s1419_s16 = smov %s1421_s18 }
 0x126   :  { %14 = sbr.rel (!%p12_p6) target bundleno = 2 (0x2), region = 85 }

// kernel: apply_unet.8
= control target key start
LH: loop header
LB: loop body
LE: loop exit
PB: predicated region body
PF: predicated region fallthrough
CT: control target
= control target key end

     0   :  { %s930_s1 = inlined_call_operand.vmem [shape: bf16[256,128], index: 1, kind: input, shape index: {}]   ;;  %s931_s0 = inlined_call_operand.vmem [shape: bf16[128,256], index: 0, kind: input, shape index: {}]   ;;  %s932_s2 = inlined_call_operand.vmem [shape: bf16[128,128], index: 2, kind: output, shape index: {0}]   ;;  %s933_s3 = inlined_call_operand.vmem [shape: f32[1,128], index: 3, kind: output, shape index: {1}]   ;;  %s934_s4 = inlined_call_operand.vmem [shape: f32[1,128], index: 4, kind: output, shape index: {2}]  }
   0x1   :  { %v635_v0 = vld [vmem:[%s930_s1 + $0x38] sm:$0xff]  ;;  %v634_v2 = vld [vmem:[%s930_s1 + $0x30] sm:$0xff]  ;;  %v633_v4 = vld [vmem:[%s930_s1 + $0x28] sm:$0xff] }
   0x2   :  { %v643_v1 = vld [vmem:[%s930_s1 + $0x78] sm:$0xff]  ;;  %256 = vmatpush.bf16.msra.mxu0 %v635_v0  ;;  %v642_v3 = vld [vmem:[%s930_s1 + $0x70] sm:$0xff]  ;;  %691 = vmatpush.bf16.msra.mxu2 %v635_v0  ;;  %v641_v5 = vld [vmem:[%s930_s1 + $0x68] sm:$0xff] }
   0x3   :  { %305 = vmatpush.bf16.msra.mxu1 %v643_v1  ;;  %699 = vmatpush.bf16.msra.mxu3 %v643_v1  ;;  %v632_v6 = vld [vmem:[%s930_s1 + $0x20] sm:$0xff]  ;;  %v631_v8 = vld [vmem:[%s930_s1 + $0x18] sm:$0xff]  ;;  %v630_v10 = vld [vmem:[%s930_s1 + $0x10] sm:$0xff] }
   0x4   :  { %v640_v7 = vld [vmem:[%s930_s1 + $0x60] sm:$0xff]  ;;  %v639_v9 = vld [vmem:[%s930_s1 + $0x58] sm:$0xff]  ;;  %v638_v11 = vld [vmem:[%s930_s1 + $0x50] sm:$0xff] }
   0x5   :  { %v629_v12 = vld [vmem:[%s930_s1 + $0x8] sm:$0xff]  ;;  %v628_v14 = vld [vmem:[%s930_s1] sm:$0xff]  ;;  %v494_v28 = vld [vmem:[%s931_s0 + $0x10] sm:$0xf] }
   0x6   :  { %257 = vmatpush.bf16.msra.mxu0 %v634_v2  ;;  %692 = vmatpush.bf16.msra.mxu2 %v634_v2  ;;  %v637_v13 = vld [vmem:[%s930_s1 + $0x48] sm:$0xff]  ;;  %v636_v15 = vld [vmem:[%s930_s1 + $0x40] sm:$0xff]  ;;  %v615_v29 = vld [vmem:[%s931_s0 + $0x14] sm:$0xf0] }
   0x7   :  { %306 = vmatpush.bf16.msra.mxu1 %v642_v3  ;;  %700 = vmatpush.bf16.msra.mxu3 %v642_v3  ;;  %v486_v16 = vld [vmem:[%s931_s0] sm:$0xf]  ;;  %v613_v17 = vld [vmem:[%s931_s0 + $0x4] sm:$0xf0]  ;;  %v612_v18 = vld [vmem:[%s931_s0 + $0x4] sm:$0xf]  ;;  %v495_v36 = vor.u32 %v615_v29, %v494_v28 }
   0x8   :  { %v488_v19 = vld [vmem:[%s931_s0 + $0x8] sm:$0xf0]  ;;  %v518_v20 = vld [vmem:[%s931_s0 + $0x40] sm:$0xf]  ;;  %v621_v21 = vld [vmem:[%s931_s0 + $0x44] sm:$0xf0]  ;;  %v487_v24 = vor.u32 %v613_v17, %v486_v16 }
   0x9   :  { %v620_v22 = vld [vmem:[%s931_s0 + $0x44] sm:$0xf]  ;;  %v520_v23 = vld [vmem:[%s931_s0 + $0x48] sm:$0xf0]  ;;  %v491_v25 = vor.u32 %v612_v18, %v488_v19  ;;  %v519_v26 = vor.u32 %v621_v21, %v518_v20  ;;  %v614_v30 = vld [vmem:[%s931_s0 + $0x14] sm:$0xf] }
   0xa   :  { %258 = vmatpush.bf16.msra.mxu0 %v633_v4  ;;  %693 = vmatpush.bf16.msra.mxu2 %v633_v4  ;;  %v523_v27 = vor.u32 %v620_v22, %v520_v23  ;;  %v496_v31 = vld [vmem:[%s931_s0 + $0x18] sm:$0xf0]  ;;  %v526_v32 = vld [vmem:[%s931_s0 + $0x50] sm:$0xf]  ;;  %v623_v33 = vld [vmem:[%s931_s0 + $0x54] sm:$0xf0] }
   0xb   :  { %307 = vmatpush.bf16.msra.mxu1 %v641_v5  ;;  %701 = vmatpush.bf16.msra.mxu3 %v641_v5  ;;  %v622_v34 = vld [vmem:[%s931_s0 + $0x54] sm:$0xf]  ;;  %v528_v35 = vld [vmem:[%s931_s0 + $0x58] sm:$0xf0]  ;;  %v499_v37 = vor.u32 %v614_v30, %v496_v31  ;;  %v527_v38 = vor.u32 %v623_v33, %v526_v32  ;;  %v502_v40 = vld [vmem:[%s931_s0 + $0x20] sm:$0xf] }
   0xc   :  { %v531_v39 = vor.u32 %v622_v34, %v528_v35  ;;  %v617_v41 = vld [vmem:[%s931_s0 + $0x24] sm:$0xf0]  ;;  %v616_v42 = vld [vmem:[%s931_s0 + $0x24] sm:$0xf]  ;;  %v504_v43 = vld [vmem:[%s931_s0 + $0x28] sm:$0xf0] }
   0xd   :  { %v534_v44 = vld [vmem:[%s931_s0 + $0x60] sm:$0xf]  ;;  %v625_v45 = vld [vmem:[%s931_s0 + $0x64] sm:$0xf0]  ;;  %v624_v46 = vld [vmem:[%s931_s0 + $0x64] sm:$0xf]  ;;  %v503_v48 = vor.u32 %v617_v41, %v502_v40  ;;  %v507_v49 = vor.u32 %v616_v42, %v504_v43 }
   0xe   :  { %259 = vmatpush.bf16.msra.mxu0 %v632_v6  ;;  %694 = vmatpush.bf16.msra.mxu2 %v632_v6  ;;  %v536_v47 = vld [vmem:[%s931_s0 + $0x68] sm:$0xf0]  ;;  %v535_v50 = vor.u32 %v625_v45, %v534_v44  ;;  %v510_v52 = vld [vmem:[%s931_s0 + $0x30] sm:$0xf]  ;;  %v619_v53 = vld [vmem:[%s931_s0 + $0x34] sm:$0xf0] }
   0xf   :  { %308 = vmatpush.bf16.msra.mxu1 %v640_v7  ;;  %702 = vmatpush.bf16.msra.mxu3 %v640_v7  ;;  %v539_v51 = vor.u32 %v624_v46, %v536_v47  ;;  %v618_v54 = vld [vmem:[%s931_s0 + $0x34] sm:$0xf]  ;;  %v512_v55 = vld [vmem:[%s931_s0 + $0x38] sm:$0xf0]  ;;  %v542_v56 = vld [vmem:[%s931_s0 + $0x70] sm:$0xf]  ;;  %v511_v60 = vor.u32 %v619_v53, %v510_v52 }
  0x10   :  { %v627_v57 = vld [vmem:[%s931_s0 + $0x74] sm:$0xf0]  ;;  %v626_v58 = vld [vmem:[%s931_s0 + $0x74] sm:$0xf]  ;;  %v544_v59 = vld [vmem:[%s931_s0 + $0x78] sm:$0xf0]  ;;  %v515_v61 = vor.u32 %v618_v54, %v512_v55 }
  0x11   :  { %v543_v62 = vor.u32 %v627_v57, %v542_v56  ;;  %v547_v63 = vor.u32 %v626_v58, %v544_v59 }
  0x12   :  { %260 = vmatpush.bf16.msra.mxu0 %v631_v8  ;;  %695 = vmatpush.bf16.msra.mxu2 %v631_v8 }
  0x13   :  { %309 = vmatpush.bf16.msra.mxu1 %v639_v9  ;;  %703 = vmatpush.bf16.msra.mxu3 %v639_v9 }
  0x16   :  { %261 = vmatpush.bf16.msra.mxu0 %v630_v10  ;;  %696 = vmatpush.bf16.msra.mxu2 %v630_v10 }
  0x17   :  { %310 = vmatpush.bf16.msra.mxu1 %v638_v11  ;;  %704 = vmatpush.bf16.msra.mxu3 %v638_v11 }
  0x1a   :  { %262 = vmatpush.bf16.msra.mxu0 %v629_v12  ;;  %697 = vmatpush.bf16.msra.mxu2 %v629_v12 }
  0x1b   :  { %311 = vmatpush.bf16.msra.mxu1 %v637_v13  ;;  %705 = vmatpush.bf16.msra.mxu3 %v637_v13 }
  0x1e   :  { %263 = vmatpush.bf16.msra.mxu0 %v628_v14  ;;  %698 = vmatpush.bf16.msra.mxu2 %v628_v14 }
  0x1f   :  { %312 = vmatpush.bf16.msra.mxu1 %v636_v15  ;;  %706 = vmatpush.bf16.msra.mxu3 %v636_v15 }
  0x21   :  { %264 = vmatmul.bf16.vlgmr.msra.gmra.mxu0 %v487_v24  ;;  %284 = vmatmul.bf16.vlgmr.msra.gmra.mxu2 %v519_v26 }
  0x22   :  { %313 = vmatmul.bf16.vlgmr.msra.gmra.mxu1 %v491_v25  ;;  %333 = vmatmul.bf16.vlgmr.msra.gmra.mxu3 %v523_v27 }
  0x31   :  { %269 = vmatmul.bf16.gmra.mxu0 %v495_v36  ;;  %289 = vmatmul.bf16.gmra.mxu2 %v527_v38 }
  0x32   :  { %318 = vmatmul.bf16.gmra.mxu1 %v499_v37  ;;  %338 = vmatmul.bf16.gmra.mxu3 %v531_v39 }
  0x41   :  { %274 = vmatmul.bf16.gmra.mxu0 %v503_v48  ;;  %294 = vmatmul.bf16.gmra.mxu2 %v535_v50 }
  0x42   :  { %323 = vmatmul.bf16.gmra.mxu1 %v507_v49  ;;  %343 = vmatmul.bf16.gmra.mxu3 %v539_v51 }
  0x51   :  { %279 = vmatmul.bf16.gmra.mxu0 %v511_v60  ;;  %299 = vmatmul.bf16.gmra.mxu2 %v543_v62 }
  0x52   :  { %328 = vmatmul.bf16.gmra.mxu1 %v515_v61  ;;  %348 = vmatmul.bf16.gmra.mxu3 %v547_v63 }
  0x9e   :  { %v265_v0 = vpop.f32.mrf.mxu0 }
  0x9f   :  { %v314_v1 = vpop.f32.mrf.mxu1 }
  0xa0   :  { %v315_v6 = vadd.f32 %v314_v1, %v265_v0 }
  0xa2   :  { %v376_v39 = vmul.f32 %v315_v6, %v315_v6 }
  0xa4   :  { %v285_v2 = vpop.f32.mrf.mxu2 }
  0xa5   :  { %v334_v3 = vpop.f32.mrf.mxu3 }
  0xa6   :  { %v267_v4 = vpop.f32.mrf.mxu0  ;;  %v879_v9 = vadd.f32 %v334_v3, %v285_v2 }
  0xa7   :  { %v316_v5 = vpop.f32.mrf.mxu1 }
  0xa8   :  { %v317_v7 = vadd.f32 %v316_v5, %v267_v4 }
  0xaa   :  { %v647_v8 = vpack.c.bf16 %v317_v7, %v315_v6  ;;  %v377_v37 = vmul.f32 %v317_v7, %v317_v7  ;;  %v354_v40 = vadd.f32 %v317_v7, %v315_v6 }
  0xac   :  { %648 = vst [vmem:[%s932_s2] sm:$0xff] %v647_v8   ;;  %v287_v10 = vpop.f32.mrf.mxu2  ;;  %v392_v47 = vadd.f32 %v377_v37, %v376_v39  ;;  %v384_v8 = vmul.f32 %v879_v9, %v879_v9 }
  0xad   :  { %v336_v11 = vpop.f32.mrf.mxu3 }
  0xae   :  { %v270_v12 = vpop.f32.mrf.mxu0  ;;  %v881_v14 = vadd.f32 %v336_v11, %v287_v10 }
  0xaf   :  { %v319_v13 = vpop.f32.mrf.mxu1 }
  0xb0   :  { %v667_v15 = vpack.c.bf16 %v881_v14, %v879_v9  ;;  %v320_v20 = vadd.f32 %v319_v13, %v270_v12  ;;  %v385_v13 = vmul.f32 %v881_v14, %v881_v14 }
  0xb2   :  { %687 = vst [vmem:[%s932_s2 + $0x20] sm:$0xff] %v667_v15   ;;  %v378_v41 = vmul.f32 %v320_v20, %v320_v20  ;;  %v355_v48 = vadd.f32 %v354_v40, %v320_v20 }
  0xb4   :  { %v290_v16 = vpop.f32.mrf.mxu2  ;;  %v393_v51 = vadd.f32 %v392_v47, %v378_v41 }
  0xb5   :  { %v339_v17 = vpop.f32.mrf.mxu3 }
  0xb6   :  { %v272_v18 = vpop.f32.mrf.mxu0  ;;  %v891_v23 = vadd.f32 %v339_v17, %v290_v16 }
  0xb7   :  { %v321_v19 = vpop.f32.mrf.mxu1 }
  0xb8   :  { %v322_v21 = vadd.f32 %v321_v19, %v272_v18 }
  0xba   :  { %v652_v22 = vpack.c.bf16 %v322_v21, %v320_v20  ;;  %v379_v49 = vmul.f32 %v322_v21, %v322_v21  ;;  %v356_v52 = vadd.f32 %v355_v48, %v322_v21  ;;  %v386_v20 = vmul.f32 %v891_v23, %v891_v23 }
  0xbc   :  { %684 = vst [vmem:[%s932_s2 + $0x8] sm:$0xff] %v652_v22   ;;  %v292_v24 = vpop.f32.mrf.mxu2  ;;  %v394_v55 = vadd.f32 %v393_v51, %v379_v49 }
  0xbd   :  { %v341_v25 = vpop.f32.mrf.mxu3 }
  0xbe   :  { %v275_v26 = vpop.f32.mrf.mxu0  ;;  %v893_v28 = vadd.f32 %v341_v25, %v292_v24 }
  0xbf   :  { %v324_v27 = vpop.f32.mrf.mxu1 }
  0xc0   :  { %v672_v29 = vpack.c.bf16 %v893_v28, %v891_v23  ;;  %v325_v34 = vadd.f32 %v324_v27, %v275_v26  ;;  %v387_v24 = vmul.f32 %v893_v28, %v893_v28 }
  0xc2   :  { %688 = vst [vmem:[%s932_s2 + $0x28] sm:$0xff] %v672_v29   ;;  %v380_v53 = vmul.f32 %v325_v34, %v325_v34  ;;  %v357_v56 = vadd.f32 %v356_v52, %v325_v34 }
  0xc4   :  { %v295_v30 = vpop.f32.mrf.mxu2  ;;  %v395_v58 = vadd.f32 %v394_v55, %v380_v53 }
  0xc5   :  { %v344_v31 = vpop.f32.mrf.mxu3 }
  0xc6   :  { %v277_v32 = vpop.f32.mrf.mxu0  ;;  %v345_v38 = vadd.f32 %v344_v31, %v295_v30 }
  0xc7   :  { %v326_v33 = vpop.f32.mrf.mxu1 }
  0xc8   :  { %v327_v35 = vadd.f32 %v326_v33, %v277_v32 }
  0xca   :  { %v657_v36 = vpack.c.bf16 %v327_v35, %v325_v34  ;;  %v381_v57 = vmul.f32 %v327_v35, %v327_v35  ;;  %v358_v59 = vadd.f32 %v357_v56, %v327_v35 }
  0xcc   :  { %685 = vst [vmem:[%s932_s2 + $0x10] sm:$0xff] %v657_v36   ;;  %v297_v42 = vpop.f32.mrf.mxu2  ;;  %v396_v1 = vadd.f32 %v395_v58, %v381_v57 }
  0xcd   :  { %v346_v43 = vpop.f32.mrf.mxu3 }
  0xce   :  { %v280_v44 = vpop.f32.mrf.mxu0  ;;  %v347_v46 = vadd.f32 %v346_v43, %v297_v42 }
  0xcf   :  { %v329_v45 = vpop.f32.mrf.mxu1 }
  0xd0   :  { %v677_v50 = vpack.c.bf16 %v347_v46, %v345_v38  ;;  %v330_v54 = vadd.f32 %v329_v45, %v280_v44  ;;  %v389_v30 = vmul.f32 %v347_v46, %v347_v46 }
  0xd2   :  { %689 = vst [vmem:[%s932_s2 + $0x30] sm:$0xff] %v677_v50   ;;  %v382_v60 = vmul.f32 %v330_v54, %v330_v54  ;;  %v359_v2 = vadd.f32 %v358_v59, %v330_v54 }
  0xd4   :  { %v300_v61 = vpop.f32.mrf.mxu2  ;;  %v397_v4 = vadd.f32 %v396_v1, %v382_v60 }
  0xd5   :  { %v349_v62 = vpop.f32.mrf.mxu3 }
  0xd6   :  { %v282_v63 = vpop.f32.mrf.mxu0  ;;  %v350_v12 = vadd.f32 %v349_v62, %v300_v61 }
  0xd7   :  { %v331_v0 = vpop.f32.mrf.mxu1 }
  0xd8   :  { %v332_v3 = vadd.f32 %v331_v0, %v282_v63 }
  0xda   :  { %v360_v5 = vadd.f32 %v359_v2, %v332_v3  ;;  %v383_v6 = vmul.f32 %v332_v3, %v332_v3  ;;  %v662_v7 = vpack.c.bf16 %v332_v3, %v330_v54 }
  0xdc   :  { %v361_v10 = vadd.f32 %v360_v5, %v879_v9  ;;  %v398_v11 = vadd.f32 %v397_v4, %v383_v6  ;;  %686 = vst [vmem:[%s932_s2 + $0x18] sm:$0xff] %v662_v7   ;;  %v302_v17 = vpop.f32.mrf.mxu2 }
  0xdd   :  { %v351_v18 = vpop.f32.mrf.mxu3 }
  0xde   :  { %v362_v15 = vadd.f32 %v361_v10, %v881_v14  ;;  %v399_v16 = vadd.f32 %v398_v11, %v384_v8  ;;  %v352_v19 = vadd.f32 %v351_v18, %v302_v17  ;;  %v388_v14 = vmul.f32 %v345_v38, %v345_v38 }
  0xe0   :  { %v363_v9 = vadd.f32 %v362_v15, %v891_v23  ;;  %v400_v21 = vadd.f32 %v399_v16, %v385_v13  ;;  %v682_v22 = vpack.c.bf16 %v352_v19, %v350_v12  ;;  %v390_v23 = vmul.f32 %v350_v12, %v350_v12 }
  0xe1   :  { %v391_v37 = vmul.f32 %v352_v19, %v352_v19 }
  0xe2   :  { %v401_v25 = vadd.f32 %v400_v21, %v386_v20  ;;  %v364_v26 = vadd.f32 %v363_v9, %v893_v28  ;;  %690 = vst [vmem:[%s932_s2 + $0x38] sm:$0xff] %v682_v22  }
  0xe4   :  { %v365_v27 = vadd.f32 %v364_v26, %v345_v38  ;;  %v402_v29 = vadd.f32 %v401_v25, %v387_v24 }
  0xe6   :  { %v366_v31 = vadd.f32 %v365_v27, %v347_v46  ;;  %v403_v32 = vadd.f32 %v402_v29, %v388_v14 }
  0xe8   :  { %v367_v33 = vadd.f32 %v366_v31, %v350_v12  ;;  %v404_v34 = vadd.f32 %v403_v32, %v389_v30 }
  0xea   :  { %v405_v35 = vadd.f32 %v404_v34, %v390_v23  ;;  %v368_v36 = vadd.f32 %v367_v33, %v352_v19 }
  0xec   :  { %v369_v39 = vrot.slane %v368_v36, 4  ;;  %v406_v40 = vadd.f32 %v405_v35, %v391_v37 }
  0xee   :  { %v370_v41 = vadd.f32 %v369_v39, %v368_v36  ;;  %v407_v28 = vrot.slane %v406_v40, 4 }
  0xf0   :  { %v371_v42 = vrot.slane %v370_v41, 2  ;;  %v408_v43 = vadd.f32 %v407_v28, %v406_v40 }
  0xf2   :  { %v372_v44 = vadd.f32 %v371_v42, %v370_v41  ;;  %v409_v45 = vrot.slane %v408_v43, 2 }
  0xf4   :  { %v373_v47 = vrot.slane %v372_v44, 1  ;;  %v410_v38 = vadd.f32 %v409_v45, %v408_v43 }
  0xf6   :  { %v374_v48 = vadd.f32 %v373_v47, %v372_v44  ;;  %v411_v49 = vrot.slane %v410_v38, 1 }
  0xf8   :  { %375 = vst [vmem:[%s933_s3] sm:$0x1] %v374_v48  ;;  %v412_v46 = vadd.f32 %v411_v49, %v410_v38 }
  0xfa   :  { %413 = vst [vmem:[%s934_s4] sm:$0x1] %v412_v46 }

// kernel: apply_unet.9
= control target key start
LH: loop header
LB: loop body
LE: loop exit
PB: predicated region body
PF: predicated region fallthrough
CT: control target
= control target key end

     0   :  { %vm569_vm0 = vcmask 523264   ;;  %s1875_s1 = inlined_call_operand.vmem [shape: bf16[576,128], index: 1, kind: input, shape index: {}]   ;;  %s1876_s0 = inlined_call_operand.vmem [shape: bf16[128,576], index: 0, kind: input, shape index: {}]   ;;  %s1877_s2 = inlined_call_operand.vmem [shape: bf16[128,128], index: 2, kind: output, shape index: {0}]   ;;  %s1878_s3 = inlined_call_operand.vmem [shape: f32[1,128], index: 3, kind: output, shape index: {1}]   ;;  %s1879_s4 = inlined_call_operand.vmem [shape: f32[1,128], index: 4, kind: output, shape index: {2}]  }
   0x1   :  { %v1328_v0 = vld [vmem:[%s1875_s1 + $0x38] sm:$0xff]  ;;  %v1327_v1 = vld [vmem:[%s1875_s1 + $0x30] sm:$0xff]  ;;  %v1326_v2 = vld [vmem:[%s1875_s1 + $0x28] sm:$0xff] }
   0x2   :  { %1404 = vmatpush.bf16.msra.mxu1 %v1328_v0  ;;  %1405 = vmatpush.bf16.msra.mxu2 %v1328_v0  ;;  %v1325_v3 = vld [vmem:[%s1875_s1 + $0x20] sm:$0xff]  ;;  %v1324_v4 = vld [vmem:[%s1875_s1 + $0x18] sm:$0xff]  ;;  %v1323_v5 = vld [vmem:[%s1875_s1 + $0x10] sm:$0xff] }
   0x3   :  { %1406 = vmatpush.bf16.msra.mxu3 %v1328_v0  ;;  %594 = vmatpush.bf16.msra.mxu0 %v1328_v0  ;;  %v1322_v6 = vld [vmem:[%s1875_s1 + $0x8] sm:$0xff]  ;;  %v1321_v7 = vld [vmem:[%s1875_s1] sm:$0xff]  ;;  %v1011_v8 = vld [vmem:[%s1876_s0 + $0x50] sm:$0xf] }
   0x4   :  { %v1293_v9 = vld [vmem:[%s1876_s0 + $0x60] sm:$0xf0]  ;;  %v1051_v10 = vld [vmem:[%s1876_s0 + $0xa0] sm:$0xf]  ;;  %v1303_v11 = vld [vmem:[%s1876_s0 + $0xb0] sm:$0xf0] }
   0x5   :  { %v1091_v12 = vld [vmem:[%s1876_s0 + $0xf0] sm:$0xf]  ;;  %v1313_v13 = vld [vmem:[%s1876_s0 + $0x100] sm:$0xf0]  ;;  %v971_v14 = vld [vmem:[%s1876_s0] sm:$0xf]  ;;  %v1012_v18 = vor.u32 %v1293_v9, %v1011_v8  ;;  %v1052_v19 = vor.u32 %v1303_v11, %v1051_v10 }
   0x6   :  { %1407 = vmatpush.bf16.msra.mxu1 %v1327_v1  ;;  %1408 = vmatpush.bf16.msra.mxu2 %v1327_v1  ;;  %v1283_v15 = vld [vmem:[%s1876_s0 + $0x10] sm:$0xf0]  ;;  %v1344_v16 = vld [vmem:[%s1875_s1 + $0xb8] sm:$0xff]  ;;  %v1092_v20 = vor.u32 %v1313_v13, %v1091_v12  ;;  %v1342_v28 = vld [vmem:[%s1875_s1 + $0xa8] sm:$0xff] }
   0x7   :  { %1409 = vmatpush.bf16.msra.mxu3 %v1327_v1  ;;  %595 = vmatpush.bf16.msra.mxu0 %v1327_v1  ;;  %v1336_v17 = vld [vmem:[%s1875_s1 + $0x78] sm:$0xff]  ;;  %v972_v21 = vor.u32 %v1283_v15, %v971_v14  ;;  %v1343_v24 = vld [vmem:[%s1875_s1 + $0xb0] sm:$0xff]  ;;  %v1334_v29 = vld [vmem:[%s1875_s1 + $0x68] sm:$0xff] }
   0x8   :  { %v1352_v22 = vld [vmem:[%s1875_s1 + $0xf8] sm:$0xff]  ;;  %v1335_v25 = vld [vmem:[%s1875_s1 + $0x70] sm:$0xff]  ;;  %v1350_v30 = vld [vmem:[%s1875_s1 + $0xe8] sm:$0xff] }
   0x9   :  { %v1356_v23 = vld [vmem:[%s1875_s1 + $0x118] sm:$0xff]  ;;  %v1351_v26 = vld [vmem:[%s1875_s1 + $0xf0] sm:$0xff]  ;;  %v1354_v31 = vld [vmem:[%s1875_s1 + $0x108] sm:$0xff] }
   0xa   :  { %1410 = vmatpush.bf16.msra.mxu1 %v1326_v2  ;;  %1411 = vmatpush.bf16.msra.mxu2 %v1326_v2  ;;  %v1355_v27 = vld [vmem:[%s1875_s1 + $0x110] sm:$0xff]  ;;  %v1341_v32 = vld [vmem:[%s1875_s1 + $0xa0] sm:$0xff]  ;;  %v1031_v35 = vld [vmem:[%s1876_s0 + $0x78] sm:$0xf] }
   0xb   :  { %1412 = vmatpush.bf16.msra.mxu3 %v1326_v2  ;;  %596 = vmatpush.bf16.msra.mxu0 %v1326_v2  ;;  %v1333_v33 = vld [vmem:[%s1875_s1 + $0x60] sm:$0xff]  ;;  %v1298_v36 = vld [vmem:[%s1876_s0 + $0x88] sm:$0xf0]  ;;  %v1071_v37 = vld [vmem:[%s1876_s0 + $0xc8] sm:$0xf] }
   0xc   :  { %v1349_v34 = vld [vmem:[%s1875_s1 + $0xe0] sm:$0xff]  ;;  %v1308_v38 = vld [vmem:[%s1876_s0 + $0xd8] sm:$0xf0]  ;;  %v1111_v39 = vld [vmem:[%s1876_s0 + $0x118] sm:$0xf]  ;;  %v1032_v46 = vor.u32 %v1298_v36, %v1031_v35 }
   0xd   :  { %v1318_v40 = vld [vmem:[%s1876_s0 + $0x128] sm:$0xf0]  ;;  %v991_v41 = vld [vmem:[%s1876_s0 + $0x28] sm:$0xf]  ;;  %v1288_v42 = vld [vmem:[%s1876_s0 + $0x38] sm:$0xf0]  ;;  %v1072_v47 = vor.u32 %v1308_v38, %v1071_v37 }
   0xe   :  { %1413 = vmatpush.bf16.msra.mxu1 %v1325_v3  ;;  %1414 = vmatpush.bf16.msra.mxu2 %v1325_v3  ;;  %v1353_v43 = vld [vmem:[%s1875_s1 + $0x100] sm:$0xff]  ;;  %v1340_v44 = vld [vmem:[%s1875_s1 + $0x98] sm:$0xff]  ;;  %v1112_v48 = vor.u32 %v1318_v40, %v1111_v39  ;;  %v992_v49 = vor.u32 %v1288_v42, %v991_v41  ;;  %v1339_v51 = vld [vmem:[%s1875_s1 + $0x90] sm:$0xff] }
   0xf   :  { %1415 = vmatpush.bf16.msra.mxu3 %v1325_v3  ;;  %597 = vmatpush.bf16.msra.mxu0 %v1325_v3  ;;  %v1332_v45 = vld [vmem:[%s1875_s1 + $0x58] sm:$0xff]  ;;  %v1331_v52 = vld [vmem:[%s1875_s1 + $0x50] sm:$0xff]  ;;  %v1338_v54 = vld [vmem:[%s1875_s1 + $0x88] sm:$0xff] }
  0x10   :  { %v1348_v50 = vld [vmem:[%s1875_s1 + $0xd8] sm:$0xff]  ;;  %v1347_v53 = vld [vmem:[%s1875_s1 + $0xd0] sm:$0xff]  ;;  %v1330_v55 = vld [vmem:[%s1875_s1 + $0x48] sm:$0xff] }
  0x11   :  { %v1346_v56 = vld [vmem:[%s1875_s1 + $0xc8] sm:$0xff]  ;;  %v1337_v57 = vld [vmem:[%s1875_s1 + $0x80] sm:$0xff]  ;;  %v973_v61 = vld [vmem:[%s1876_s0 + $0x14] sm:$0xf0] }
  0x12   :  { %1416 = vmatpush.bf16.msra.mxu1 %v1324_v4  ;;  %1417 = vmatpush.bf16.msra.mxu2 %v1324_v4  ;;  %v1329_v58 = vld [vmem:[%s1875_s1 + $0x40] sm:$0xff]  ;;  %v979_v62 = vld [vmem:[%s1876_s0 + $0x8] sm:$0xf]  ;;  %v1284_v63 = vld [vmem:[%s1876_s0 + $0x18] sm:$0xf0] }
  0x13   :  { %1418 = vmatpush.bf16.msra.mxu3 %v1324_v4  ;;  %598 = vmatpush.bf16.msra.mxu0 %v1324_v4  ;;  %v1345_v59 = vld [vmem:[%s1875_s1 + $0xc0] sm:$0xff]  ;;  %v1282_v0 = vld [vmem:[%s1876_s0 + $0xc] sm:$0xf]  ;;  %v987_v2 = vld [vmem:[%s1876_s0 + $0x10] sm:$0xf] }
  0x14   :  { %v1281_v60 = vld [vmem:[%s1876_s0 + $0x4] sm:$0xf]  ;;  %v981_v1 = vld [vmem:[%s1876_s0 + $0x1c] sm:$0xf0]  ;;  %v1286_v8 = vld [vmem:[%s1876_s0 + $0x2c] sm:$0xf] }
  0x15   :  { %v1285_v3 = vld [vmem:[%s1876_s0 + $0x20] sm:$0xf0]  ;;  %v976_v4 = vor.u32 %v1281_v60, %v973_v61  ;;  %v993_v9 = vld [vmem:[%s1876_s0 + $0x3c] sm:$0xf0]  ;;  %v999_v10 = vld [vmem:[%s1876_s0 + $0x30] sm:$0xf] }
  0x16   :  { %1419 = vmatpush.bf16.msra.mxu1 %v1323_v5  ;;  %1420 = vmatpush.bf16.msra.mxu2 %v1323_v5  ;;  %v1289_v11 = vld [vmem:[%s1876_s0 + $0x40] sm:$0xf0]  ;;  %v1287_v12 = vld [vmem:[%s1876_s0 + $0x34] sm:$0xf]  ;;  %v1001_v13 = vld [vmem:[%s1876_s0 + $0x44] sm:$0xf0] }
  0x17   :  { %1421 = vmatpush.bf16.msra.mxu3 %v1323_v5  ;;  %599 = vmatpush.bf16.msra.mxu0 %v1323_v5  ;;  %v980_v5 = vor.u32 %v1284_v63, %v979_v62  ;;  %v1007_v14 = vld [vmem:[%s1876_s0 + $0x38] sm:$0xf]  ;;  %v1290_v15 = vld [vmem:[%s1876_s0 + $0x48] sm:$0xf0]  ;;  %v1299_v35 = vld [vmem:[%s1876_s0 + $0x90] sm:$0xf0] }
  0x18   :  { %v1297_v36 = vld [vmem:[%s1876_s0 + $0x84] sm:$0xf]  ;;  %v1041_v37 = vld [vmem:[%s1876_s0 + $0x94] sm:$0xf0]  ;;  %v1047_v38 = vld [vmem:[%s1876_s0 + $0x88] sm:$0xf] }
  0x19   :  { %v1300_v39 = vld [vmem:[%s1876_s0 + $0x98] sm:$0xf0]  ;;  %v1044_v42 = vor.u32 %v1297_v36, %v1041_v37  ;;  %v1307_v60 = vld [vmem:[%s1876_s0 + $0xd4] sm:$0xf]  ;;  %v1081_v61 = vld [vmem:[%s1876_s0 + $0xe4] sm:$0xf0] }
  0x1a   :  { %1422 = vmatpush.bf16.msra.mxu1 %v1322_v6  ;;  %1423 = vmatpush.bf16.msra.mxu2 %v1322_v6  ;;  %v1087_v62 = vld [vmem:[%s1876_s0 + $0xd8] sm:$0xf]  ;;  %v1310_v63 = vld [vmem:[%s1876_s0 + $0xe8] sm:$0xf0] }
  0x1b   :  { %1424 = vmatpush.bf16.msra.mxu3 %v1322_v6  ;;  %600 = vmatpush.bf16.msra.mxu0 %v1322_v6  ;;  %v984_v6 = vor.u32 %v1282_v0, %v981_v1 }
  0x1e   :  { %1425 = vmatpush.bf16.msra.mxu1 %v1321_v7  ;;  %1426 = vmatpush.bf16.msra.mxu2 %v1321_v7 }
  0x1f   :  { %1427 = vmatpush.bf16.msra.mxu3 %v1321_v7  ;;  %601 = vmatpush.bf16.msra.mxu0 %v1321_v7  ;;  %v988_v7 = vor.u32 %v1285_v3, %v987_v2  ;;  %v1084_v2 = vor.u32 %v1307_v60, %v1081_v61  ;;  %v1088_v3 = vor.u32 %v1310_v63, %v1087_v62 }
  0x21   :  { %612 = vmatmul.bf16.vlgmr.msra.gmra.mxu1 %v1012_v18  ;;  %622 = vmatmul.bf16.vlgmr.msra.gmra.mxu2 %v1052_v19  ;;  %v1004_v18 = vor.u32 %v1287_v12, %v1001_v13  ;;  %v1008_v19 = vor.u32 %v1290_v15, %v1007_v14 }
  0x22   :  { %692 = vmatpush.bf16.msrb.mxu2 %v1344_v16  ;;  %643 = vmatpush.bf16.msrb.mxu1 %v1336_v17  ;;  %v996_v16 = vor.u32 %v1286_v8, %v993_v9  ;;  %v1000_v17 = vor.u32 %v1289_v11, %v999_v10  ;;  %v1312_v8 = vld [vmem:[%s1876_s0 + $0xfc] sm:$0xf]  ;;  %v1101_v9 = vld [vmem:[%s1876_s0 + $0x10c] sm:$0xf0]  ;;  %v1107_v10 = vld [vmem:[%s1876_s0 + $0x100] sm:$0xf] }
  0x23   :  { %632 = vmatmul.bf16.vlgmr.msra.gmra.mxu3 %v1092_v20  ;;  %602 = vmatmul.bf16.vlgmr.msra.gmra.mxu0 %v972_v21  ;;  %v1291_v20 = vld [vmem:[%s1876_s0 + $0x54] sm:$0xf]  ;;  %v1013_v21 = vld [vmem:[%s1876_s0 + $0x64] sm:$0xf0]  ;;  %v1104_v15 = vor.u32 %v1312_v8, %v1101_v9 }
  0x24   :  { %741 = vmatpush.bf16.msrb.mxu3 %v1352_v22  ;;  %794 = vmatpush.bf16.msrb.mxu0 %v1356_v23  ;;  %v1019_v22 = vld [vmem:[%s1876_s0 + $0x58] sm:$0xf]  ;;  %v1294_v23 = vld [vmem:[%s1876_s0 + $0x68] sm:$0xf0]  ;;  %v1315_v11 = vld [vmem:[%s1876_s0 + $0x110] sm:$0xf0] }
  0x26   :  { %693 = vmatpush.bf16.msrb.mxu2 %v1343_v24  ;;  %644 = vmatpush.bf16.msrb.mxu1 %v1335_v25  ;;  %v1292_v24 = vld [vmem:[%s1876_s0 + $0x5c] sm:$0xf]  ;;  %v1021_v25 = vld [vmem:[%s1876_s0 + $0x6c] sm:$0xf0] }
  0x28   :  { %742 = vmatpush.bf16.msrb.mxu3 %v1351_v26  ;;  %795 = vmatpush.bf16.msrb.mxu0 %v1355_v27  ;;  %v1027_v26 = vld [vmem:[%s1876_s0 + $0x60] sm:$0xf]  ;;  %v1295_v27 = vld [vmem:[%s1876_s0 + $0x70] sm:$0xf0] }
  0x2a   :  { %694 = vmatpush.bf16.msrb.mxu2 %v1342_v28  ;;  %645 = vmatpush.bf16.msrb.mxu1 %v1334_v29  ;;  %v1016_v28 = vor.u32 %v1291_v20, %v1013_v21  ;;  %v1020_v29 = vor.u32 %v1294_v23, %v1019_v22  ;;  %v1316_v22 = vld [vmem:[%s1876_s0 + $0x11c] sm:$0xf]  ;;  %v1113_v23 = vld [vmem:[%s1876_s0 + $0x12c] sm:$0xf0] }
  0x2c   :  { %743 = vmatpush.bf16.msrb.mxu3 %v1350_v30  ;;  %796 = vmatpush.bf16.msrb.mxu0 %v1354_v31  ;;  %v1024_v30 = vor.u32 %v1292_v24, %v1021_v25  ;;  %v1028_v31 = vor.u32 %v1295_v27, %v1027_v26  ;;  %v1119_v24 = vld [vmem:[%s1876_s0 + $0x120] sm:$0xf]  ;;  %v1319_v25 = vld [vmem:[%s1876_s0 + $0x130] sm:$0xf0]  ;;  %v1317_v26 = vld [vmem:[%s1876_s0 + $0x124] sm:$0xf] }
  0x2d   :  { %v1121_v27 = vld [vmem:[%s1876_s0 + $0x134] sm:$0xf0] }
  0x2e   :  { %695 = vmatpush.bf16.msrb.mxu2 %v1341_v32  ;;  %646 = vmatpush.bf16.msrb.mxu1 %v1333_v33  ;;  %v1296_v32 = vld [vmem:[%s1876_s0 + $0x7c] sm:$0xf]  ;;  %v1033_v33 = vld [vmem:[%s1876_s0 + $0x8c] sm:$0xf0] }
  0x2f   :  { %v1036_v40 = vor.u32 %v1296_v32, %v1033_v33  ;;  %v1116_v32 = vor.u32 %v1316_v22, %v1113_v23  ;;  %v1120_v33 = vor.u32 %v1319_v25, %v1119_v24 }
  0x30   :  { %744 = vmatpush.bf16.msrb.mxu3 %v1349_v34  ;;  %797 = vmatpush.bf16.msrb.mxu0 %v1353_v43  ;;  %v1039_v34 = vld [vmem:[%s1876_s0 + $0x80] sm:$0xf]  ;;  %v1048_v43 = vor.u32 %v1300_v39, %v1047_v38 }
  0x31   :  { %617 = vmatmul.bf16.gmra.mxu1 %v1032_v46  ;;  %627 = vmatmul.bf16.gmra.mxu2 %v1072_v47  ;;  %v1040_v41 = vor.u32 %v1299_v35, %v1039_v34  ;;  %v1059_v46 = vld [vmem:[%s1876_s0 + $0xa8] sm:$0xf]  ;;  %v1304_v47 = vld [vmem:[%s1876_s0 + $0xb8] sm:$0xf0]  ;;  %v1124_v35 = vor.u32 %v1317_v26, %v1121_v27 }
  0x32   :  { %696 = vmatpush.bf16.msrb.mxu2 %v1340_v44  ;;  %647 = vmatpush.bf16.msrb.mxu1 %v1332_v45  ;;  %v1301_v44 = vld [vmem:[%s1876_s0 + $0xa4] sm:$0xf]  ;;  %v1053_v45 = vld [vmem:[%s1876_s0 + $0xb4] sm:$0xf0] }
  0x33   :  { %637 = vmatmul.bf16.gmra.mxu3 %v1112_v48  ;;  %607 = vmatmul.bf16.gmra.mxu0 %v992_v49  ;;  %v1302_v48 = vld [vmem:[%s1876_s0 + $0xac] sm:$0xf]  ;;  %v1061_v49 = vld [vmem:[%s1876_s0 + $0xbc] sm:$0xf0] }
  0x34   :  { %745 = vmatpush.bf16.msrb.mxu3 %v1348_v50  ;;  %v1067_v50 = vld [vmem:[%s1876_s0 + $0xb0] sm:$0xf] }
  0x36   :  { %697 = vmatpush.bf16.msrb.mxu2 %v1339_v51  ;;  %648 = vmatpush.bf16.msrb.mxu1 %v1331_v52  ;;  %v1305_v51 = vld [vmem:[%s1876_s0 + $0xc0] sm:$0xf0]  ;;  %v1056_v52 = vor.u32 %v1301_v44, %v1053_v45 }
  0x38   :  { %746 = vmatpush.bf16.msrb.mxu3 %v1347_v53  ;;  %v1060_v53 = vor.u32 %v1304_v47, %v1059_v46 }
  0x3a   :  { %698 = vmatpush.bf16.msrb.mxu2 %v1338_v54  ;;  %649 = vmatpush.bf16.msrb.mxu1 %v1330_v55  ;;  %v1064_v54 = vor.u32 %v1302_v48, %v1061_v49  ;;  %v1068_v55 = vor.u32 %v1305_v51, %v1067_v50 }
  0x3c   :  { %747 = vmatpush.bf16.msrb.mxu3 %v1346_v56  ;;  %v1306_v56 = vld [vmem:[%s1876_s0 + $0xcc] sm:$0xf] }
  0x3e   :  { %699 = vmatpush.bf16.msrb.mxu2 %v1337_v57  ;;  %650 = vmatpush.bf16.msrb.mxu1 %v1329_v58  ;;  %v1073_v57 = vld [vmem:[%s1876_s0 + $0xdc] sm:$0xf0]  ;;  %v1079_v58 = vld [vmem:[%s1876_s0 + $0xd0] sm:$0xf] }
  0x3f   :  { %v1076_v0 = vor.u32 %v1306_v56, %v1073_v57 }
  0x40   :  { %748 = vmatpush.bf16.msrb.mxu3 %v1345_v59  ;;  %v1309_v59 = vld [vmem:[%s1876_s0 + $0xe0] sm:$0xf0] }
  0x41   :  { %651 = vmatmul.bf16.vlgmr.msrb.gmra.mxu1 %v976_v4  ;;  %700 = vmatmul.bf16.vlgmr.msrb.gmra.mxu2 %v980_v5  ;;  %v1080_v1 = vor.u32 %v1309_v59, %v1079_v58  ;;  %v1311_v4 = vld [vmem:[%s1876_s0 + $0xf4] sm:$0xf]  ;;  %v1093_v5 = vld [vmem:[%s1876_s0 + $0x104] sm:$0xf0] }
  0x42   :  { %v1096_v12 = vor.u32 %v1311_v4, %v1093_v5 }
  0x43   :  { %749 = vmatmul.bf16.vlgmr.msrb.gmra.mxu3 %v984_v6  ;;  %1273 = vmatmul.msk.bf16.vlgmr.msrb.gmra.mxu0 %vm569_vm0, %v988_v7  ;;  %v1099_v6 = vld [vmem:[%s1876_s0 + $0xf8] sm:$0xf]  ;;  %v1314_v7 = vld [vmem:[%s1876_s0 + $0x108] sm:$0xf0] }
  0x44   :  { %v1100_v13 = vor.u32 %v1314_v7, %v1099_v6 }
  0x51   :  { %656 = vmatmul.bf16.gmra.mxu1 %v996_v16  ;;  %705 = vmatmul.bf16.gmra.mxu2 %v1000_v17  ;;  %v1108_v16 = vor.u32 %v1315_v11, %v1107_v10 }
  0x53   :  { %754 = vmatmul.bf16.gmra.mxu3 %v1004_v18  ;;  %1274 = vmatmul.msk.bf16.gmra.mxu0 %vm569_vm0, %v1008_v19 }
  0x61   :  { %661 = vmatmul.bf16.gmra.mxu1 %v1016_v28  ;;  %710 = vmatmul.bf16.gmra.mxu2 %v1020_v29  ;;  %v1127_v28 = vld [vmem:[%s1876_s0 + $0x128] sm:$0xf]  ;;  %v1320_v29 = vld [vmem:[%s1876_s0 + $0x138] sm:$0xf0] }
  0x62   :  { %v1128_v36 = vor.u32 %v1320_v29, %v1127_v28 }
  0x63   :  { %759 = vmatmul.bf16.gmra.mxu3 %v1024_v30  ;;  %1275 = vmatmul.msk.bf16.gmra.mxu0 %vm569_vm0, %v1028_v31 }
  0x71   :  { %666 = vmatmul.bf16.gmra.mxu1 %v1036_v40  ;;  %715 = vmatmul.bf16.gmra.mxu2 %v1040_v41 }
  0x73   :  { %764 = vmatmul.bf16.gmra.mxu3 %v1044_v42  ;;  %1276 = vmatmul.msk.bf16.gmra.mxu0 %vm569_vm0, %v1048_v43 }
  0x81   :  { %671 = vmatmul.bf16.gmra.mxu1 %v1056_v52  ;;  %720 = vmatmul.bf16.gmra.mxu2 %v1060_v53 }
  0x83   :  { %769 = vmatmul.bf16.gmra.mxu3 %v1064_v54  ;;  %1277 = vmatmul.msk.bf16.gmra.mxu0 %vm569_vm0, %v1068_v55 }
  0x91   :  { %676 = vmatmul.bf16.gmra.mxu1 %v1076_v0  ;;  %725 = vmatmul.bf16.gmra.mxu2 %v1080_v1 }
  0x93   :  { %774 = vmatmul.bf16.gmra.mxu3 %v1084_v2  ;;  %1278 = vmatmul.msk.bf16.gmra.mxu0 %vm569_vm0, %v1088_v3 }
  0x9e   :  { %v1783_v14 = vpop.f32.mrf.mxu1 }
  0xa0   :  { %v603_v17 = vpop.f32.mrf.mxu0 }
  0xa1   :  { %681 = vmatmul.bf16.gmra.mxu1 %v1096_v12  ;;  %730 = vmatmul.bf16.gmra.mxu2 %v1100_v13 }
  0xa3   :  { %779 = vmatmul.bf16.gmra.mxu3 %v1104_v15  ;;  %1279 = vmatmul.msk.bf16.gmra.mxu0 %vm569_vm0, %v1108_v16 }
  0xa4   :  { %v1786_v18 = vpop.f32.mrf.mxu2 }
  0xa6   :  { %v1788_v19 = vpop.f32.mrf.mxu3  ;;  %v1790_v20 = vpop.f32.mrf.mxu1 }
  0xa8   :  { %v605_v21 = vpop.f32.mrf.mxu0 }
  0xac   :  { %v1816_v30 = vpop.f32.mrf.mxu2 }
  0xae   :  { %v1818_v31 = vpop.f32.mrf.mxu3  ;;  %v1820_v34 = vpop.f32.mrf.mxu1 }
  0xb0   :  { %v608_v37 = vpop.f32.mrf.mxu0 }
  0xb1   :  { %686 = vmatmul.bf16.gmra.mxu1 %v1116_v32  ;;  %735 = vmatmul.bf16.gmra.mxu2 %v1120_v33 }
  0xb3   :  { %784 = vmatmul.bf16.gmra.mxu3 %v1124_v35  ;;  %1280 = vmatmul.msk.bf16.gmra.mxu0 %vm569_vm0, %v1128_v36 }
  0xb4   :  { %v1823_v38 = vpop.f32.mrf.mxu2 }
  0xb6   :  { %v1825_v39 = vpop.f32.mrf.mxu3  ;;  %v1827_v40 = vpop.f32.mrf.mxu1 }
  0xb8   :  { %v610_v41 = vpop.f32.mrf.mxu0 }
  0xbc   :  { %v1829_v42 = vpop.f32.mrf.mxu2 }
  0xbe   :  { %v1831_v43 = vpop.f32.mrf.mxu3  ;;  %v652_v44 = vpop.f32.mrf.mxu1 }
  0xbf   :  { %v653_v46 = vadd.f32 %v652_v44, %v603_v17 }
  0xc0   :  { %v799_v45 = vpop.f32.mrf.mxu0 }
  0xc4   :  { %v701_v47 = vpop.f32.mrf.mxu2 }
  0xc5   :  { %v702_v49 = vadd.f32 %v701_v47, %v653_v46 }
  0xc6   :  { %v750_v48 = vpop.f32.mrf.mxu3  ;;  %v654_v50 = vpop.f32.mrf.mxu1 }
  0xc7   :  { %v751_v52 = vadd.f32 %v750_v48, %v702_v49  ;;  %v655_v53 = vadd.f32 %v654_v50, %v605_v21 }
  0xc8   :  { %v801_v51 = vpop.f32.mrf.mxu0 }
  0xc9   :  { %v800_v57 = vadd.f32 %v799_v45, %v751_v52 }
  0xcb   :  { %v861_v62 = vmul.f32 %v800_v57, %v800_v57 }
  0xcc   :  { %v703_v54 = vpop.f32.mrf.mxu2 }
  0xcd   :  { %v704_v55 = vadd.f32 %v703_v54, %v655_v53 }
  0xce   :  { %v752_v56 = vpop.f32.mrf.mxu3  ;;  %v657_v58 = vpop.f32.mrf.mxu1 }
  0xcf   :  { %v753_v59 = vadd.f32 %v752_v56, %v704_v55  ;;  %v658_v2 = vadd.f32 %v657_v58, %v608_v37 }
  0xd0   :  { %v804_v60 = vpop.f32.mrf.mxu0 }
  0xd1   :  { %v802_v61 = vadd.f32 %v801_v51, %v753_v59 }
  0xd3   :  { %v839_v63 = vadd.f32 %v802_v61, %v800_v57  ;;  %v862_v0 = vmul.f32 %v802_v61, %v802_v61  ;;  %v1360_v1 = vpack.c.bf16 %v802_v61, %v800_v57 }
  0xd4   :  { %v706_v3 = vpop.f32.mrf.mxu2 }
  0xd5   :  { %v877_v4 = vadd.f32 %v862_v0, %v861_v62  ;;  %1361 = vst [vmem:[%s1877_s2] sm:$0xff] %v1360_v1   ;;  %v707_v5 = vadd.f32 %v706_v3, %v658_v2 }
  0xd6   :  { %v755_v6 = vpop.f32.mrf.mxu3  ;;  %v659_v7 = vpop.f32.mrf.mxu1 }
  0xd7   :  { %v756_v8 = vadd.f32 %v755_v6, %v707_v5  ;;  %v660_v13 = vadd.f32 %v659_v7, %v610_v41 }
  0xd8   :  { %v806_v9 = vpop.f32.mrf.mxu0 }
  0xd9   :  { %v805_v10 = vadd.f32 %v804_v60, %v756_v8 }
  0xdb   :  { %v840_v11 = vadd.f32 %v839_v63, %v805_v10  ;;  %v863_v12 = vmul.f32 %v805_v10, %v805_v10 }
  0xdc   :  { %v708_v15 = vpop.f32.mrf.mxu2 }
  0xdd   :  { %v878_v16 = vadd.f32 %v877_v4, %v863_v12  ;;  %v709_v17 = vadd.f32 %v708_v15, %v660_v13 }
  0xde   :  { %v757_v21 = vpop.f32.mrf.mxu3  ;;  %v662_v22 = vpop.f32.mrf.mxu1 }
  0xdf   :  { %v758_v23 = vadd.f32 %v757_v21, %v709_v17  ;;  %v663_v29 = vadd.f32 %v662_v22, %v1783_v14 }
  0xe0   :  { %v809_v24 = vpop.f32.mrf.mxu0 }
  0xe1   :  { %v807_v25 = vadd.f32 %v806_v9, %v758_v23 }
  0xe3   :  { %v841_v26 = vadd.f32 %v840_v11, %v807_v25  ;;  %v864_v27 = vmul.f32 %v807_v25, %v807_v25  ;;  %v1365_v28 = vpack.c.bf16 %v807_v25, %v805_v10 }
  0xe4   :  { %v711_v32 = vpop.f32.mrf.mxu2 }
  0xe5   :  { %v879_v33 = vadd.f32 %v878_v16, %v864_v27  ;;  %1397 = vst [vmem:[%s1877_s2 + $0x8] sm:$0xff] %v1365_v28   ;;  %v712_v35 = vadd.f32 %v711_v32, %v663_v29 }
  0xe6   :  { %v760_v36 = vpop.f32.mrf.mxu3  ;;  %v664_v37 = vpop.f32.mrf.mxu1 }
  0xe7   :  { %v761_v41 = vadd.f32 %v760_v36, %v712_v35  ;;  %v665_v48 = vadd.f32 %v664_v37, %v1790_v20 }
  0xe8   :  { %v811_v44 = vpop.f32.mrf.mxu0 }
  0xe9   :  { %v810_v45 = vadd.f32 %v809_v24, %v761_v41 }
  0xeb   :  { %v842_v46 = vadd.f32 %v841_v26, %v810_v45  ;;  %v865_v47 = vmul.f32 %v810_v45, %v810_v45 }
  0xec   :  { %v713_v49 = vpop.f32.mrf.mxu2 }
  0xed   :  { %v880_v50 = vadd.f32 %v879_v33, %v865_v47  ;;  %v714_v51 = vadd.f32 %v713_v49, %v665_v48 }
  0xee   :  { %v762_v14 = vpop.f32.mrf.mxu3  ;;  %v667_v52 = vpop.f32.mrf.mxu1 }
  0xef   :  { %v763_v53 = vadd.f32 %v762_v14, %v714_v51  ;;  %v668_v59 = vadd.f32 %v667_v52, %v1820_v34 }
  0xf0   :  { %v814_v54 = vpop.f32.mrf.mxu0 }
  0xf1   :  { %v812_v55 = vadd.f32 %v811_v44, %v763_v53 }
  0xf3   :  { %v843_v56 = vadd.f32 %v842_v46, %v812_v55  ;;  %v866_v57 = vmul.f32 %v812_v55, %v812_v55  ;;  %v1370_v58 = vpack.c.bf16 %v812_v55, %v810_v45 }
  0xf4   :  { %v716_v60 = vpop.f32.mrf.mxu2 }
  0xf5   :  { %v881_v61 = vadd.f32 %v880_v50, %v866_v57  ;;  %1398 = vst [vmem:[%s1877_s2 + $0x10] sm:$0xff] %v1370_v58   ;;  %v717_v20 = vadd.f32 %v716_v60, %v668_v59 }
  0xf6   :  { %v765_v62 = vpop.f32.mrf.mxu3  ;;  %v669_v63 = vpop.f32.mrf.mxu1 }
  0xf7   :  { %v766_v0 = vadd.f32 %v765_v62, %v717_v20  ;;  %v670_v5 = vadd.f32 %v669_v63, %v1827_v40 }
  0xf8   :  { %v816_v1 = vpop.f32.mrf.mxu0 }
  0xf9   :  { %v815_v2 = vadd.f32 %v814_v54, %v766_v0 }
  0xfb   :  { %v844_v3 = vadd.f32 %v843_v56, %v815_v2  ;;  %v867_v4 = vmul.f32 %v815_v2, %v815_v2 }
  0xfc   :  { %v718_v6 = vpop.f32.mrf.mxu2 }
  0xfd   :  { %v882_v7 = vadd.f32 %v881_v61, %v867_v4  ;;  %v719_v8 = vadd.f32 %v718_v6, %v670_v5 }
  0xfe   :  { %v767_v34 = vpop.f32.mrf.mxu3  ;;  %v672_v9 = vpop.f32.mrf.mxu1 }
  0xff   :  { %v768_v10 = vadd.f32 %v767_v34, %v719_v8  ;;  %v673_v40 = vadd.f32 %v672_v9, %v1786_v18 }
 0x100   :  { %v819_v11 = vpop.f32.mrf.mxu0 }
 0x101   :  { %v817_v12 = vadd.f32 %v816_v1, %v768_v10 }
 0x103   :  { %v845_v13 = vadd.f32 %v844_v3, %v817_v12  ;;  %v868_v15 = vmul.f32 %v817_v12, %v817_v12  ;;  %v1375_v16 = vpack.c.bf16 %v817_v12, %v815_v2 }
 0x104   :  { %v721_v17 = vpop.f32.mrf.mxu2 }
 0x105   :  { %v883_v21 = vadd.f32 %v882_v7, %v868_v15  ;;  %1399 = vst [vmem:[%s1877_s2 + $0x18] sm:$0xff] %v1375_v16   ;;  %v722_v25 = vadd.f32 %v721_v17, %v673_v40 }
 0x106   :  { %v770_v22 = vpop.f32.mrf.mxu3  ;;  %v674_v23 = vpop.f32.mrf.mxu1 }
 0x107   :  { %v675_v26 = vadd.f32 %v674_v23, %v1816_v30  ;;  %v771_v28 = vadd.f32 %v770_v22, %v722_v25 }
 0x108   :  { %v821_v24 = vpop.f32.mrf.mxu0 }
 0x109   :  { %v820_v37 = vadd.f32 %v819_v11, %v771_v28 }
 0x10b   :  { %v869_v7 = vmul.f32 %v820_v37, %v820_v37  ;;  %v846_v11 = vadd.f32 %v845_v13, %v820_v37 }
 0x10c   :  { %v723_v27 = vpop.f32.mrf.mxu2 }
 0x10d   :  { %v724_v29 = vadd.f32 %v723_v27, %v675_v26  ;;  %v884_v12 = vadd.f32 %v883_v21, %v869_v7 }
 0x10e   :  { %v772_v32 = vpop.f32.mrf.mxu3  ;;  %v677_v33 = vpop.f32.mrf.mxu1 }
 0x10f   :  { %v773_v35 = vadd.f32 %v772_v32, %v724_v29  ;;  %v678_v47 = vadd.f32 %v677_v33, %v1823_v38 }
 0x110   :  { %v824_v36 = vpop.f32.mrf.mxu0 }
 0x111   :  { %v822_v41 = vadd.f32 %v821_v24, %v773_v35 }
 0x113   :  { %v1380_v44 = vpack.c.bf16 %v822_v41, %v820_v37  ;;  %v870_v9 = vmul.f32 %v822_v41, %v822_v41  ;;  %v847_v17 = vadd.f32 %v846_v11, %v822_v41 }
 0x114   :  { %v726_v45 = vpop.f32.mrf.mxu2 }
 0x115   :  { %1400 = vst [vmem:[%s1877_s2 + $0x20] sm:$0xff] %v1380_v44   ;;  %v727_v48 = vadd.f32 %v726_v45, %v678_v47  ;;  %v885_v23 = vadd.f32 %v884_v12, %v870_v9 }
 0x116   :  { %v775_v18 = vpop.f32.mrf.mxu3  ;;  %v679_v46 = vpop.f32.mrf.mxu1 }
 0x117   :  { %v680_v49 = vadd.f32 %v679_v46, %v1829_v42  ;;  %v776_v51 = vadd.f32 %v775_v18, %v727_v48 }
 0x118   :  { %v826_v30 = vpop.f32.mrf.mxu0 }
 0x119   :  { %v825_v55 = vadd.f32 %v824_v36, %v776_v51 }
 0x11b   :  { %v871_v15 = vmul.f32 %v825_v55, %v825_v55  ;;  %v848_v24 = vadd.f32 %v847_v17, %v825_v55 }
 0x11c   :  { %v728_v50 = vpop.f32.mrf.mxu2 }
 0x11d   :  { %v729_v14 = vadd.f32 %v728_v50, %v680_v49  ;;  %v886_v26 = vadd.f32 %v885_v23, %v871_v15 }
 0x11e   :  { %v777_v52 = vpop.f32.mrf.mxu3  ;;  %v682_v53 = vpop.f32.mrf.mxu1 }
 0x11f   :  { %v778_v54 = vadd.f32 %v777_v52, %v729_v14  ;;  %v683_v61 = vadd.f32 %v682_v53, %v1788_v19 }
 0x120   :  { %v829_v57 = vpop.f32.mrf.mxu0 }
 0x121   :  { %v827_v56 = vadd.f32 %v826_v30, %v778_v54 }
 0x123   :  { %v1385_v58 = vpack.c.bf16 %v827_v56, %v825_v55  ;;  %v872_v25 = vmul.f32 %v827_v56, %v827_v56 }
 0x124   :  { %v731_v59 = vpop.f32.mrf.mxu2 }
 0x125   :  { %1401 = vst [vmem:[%s1877_s2 + $0x28] sm:$0xff] %v1385_v58   ;;  %v732_v42 = vadd.f32 %v731_v59, %v683_v61  ;;  %v887_v32 = vadd.f32 %v886_v26, %v872_v25 }
 0x126   :  { %v780_v38 = vpop.f32.mrf.mxu3  ;;  %v684_v60 = vpop.f32.mrf.mxu1 }
 0x127   :  { %v685_v20 = vadd.f32 %v684_v60, %v1818_v31  ;;  %v781_v0 = vadd.f32 %v780_v38, %v732_v42 }
 0x128   :  { %v831_v62 = vpop.f32.mrf.mxu0 }
 0x129   :  { %v830_v5 = vadd.f32 %v829_v57, %v781_v0 }
 0x12b   :  { %v873_v27 = vmul.f32 %v830_v5, %v830_v5 }
 0x12c   :  { %v733_v63 = vpop.f32.mrf.mxu2 }
 0x12d   :  { %v734_v1 = vadd.f32 %v733_v63, %v685_v20  ;;  %v888_v37 = vadd.f32 %v887_v32, %v873_v27 }
 0x12e   :  { %v782_v2 = vpop.f32.mrf.mxu3  ;;  %v687_v3 = vpop.f32.mrf.mxu1 }
 0x12f   :  { %v783_v4 = vadd.f32 %v782_v2, %v734_v1  ;;  %v688_v34 = vadd.f32 %v687_v3, %v1825_v39  ;;  %v849_v39 = vadd.f32 %v848_v24, %v827_v56 }
 0x130   :  { %v834_v16 = vpop.f32.mrf.mxu0 }
 0x131   :  { %v832_v6 = vadd.f32 %v831_v62, %v783_v4  ;;  %v850_v33 = vadd.f32 %v849_v39, %v830_v5 }
 0x133   :  { %v1390_v8 = vpack.c.bf16 %v832_v6, %v830_v5  ;;  %v874_v35 = vmul.f32 %v832_v6, %v832_v6  ;;  %v851_v44 = vadd.f32 %v850_v33, %v832_v6 }
 0x134   :  { %v736_v10 = vpop.f32.mrf.mxu2 }
 0x135   :  { %1402 = vst [vmem:[%s1877_s2 + $0x30] sm:$0xff] %v1390_v8   ;;  %v737_v19 = vadd.f32 %v736_v10, %v688_v34  ;;  %v889_v46 = vadd.f32 %v888_v37, %v874_v35 }
 0x136   :  { %v785_v31 = vpop.f32.mrf.mxu3  ;;  %v689_v40 = vpop.f32.mrf.mxu1 }
 0x137   :  { %v786_v22 = vadd.f32 %v785_v31, %v737_v19  ;;  %v690_v13 = vadd.f32 %v689_v40, %v1831_v43 }
 0x138   :  { %v836_v18 = vpop.f32.mrf.mxu0 }
 0x139   :  { %v835_v28 = vadd.f32 %v834_v16, %v786_v22 }
 0x13b   :  { %v875_v41 = vmul.f32 %v835_v28, %v835_v28  ;;  %v852_v47 = vadd.f32 %v851_v44, %v835_v28 }
 0x13c   :  { %v738_v29 = vpop.f32.mrf.mxu2 }
 0x13d   :  { %v739_v36 = vadd.f32 %v738_v29, %v690_v13  ;;  %v890_v48 = vadd.f32 %v889_v46, %v875_v41 }
 0x13e   :  { %v787_v21 = vpop.f32.mrf.mxu3 }
 0x13f   :  { %v788_v45 = vadd.f32 %v787_v21, %v739_v36 }
 0x141   :  { %v837_v30 = vadd.f32 %v836_v18, %v788_v45 }
 0x143   :  { %v853_v49 = vadd.f32 %v852_v47, %v837_v30  ;;  %v876_v50 = vmul.f32 %v837_v30, %v837_v30  ;;  %v1395_v51 = vpack.c.bf16 %v837_v30, %v835_v28 }
 0x145   :  { %v854_v14 = vrot.slane %v853_v49, 4  ;;  %v891_v43 = vadd.f32 %v890_v48, %v876_v50  ;;  %1403 = vst [vmem:[%s1877_s2 + $0x38] sm:$0xff] %v1395_v51  }
 0x147   :  { %v855_v52 = vadd.f32 %v854_v14, %v853_v49  ;;  %v892_v53 = vrot.slane %v891_v43, 4 }
 0x149   :  { %v856_v54 = vrot.slane %v855_v52, 2  ;;  %v893_v55 = vadd.f32 %v892_v53, %v891_v43 }
 0x14b   :  { %v857_v56 = vadd.f32 %v856_v54, %v855_v52  ;;  %v894_v57 = vrot.slane %v893_v55, 2 }
 0x14d   :  { %v858_v58 = vrot.slane %v857_v56, 1  ;;  %v895_v59 = vadd.f32 %v894_v57, %v893_v55 }
 0x14f   :  { %v859_v38 = vadd.f32 %v858_v58, %v857_v56  ;;  %v896_v60 = vrot.slane %v895_v59, 1 }
 0x151   :  { %860 = vst [vmem:[%s1878_s3] sm:$0x1] %v859_v38  ;;  %v897_v61 = vadd.f32 %v896_v60, %v895_v59 }
 0x153   :  { %898 = vst [vmem:[%s1879_s4] sm:$0x1] %v897_v61 }

// kernel: apply_unet.10
= control target key start
LH: loop header
LB: loop body
LE: loop exit
PB: predicated region body
PF: predicated region fallthrough
CT: control target
= control target key end

     0   :  { %s1896_s15 = smov 0   ;;  %s1898_s16 = smov 0   ;;  %s2208_s0 = inlined_call_operand.vmem [shape: bf16[512,288], index: 0, kind: input, shape index: {}]   ;;  %s2209_s1 = inlined_call_operand.vmem [shape: bf16[288,128], index: 1, kind: input, shape index: {}]   ;;  %s2210_s2 = inlined_call_operand.vmem [shape: bf16[512,128], index: 2, kind: output, shape index: {0}]   ;;  %s2211_s3 = inlined_call_operand.vmem [shape: f32[1,256], index: 3, kind: output, shape index: {1}]   ;;  %s2212_s4 = inlined_call_operand.vmem [shape: f32[1,256], index: 4, kind: output, shape index: {2}]  }
   0x1   :  { %s1900_s17 = smov 0  }
   0x2 LB: > { %s27_s18 = sadd.s32 1, %s1865_s16  ;;  %p1356_p0 = scmp.ge.s32.totalorder %s1869_s17, 1  ;;  %s1869_s17 = sphi %s1900_s17, %s15_s17   ;;  %s1865_s16 = sphi %s1898_s16, %s2214_s16   ;;  %s1861_s15 = sphi %s1896_s15, %s2213_s15  }
   0x3   : > { %p29_p1 = scmp.ge.s32.totalorder %s27_s18, 2  ;;  %p196_p2 = scmp.lt.s32.totalorder %s1869_s17, 3 }
   0x5   : > { %s2216_s18 = smov (%p29_p1, %s27_s18), 0  ;;  %p197_p3 = pnand %p1356_p0, %p196_p2 }
   0x6   : > { %s1357_s25 = sshll.u32 (!%p197_p3), %s1861_s15, 5  ;;  %p259_p5 = scmp.lt.s32.totalorder (!%p197_p3), %s1861_s15, 1 }
   0x7   : > { %200 = sbr.rel (%p197_p3) target bundleno = 397 (0x18d), region = 28  ;;  %p239_p4 = scmp.lt.s32.totalorder (!%p197_p3), %s1357_s25, 63 }
   0xc   : > { %v1698_v0 = vld [vmem:[%s2209_s1 + $0x38] sm:$0xff]  ;;  %v1927_v2 = vld [vmem:[%s2209_s1 + $0x88] sm:$0xff]  ;;  %v1697_v3 = vld [vmem:[%s2209_s1 + $0x30] sm:$0xff]  ;;  %s2218_s25 = smov (!%p239_p4, %s1357_s25), 63  ;;  %vm717_vm0 = vcmask 261120   ;;  %s2220_s15 = smov (!%p259_p5, %s1861_s15), 1 }
   0xd   : > { %v1922_v1 = vld [vmem:[%s2209_s1 + $0x78] sm:$0xff]  ;;  %766 = vmatpush.bf16.msra.mxu0 %v1698_v0  ;;  %1804 = vmatpush.bf16.msra.mxu3 %v1698_v0  ;;  %v1705_v4 = vld [vmem:[%s2209_s1 + $0x70] sm:$0xff]  ;;  %v1941_v5 = vld [vmem:[%s2209_s1 + $0x80] sm:$0xff]  ;;  %s1822_s6 = smul.u32 12, %s2218_s25  ;;  %s1360_s14 = sshll.u32 %s2218_s25, 2 }
   0xe   : > { %855 = vmatpush.bf16.msra.mxu1 %v1922_v1  ;;  %950 = vmatpush.bf16.msra.mxu2 %v1927_v2  ;;  %v1696_v6 = vld [vmem:[%s2209_s1 + $0x28] sm:$0xff]  ;;  %v1695_v11 = vld [vmem:[%s2209_s1 + $0x20] sm:$0xff]  ;;  %v1694_v13 = vld [vmem:[%s2209_s1 + $0x18] sm:$0xff]  ;;  %s2088_s21 = scalar_lea.vmem %s2210_s2, %s1360_s14  ;;  %s261_s22 = scalar_lea.vmem %s2211_s3, %s2220_s15 }
   0xf   : > { %v1704_v7 = vld [vmem:[%s2209_s1 + $0x68] sm:$0xff]  ;;  %s1956_s13 = scalar_lea.vmem %s2208_s0, %s1822_s6  ;;  %v1703_v12 = vld [vmem:[%s2209_s1 + $0x60] sm:$0xff]  ;;  %v1702_v14 = vld [vmem:[%s2209_s1 + $0x58] sm:$0xff]  ;;  %s266_s26 = scalar_lea.vmem %s2212_s4, %s2220_s15 }
  0x10   : > { %v1371_v8 = vld [vmem:[%s1956_s13 + $0x8] sm:$0xf]  ;;  %v1645_v9 = vld [vmem:[%s1956_s13 + $0x10] sm:$0xf0]  ;;  %v1383_v17 = vld [vmem:[%s1956_s13 + $0x20] sm:$0xf] }
  0x11   : > { %767 = vmatpush.bf16.msra.mxu0 %v1697_v3  ;;  %1805 = vmatpush.bf16.msra.mxu3 %v1697_v3  ;;  %v1372_v10 = vor.u32 %v1645_v9, %v1371_v8  ;;  %v1693_v15 = vld [vmem:[%s2209_s1 + $0x10] sm:$0xff]  ;;  %v1648_v18 = vld [vmem:[%s1956_s13 + $0x28] sm:$0xf0]  ;;  %v1691_v22 = vld [vmem:[%s2209_s1] sm:$0xff] }
  0x12   : > { %856 = vmatpush.bf16.msra.mxu1 %v1705_v4  ;;  %951 = vmatpush.bf16.msra.mxu2 %v1941_v5  ;;  %v1701_v16 = vld [vmem:[%s2209_s1 + $0x50] sm:$0xff]  ;;  %v1692_v19 = vld [vmem:[%s2209_s1 + $0x8] sm:$0xff]  ;;  %v1384_v21 = vor.u32 %v1648_v18, %v1383_v17  ;;  %v1363_v23 = vld [vmem:[%s1956_s13] sm:$0xf] }
  0x13   : > { %v1700_v20 = vld [vmem:[%s2209_s1 + $0x48] sm:$0xff]  ;;  %v1507_v25 = vld [vmem:[%s1956_s13 + $0x120] sm:$0xf]  ;;  %v1643_v28 = vld [vmem:[%s1956_s13 + $0x4] sm:$0xf] }
  0x14   : > { %v1644_v24 = vld [vmem:[%s1956_s13 + $0x8] sm:$0xf0]  ;;  %v1699_v27 = vld [vmem:[%s2209_s1 + $0x40] sm:$0xff]  ;;  %v1365_v29 = vld [vmem:[%s1956_s13 + $0xc] sm:$0xf0] }
  0x15   : > { %768 = vmatpush.bf16.msra.mxu0 %v1696_v6  ;;  %1806 = vmatpush.bf16.msra.mxu3 %v1696_v6  ;;  %v1680_v26 = vld [vmem:[%s1956_s13 + $0x128] sm:$0xf0]  ;;  %v1364_v30 = vor.u32 %v1644_v24, %v1363_v23  ;;  %v1368_v32 = vor.u32 %v1643_v28, %v1365_v29  ;;  %v1395_v33 = vld [vmem:[%s1956_s13 + $0x38] sm:$0xf]  ;;  %v1651_v34 = vld [vmem:[%s1956_s13 + $0x40] sm:$0xf0] }
  0x16   : > { %857 = vmatpush.bf16.msra.mxu1 %v1704_v7  ;;  %1625 = vmatmul.msk.bf16.vlgmr.msra.gmra.mxu2 %vm717_vm0, %v1372_v10  ;;  %v1508_v31 = vor.u32 %v1680_v26, %v1507_v25  ;;  %v1396_v35 = vor.u32 %v1651_v34, %v1395_v33  ;;  %v1375_v36 = vld [vmem:[%s1956_s13 + $0x18] sm:$0xf]  ;;  %v1647_v37 = vld [vmem:[%s1956_s13 + $0x20] sm:$0xf0]  ;;  %v1646_v40 = vld [vmem:[%s1956_s13 + $0x1c] sm:$0xf] }
  0x17   : > { %v1519_v38 = vld [vmem:[%s1956_s13 + $0x138] sm:$0xf]  ;;  %v1683_v39 = vld [vmem:[%s1956_s13 + $0x140] sm:$0xf0]  ;;  %v1377_v41 = vld [vmem:[%s1956_s13 + $0x24] sm:$0xf0]  ;;  %v1376_v42 = vor.u32 %v1647_v37, %v1375_v36 }
  0x18   : > { %v1520_v43 = vor.u32 %v1683_v39, %v1519_v38  ;;  %v1380_v44 = vor.u32 %v1646_v40, %v1377_v41  ;;  %v1407_v45 = vld [vmem:[%s1956_s13 + $0x50] sm:$0xf]  ;;  %v1654_v46 = vld [vmem:[%s1956_s13 + $0x58] sm:$0xf0]  ;;  %v1649_v52 = vld [vmem:[%s1956_s13 + $0x34] sm:$0xf] }
  0x19   : > { %769 = vmatpush.bf16.msra.mxu0 %v1695_v11  ;;  %1807 = vmatpush.bf16.msra.mxu3 %v1695_v11  ;;  %v1408_v47 = vor.u32 %v1654_v46, %v1407_v45  ;;  %v1387_v48 = vld [vmem:[%s1956_s13 + $0x30] sm:$0xf]  ;;  %v1650_v49 = vld [vmem:[%s1956_s13 + $0x38] sm:$0xf0]  ;;  %v1389_v53 = vld [vmem:[%s1956_s13 + $0x3c] sm:$0xf0] }
  0x1a   : > { %858 = vmatpush.bf16.msra.mxu1 %v1703_v12  ;;  %v1531_v50 = vld [vmem:[%s1956_s13 + $0x150] sm:$0xf]  ;;  %v1686_v51 = vld [vmem:[%s1956_s13 + $0x158] sm:$0xf0]  ;;  %v1388_v54 = vor.u32 %v1650_v49, %v1387_v48  ;;  %v1392_v56 = vor.u32 %v1649_v52, %v1389_v53  ;;  %v1419_v57 = vld [vmem:[%s1956_s13 + $0x68] sm:$0xf] }
  0x1b   : > { %v1532_v55 = vor.u32 %v1686_v51, %v1531_v50  ;;  %v1657_v58 = vld [vmem:[%s1956_s13 + $0x70] sm:$0xf0]  ;;  %v1399_v60 = vld [vmem:[%s1956_s13 + $0x48] sm:$0xf]  ;;  %v1652_v0 = vld [vmem:[%s1956_s13 + $0x4c] sm:$0xf] }
  0x1c   : > { %v1420_v59 = vor.u32 %v1657_v58, %v1419_v57  ;;  %v1653_v61 = vld [vmem:[%s1956_s13 + $0x50] sm:$0xf0]  ;;  %v1543_v62 = vld [vmem:[%s1956_s13 + $0x168] sm:$0xf]  ;;  %v1660_v6 = vld [vmem:[%s1956_s13 + $0x88] sm:$0xf0] }
  0x1d   : > { %770 = vmatpush.bf16.msra.mxu0 %v1694_v13  ;;  %1808 = vmatpush.bf16.msra.mxu3 %v1694_v13  ;;  %v1689_v63 = vld [vmem:[%s1956_s13 + $0x170] sm:$0xf0]  ;;  %v1411_v8 = vld [vmem:[%s1956_s13 + $0x60] sm:$0xf]  ;;  %v1656_v9 = vld [vmem:[%s1956_s13 + $0x68] sm:$0xf0] }
  0x1e   : > { %859 = vmatpush.bf16.msra.mxu1 %v1702_v14  ;;  %v1544_v3 = vor.u32 %v1689_v63, %v1543_v62  ;;  %v1679_v10 = vld [vmem:[%s1956_s13 + $0x124] sm:$0xf]  ;;  %v1509_v11 = vld [vmem:[%s1956_s13 + $0x12c] sm:$0xf0]  ;;  %v1443_v17 = vld [vmem:[%s1956_s13 + $0x98] sm:$0xf] }
  0x1f   : > { %v1413_v13 = vld [vmem:[%s1956_s13 + $0x6c] sm:$0xf0]  ;;  %v1663_v18 = vld [vmem:[%s1956_s13 + $0xa0] sm:$0xf0]  ;;  %v1521_v23 = vld [vmem:[%s1956_s13 + $0x144] sm:$0xf0] }
  0x20   : > { %v1658_v24 = vld [vmem:[%s1956_s13 + $0x7c] sm:$0xf]  ;;  %v1425_v25 = vld [vmem:[%s1956_s13 + $0x84] sm:$0xf0]  ;;  %v1455_v29 = vld [vmem:[%s1956_s13 + $0xb0] sm:$0xf] }
  0x21   : > { %771 = vmatpush.bf16.msra.mxu0 %v1693_v15  ;;  %1809 = vmatpush.bf16.msra.mxu3 %v1693_v15  ;;  %v1512_v15 = vor.u32 %v1679_v10, %v1509_v11  ;;  %v1428_v28 = vor.u32 %v1658_v24, %v1425_v25  ;;  %v1662_v33 = vld [vmem:[%s1956_s13 + $0x98] sm:$0xf0]  ;;  %v1685_v34 = vld [vmem:[%s1956_s13 + $0x154] sm:$0xf]  ;;  %v1437_v37 = vld [vmem:[%s1956_s13 + $0x9c] sm:$0xf0] }
  0x22   : > { %860 = vmatpush.bf16.msra.mxu1 %v1701_v16  ;;  %v1661_v36 = vld [vmem:[%s1956_s13 + $0x94] sm:$0xf]  ;;  %v1467_v41 = vld [vmem:[%s1956_s13 + $0xc8] sm:$0xf]  ;;  %v1688_v46 = vld [vmem:[%s1956_s13 + $0x16c] sm:$0xf] }
  0x23   : > { %v1440_v40 = vor.u32 %v1661_v36, %v1437_v37  ;;  %v1665_v45 = vld [vmem:[%s1956_s13 + $0xb0] sm:$0xf0]  ;;  %v1664_v48 = vld [vmem:[%s1956_s13 + $0xac] sm:$0xf]  ;;  %v1449_v49 = vld [vmem:[%s1956_s13 + $0xb4] sm:$0xf0] }
  0x24   : > { %v1452_v53 = vor.u32 %v1664_v48, %v1449_v49  ;;  %v1459_v58 = vld [vmem:[%s1956_s13 + $0xc0] sm:$0xf]  ;;  %v1667_v62 = vld [vmem:[%s1956_s13 + $0xc4] sm:$0xf]  ;;  %v1461_v63 = vld [vmem:[%s1956_s13 + $0xcc] sm:$0xf0] }
  0x25   : > { %772 = vmatpush.bf16.msra.mxu0 %v1692_v19  ;;  %1810 = vmatpush.bf16.msra.mxu3 %v1692_v19  ;;  %v1444_v19 = vor.u32 %v1663_v18, %v1443_v17  ;;  %v1671_v18 = vld [vmem:[%s1956_s13 + $0xe0] sm:$0xf0]  ;;  %v1483_v49 = vld [vmem:[%s1956_s13 + $0xf0] sm:$0xf] }
  0x26   : > { %861 = vmatpush.bf16.msra.mxu1 %v1700_v20  ;;  %1626 = vmatmul.msk.bf16.gmra.mxu2 %vm717_vm0, %v1384_v21  ;;  %v1659_v21 = vld [vmem:[%s1956_s13 + $0x80] sm:$0xf0] }
  0x29   : > { %773 = vmatpush.bf16.msra.mxu0 %v1691_v22  ;;  %1811 = vmatpush.bf16.msra.mxu3 %v1691_v22  ;;  %v1682_v22 = vld [vmem:[%s1956_s13 + $0x13c] sm:$0xf] }
  0x2a   : > { %862 = vmatpush.bf16.msra.mxu1 %v1699_v27 }
  0x2c   : > { %774 = vmatmul.bf16.vlgmr.msra.gmra.mxu0 %v1364_v30  ;;  %834 = vmatmul.bf16.vlgmr.msra.gmra.mxu3 %v1508_v31  ;;  %v1666_v30 = vld [vmem:[%s1956_s13 + $0xb8] sm:$0xf0] }
  0x2d   : > { %1812 = vmatpush.bf16.msrb.mxu3 %v1922_v1  ;;  %863 = vmatmul.bf16.vlgmr.msra.gmra.mxu1 %v1368_v32  ;;  %v1401_v1 = vld [vmem:[%s1956_s13 + $0x54] sm:$0xf0]  ;;  %v1456_v31 = vor.u32 %v1666_v30, %v1455_v29  ;;  %v1435_v32 = vld [vmem:[%s1956_s13 + $0x90] sm:$0xf] }
  0x2e   : > { %v1436_v38 = vor.u32 %v1662_v33, %v1435_v32 }
  0x31   : > { %1813 = vmatpush.bf16.msrb.mxu3 %v1705_v4  ;;  %v1404_v4 = vor.u32 %v1652_v0, %v1401_v1 }
  0x35   : > { %1814 = vmatpush.bf16.msrb.mxu3 %v1704_v7 }
  0x36   : > { %1627 = vmatmul.msk.bf16.gmra.mxu2 %vm717_vm0, %v1396_v35  ;;  %v1533_v35 = vld [vmem:[%s1956_s13 + $0x15c] sm:$0xf0] }
  0x37   : > { %v1536_v39 = vor.u32 %v1685_v34, %v1533_v35 }
  0x39   : > { %1815 = vmatpush.bf16.msrb.mxu3 %v1703_v12  ;;  %v1655_v12 = vld [vmem:[%s1956_s13 + $0x64] sm:$0xf] }
  0x3c   : > { %779 = vmatmul.bf16.gmra.mxu0 %v1376_v42  ;;  %839 = vmatmul.bf16.gmra.mxu3 %v1520_v43  ;;  %v1669_v42 = vld [vmem:[%s1956_s13 + $0xd0] sm:$0xf0] }
  0x3d   : > { %1816 = vmatpush.bf16.msrb.mxu3 %v1702_v14  ;;  %868 = vmatmul.bf16.gmra.mxu1 %v1380_v44  ;;  %v1412_v14 = vor.u32 %v1656_v9, %v1411_v8  ;;  %v1468_v43 = vor.u32 %v1669_v42, %v1467_v41  ;;  %v1447_v44 = vld [vmem:[%s1956_s13 + $0xa8] sm:$0xf]  ;;  %v1491_v8 = vld [vmem:[%s1956_s13 + $0xf8] sm:$0xf]  ;;  %v1675_v9 = vld [vmem:[%s1956_s13 + $0x100] sm:$0xf0] }
  0x3e   : > { %v1448_v50 = vor.u32 %v1665_v45, %v1447_v44  ;;  %v1678_v41 = vld [vmem:[%s1956_s13 + $0x118] sm:$0xf0] }
  0x41   : > { %1817 = vmatpush.bf16.msrb.mxu3 %v1701_v16  ;;  %v1416_v16 = vor.u32 %v1655_v12, %v1413_v13  ;;  %v1492_v13 = vor.u32 %v1675_v9, %v1491_v8 }
  0x45   : > { %1818 = vmatpush.bf16.msrb.mxu3 %v1700_v20  ;;  %v1423_v20 = vld [vmem:[%s1956_s13 + $0x78] sm:$0xf] }
  0x46   : > { %1628 = vmatmul.msk.bf16.gmra.mxu2 %vm717_vm0, %v1408_v47  ;;  %v1424_v26 = vor.u32 %v1659_v21, %v1423_v20  ;;  %v1545_v47 = vld [vmem:[%s1956_s13 + $0x174] sm:$0xf0]  ;;  %v1690_v20 = vld [vmem:[%s1956_s13 + $0x178] sm:$0xf0] }
  0x47   : > { %v1548_v51 = vor.u32 %v1688_v46, %v1545_v47  ;;  %v1670_v21 = vld [vmem:[%s1956_s13 + $0xdc] sm:$0xf] }
  0x49   : > { %1819 = vmatpush.bf16.msrb.mxu3 %v1699_v27  ;;  %v1524_v27 = vor.u32 %v1682_v22, %v1521_v23  ;;  %v1473_v22 = vld [vmem:[%s1956_s13 + $0xe4] sm:$0xf0] }
  0x4a   : > { %v1476_v33 = vor.u32 %v1670_v21, %v1473_v22 }
  0x4c   : > { %784 = vmatmul.bf16.gmra.mxu0 %v1388_v54  ;;  %844 = vmatmul.bf16.gmra.mxu3 %v1532_v55  ;;  %v1479_v54 = vld [vmem:[%s1956_s13 + $0xe0] sm:$0xf]  ;;  %v1672_v55 = vld [vmem:[%s1956_s13 + $0xe8] sm:$0xf0] }
  0x4d   : > { %1820 = vmatpush.bf16.msra.mxu3 %v1927_v2  ;;  %873 = vmatmul.bf16.gmra.mxu1 %v1392_v56  ;;  %v1400_v2 = vor.u32 %v1653_v61, %v1399_v60  ;;  %v1480_v57 = vor.u32 %v1672_v55, %v1479_v54  ;;  %v1539_v60 = vld [vmem:[%s1956_s13 + $0x158] sm:$0xf]  ;;  %v1687_v61 = vld [vmem:[%s1956_s13 + $0x160] sm:$0xf0] }
  0x4e   : > { %v1540_v1 = vor.u32 %v1687_v61, %v1539_v60 }
  0x51   : > { %1821 = vmatpush.bf16.msra.mxu3 %v1941_v5  ;;  %v1431_v5 = vld [vmem:[%s1956_s13 + $0x80] sm:$0xf] }
  0x52   : > { %v1432_v7 = vor.u32 %v1660_v6, %v1431_v5 }
  0x56   : > { %1629 = vmatmul.msk.bf16.gmra.mxu2 %vm717_vm0, %v1420_v59  ;;  %v1668_v59 = vld [vmem:[%s1956_s13 + $0xc8] sm:$0xf0] }
  0x57   : > { %v1460_v0 = vor.u32 %v1668_v59, %v1459_v58 }
  0x5c   : > { %789 = vmatmul.bf16.gmra.mxu0 %v1400_v2  ;;  %849 = vmatmul.bf16.gmra.mxu3 %v1544_v3 }
  0x5d   : > { %878 = vmatmul.bf16.gmra.mxu1 %v1404_v4  ;;  %v1464_v4 = vor.u32 %v1667_v62, %v1461_v63 }
  0x66   : > { %1630 = vmatmul.msk.bf16.gmra.mxu2 %vm717_vm0, %v1432_v7 }
  0x6c   : > { %794 = vmatmul.bf16.gmra.mxu0 %v1412_v14  ;;  %923 = vmatmul.bf16.vlgmr.msrb.gmra.mxu3 %v1512_v15 }
  0x6d   : > { %883 = vmatmul.bf16.gmra.mxu1 %v1416_v16  ;;  %v1471_v16 = vld [vmem:[%s1956_s13 + $0xd8] sm:$0xf] }
  0x76   : > { %1631 = vmatmul.msk.bf16.gmra.mxu2 %vm717_vm0, %v1444_v19  ;;  %v1551_v19 = vld [vmem:[%s1956_s13 + $0x170] sm:$0xf] }
  0x77   : > { %v1552_v29 = vor.u32 %v1690_v20, %v1551_v19 }
  0x7c   : > { %799 = vmatmul.bf16.gmra.mxu0 %v1424_v26  ;;  %928 = vmatmul.bf16.gmra.mxu3 %v1524_v27 }
  0x7d   : > { %888 = vmatmul.bf16.gmra.mxu1 %v1428_v28  ;;  %v1472_v28 = vor.u32 %v1671_v18, %v1471_v16  ;;  %v1676_v16 = vld [vmem:[%s1956_s13 + $0x10c] sm:$0xf] }
  0x86   : > { %1632 = vmatmul.msk.bf16.gmra.mxu2 %vm717_vm0, %v1456_v31 }
  0x8c   : > { %804 = vmatmul.bf16.gmra.mxu0 %v1436_v38  ;;  %933 = vmatmul.bf16.gmra.mxu3 %v1536_v39 }
  0x8d   : > { %893 = vmatmul.bf16.gmra.mxu1 %v1440_v40  ;;  %v1503_v40 = vld [vmem:[%s1956_s13 + $0x110] sm:$0xf] }
  0x8e   : > { %v1504_v46 = vor.u32 %v1678_v41, %v1503_v40 }
  0x96   : > { %1633 = vmatmul.msk.bf16.gmra.mxu2 %vm717_vm0, %v1468_v43 }
  0x99   : > { %v953_v52 = vpop.f32.mrf.mxu2 }
  0x9c   : > { %809 = vmatmul.bf16.gmra.mxu0 %v1448_v50  ;;  %938 = vmatmul.bf16.gmra.mxu3 %v1548_v51  ;;  %v1674_v50 = vld [vmem:[%s1956_s13 + $0xf8] sm:$0xf0]  ;;  %v1673_v51 = vld [vmem:[%s1956_s13 + $0xf4] sm:$0xf] }
  0x9d   : > { %898 = vmatmul.bf16.gmra.mxu1 %v1452_v53 }
  0xa1   : > { %v955_v56 = vpop.f32.mrf.mxu2 }
  0xa6   : > { %1634 = vmatmul.msk.bf16.gmra.mxu2 %vm717_vm0, %v1480_v57  ;;  %v1484_v57 = vor.u32 %v1674_v50, %v1483_v49 }
  0xa9   : > { %v958_v2 = vpop.f32.mrf.mxu2  ;;  %v775_v3 = vpop.f32.mrf.mxu0 }
  0xaa   : > { %v864_v5 = vpop.f32.mrf.mxu1 }
  0xab   : > { %v865_v6 = vadd.f32 %v864_v5, %v775_v3  ;;  %v1681_v5 = vld [vmem:[%s1956_s13 + $0x130] sm:$0xf0] }
  0xac   : > { %814 = vmatmul.bf16.gmra.mxu0 %v1460_v0  ;;  %1639 = vmatmul.msk.bf16.vlgmr.msra.gmra.mxu3 %vm717_vm0, %v1540_v1 }
  0xad   : > { %903 = vmatmul.bf16.gmra.mxu1 %v1464_v4  ;;  %v954_v14 = vadd.f32 %v953_v52, %v865_v6  ;;  %v1485_v52 = vld [vmem:[%s1956_s13 + $0xfc] sm:$0xf0]  ;;  %v1515_v4 = vld [vmem:[%s1956_s13 + $0x128] sm:$0xf] }
  0xae   : > { %v1488_v61 = vor.u32 %v1673_v51, %v1485_v52 }
  0xaf   : > { %v2076_v7 = vpop.f32.mrf.mxu3  ;;  %v1071_v23 = vmul.f32 %v954_v14, %v954_v14 }
  0xb1   : > { %v960_v10 = vpop.f32.mrf.mxu2  ;;  %v777_v11 = vpop.f32.mrf.mxu0 }
  0xb2   : > { %v866_v12 = vpop.f32.mrf.mxu1 }
  0xb3   : > { %v867_v15 = vadd.f32 %v866_v12, %v777_v11  ;;  %v1516_v11 = vor.u32 %v1681_v5, %v1515_v4 }
  0xb5   : > { %v956_v17 = vadd.f32 %v955_v56, %v867_v15  ;;  %v1677_v15 = vld [vmem:[%s1956_s13 + $0x110] sm:$0xf0] }
  0xb6   : > { %1635 = vmatmul.msk.bf16.gmra.mxu2 %vm717_vm0, %v1492_v13 }
  0xb7   : > { %v1033_v24 = vadd.f32 %v956_v17, %v954_v14  ;;  %v1072_v25 = vmul.f32 %v956_v17, %v956_v17  ;;  %v1712_v26 = vpack.c.bf16 %v956_v17, %v954_v14  ;;  %v2093_v27 = vpop.f32.mrf.mxu3  ;;  %v1495_v14 = vld [vmem:[%s1956_s13 + $0x108] sm:$0xf]  ;;  %v1497_v17 = vld [vmem:[%s1956_s13 + $0x114] sm:$0xf0] }
  0xb8   : > { %v1496_v22 = vor.u32 %v1677_v15, %v1495_v14 }
  0xb9   : > { %v1103_v30 = vadd.f32 %v1072_v25, %v1071_v23  ;;  %1713 = vst [vmem:[%s2088_s21] sm:$0xff] %v1712_v26   ;;  %v963_v31 = vpop.f32.mrf.mxu2  ;;  %v780_v32 = vpop.f32.mrf.mxu0  ;;  %v1500_v26 = vor.u32 %v1676_v16, %v1497_v17 }
  0xba   : > { %v869_v34 = vpop.f32.mrf.mxu1 }
  0xbb   : > { %v870_v35 = vadd.f32 %v869_v34, %v780_v32  ;;  %v1527_v34 = vld [vmem:[%s1956_s13 + $0x140] sm:$0xf] }
  0xbc   : > { %819 = vmatmul.bf16.gmra.mxu0 %v1472_v28  ;;  %1640 = vmatmul.msk.bf16.gmra.mxu3 %vm717_vm0, %v1552_v29 }
  0xbd   : > { %v959_v36 = vadd.f32 %v958_v2, %v870_v35  ;;  %908 = vmatmul.bf16.gmra.mxu1 %v1476_v33  ;;  %v1684_v35 = vld [vmem:[%s1956_s13 + $0x148] sm:$0xf0] }
  0xbe   : > { %v1528_v41 = vor.u32 %v1684_v35, %v1527_v34 }
  0xbf   : > { %v1034_v37 = vadd.f32 %v1033_v24, %v959_v36  ;;  %v1073_v38 = vmul.f32 %v959_v36, %v959_v36  ;;  %v2097_v39 = vpop.f32.mrf.mxu3 }
  0xc1   : > { %v1104_v42 = vadd.f32 %v1103_v30, %v1073_v38  ;;  %v965_v43 = vpop.f32.mrf.mxu2  ;;  %v782_v44 = vpop.f32.mrf.mxu0 }
  0xc2   : > { %v871_v45 = vpop.f32.mrf.mxu1 }
  0xc3   : > { %v872_v47 = vadd.f32 %v871_v45, %v782_v44 }
  0xc5   : > { %v961_v48 = vadd.f32 %v960_v10, %v872_v47 }
  0xc6   : > { %1636 = vmatmul.msk.bf16.gmra.mxu2 %vm717_vm0, %v1504_v46 }
  0xc7   : > { %v1035_v53 = vadd.f32 %v1034_v37, %v961_v48  ;;  %v1074_v54 = vmul.f32 %v961_v48, %v961_v48  ;;  %v1717_v55 = vpack.c.bf16 %v961_v48, %v959_v36  ;;  %v2106_v56 = vpop.f32.mrf.mxu3 }
  0xc9   : > { %v1105_v58 = vadd.f32 %v1104_v42, %v1074_v54  ;;  %1789 = vst [vmem:[%s2088_s21 + $0x8] sm:$0xff] %v1717_v55   ;;  %v968_v59 = vpop.f32.mrf.mxu2  ;;  %v785_v60 = vpop.f32.mrf.mxu0 }
  0xca   : > { %v874_v62 = vpop.f32.mrf.mxu1 }
  0xcb   : > { %v875_v63 = vadd.f32 %v874_v62, %v785_v60 }
  0xcc   : > { %824 = vmatmul.bf16.gmra.mxu0 %v1484_v57 }
  0xcd   : > { %v964_v0 = vadd.f32 %v963_v31, %v875_v63  ;;  %913 = vmatmul.bf16.gmra.mxu1 %v1488_v61 }
  0xcf   : > { %v1036_v1 = vadd.f32 %v1035_v53, %v964_v0  ;;  %v1075_v2 = vmul.f32 %v964_v0, %v964_v0  ;;  %v2109_v3 = vpop.f32.mrf.mxu3 }
  0xd1   : > { %v1106_v6 = vadd.f32 %v1105_v58, %v1075_v2  ;;  %v970_v8 = vpop.f32.mrf.mxu2  ;;  %v787_v9 = vpop.f32.mrf.mxu0 }
  0xd2   : > { %v876_v10 = vpop.f32.mrf.mxu1 }
  0xd3   : > { %v877_v12 = vadd.f32 %v876_v10, %v787_v9 }
  0xd5   : > { %v966_v13 = vadd.f32 %v965_v43, %v877_v12 }
  0xd6   : > { %1637 = vmatmul.msk.bf16.gmra.mxu2 %vm717_vm0, %v1516_v11 }
  0xd7   : > { %v1037_v18 = vadd.f32 %v1036_v1, %v966_v13  ;;  %v1076_v19 = vmul.f32 %v966_v13, %v966_v13  ;;  %v1722_v20 = vpack.c.bf16 %v966_v13, %v964_v0  ;;  %v2118_v21 = vpop.f32.mrf.mxu3 }
  0xd9   : > { %v1107_v23 = vadd.f32 %v1106_v6, %v1076_v19  ;;  %1790 = vst [vmem:[%s2088_s21 + $0x10] sm:$0xff] %v1722_v20   ;;  %v973_v24 = vpop.f32.mrf.mxu2  ;;  %v790_v25 = vpop.f32.mrf.mxu0 }
  0xda   : > { %v879_v28 = vpop.f32.mrf.mxu1 }
  0xdb   : > { %v880_v29 = vadd.f32 %v879_v28, %v790_v25 }
  0xdc   : > { %829 = vmatmul.bf16.gmra.mxu0 %v1496_v22 }
  0xdd   : > { %v969_v30 = vadd.f32 %v968_v59, %v880_v29  ;;  %918 = vmatmul.bf16.gmra.mxu1 %v1500_v26 }
  0xdf   : > { %v1038_v31 = vadd.f32 %v1037_v18, %v969_v30  ;;  %v1077_v32 = vmul.f32 %v969_v30, %v969_v30  ;;  %v2121_v33 = vpop.f32.mrf.mxu3 }
  0xe1   : > { %v1108_v36 = vadd.f32 %v1107_v23, %v1077_v32  ;;  %v975_v37 = vpop.f32.mrf.mxu2  ;;  %v792_v38 = vpop.f32.mrf.mxu0 }
  0xe2   : > { %v881_v40 = vpop.f32.mrf.mxu1 }
  0xe3   : > { %v882_v42 = vadd.f32 %v881_v40, %v792_v38 }
  0xe5   : > { %v971_v43 = vadd.f32 %v970_v8, %v882_v42 }
  0xe6   : > { %1638 = vmatmul.msk.bf16.gmra.mxu2 %vm717_vm0, %v1528_v41 }
  0xe7   : > { %v1039_v44 = vadd.f32 %v1038_v31, %v971_v43  ;;  %v1078_v45 = vmul.f32 %v971_v43, %v971_v43  ;;  %v1727_v46 = vpack.c.bf16 %v971_v43, %v969_v30  ;;  %v2126_v47 = vpop.f32.mrf.mxu3 }
  0xe9   : > { %v1109_v48 = vadd.f32 %v1108_v36, %v1078_v45  ;;  %1791 = vst [vmem:[%s2088_s21 + $0x18] sm:$0xff] %v1727_v46   ;;  %v978_v49 = vpop.f32.mrf.mxu2  ;;  %v795_v50 = vpop.f32.mrf.mxu0 }
  0xea   : > { %v884_v51 = vpop.f32.mrf.mxu1 }
  0xeb   : > { %v885_v52 = vadd.f32 %v884_v51, %v795_v50 }
  0xed   : > { %v974_v53 = vadd.f32 %v973_v24, %v885_v52 }
  0xef   : > { %v1040_v54 = vadd.f32 %v1039_v44, %v974_v53  ;;  %v1079_v55 = vmul.f32 %v974_v53, %v974_v53  ;;  %v924_v57 = vpop.f32.mrf.mxu3 }
  0xf0   : > { %v2130_v58 = vadd.f32 %v924_v57, %v2076_v7 }
  0xf1   : > { %v1110_v59 = vadd.f32 %v1109_v48, %v1079_v55  ;;  %v980_v60 = vpop.f32.mrf.mxu2  ;;  %v797_v61 = vpop.f32.mrf.mxu0 }
  0xf2   : > { %v886_v62 = vpop.f32.mrf.mxu1 }
  0xf3   : > { %v887_v63 = vadd.f32 %v886_v62, %v797_v61 }
  0xf5   : > { %v976_v0 = vadd.f32 %v975_v37, %v887_v63 }
  0xf7   : > { %v1041_v1 = vadd.f32 %v1040_v54, %v976_v0  ;;  %v1080_v2 = vmul.f32 %v976_v0, %v976_v0  ;;  %v1732_v4 = vpack.c.bf16 %v976_v0, %v974_v53  ;;  %v926_v5 = vpop.f32.mrf.mxu3 }
  0xf8   : > { %v2133_v6 = vadd.f32 %v926_v5, %v2093_v27 }
  0xf9   : > { %v1111_v8 = vadd.f32 %v1110_v59, %v1080_v2  ;;  %1792 = vst [vmem:[%s2088_s21 + $0x20] sm:$0xff] %v1732_v4   ;;  %v983_v9 = vpop.f32.mrf.mxu2  ;;  %v800_v10 = vpop.f32.mrf.mxu0 }
  0xfa   : > { %v889_v11 = vpop.f32.mrf.mxu1 }
  0xfb   : > { %v890_v7 = vadd.f32 %v889_v11, %v800_v10 }
  0xfd   : > { %v979_v12 = vadd.f32 %v978_v49, %v890_v7 }
  0xff   : > { %v1042_v13 = vadd.f32 %v1041_v1, %v979_v12  ;;  %v1081_v14 = vmul.f32 %v979_v12, %v979_v12  ;;  %v929_v15 = vpop.f32.mrf.mxu3 }
 0x100   : > { %v2137_v16 = vadd.f32 %v929_v15, %v2097_v39 }
 0x101   : > { %v1112_v17 = vadd.f32 %v1111_v8, %v1081_v14  ;;  %v985_v18 = vpop.f32.mrf.mxu2  ;;  %v802_v19 = vpop.f32.mrf.mxu0 }
 0x102   : > { %v891_v20 = vpop.f32.mrf.mxu1 }
 0x103   : > { %v892_v27 = vadd.f32 %v891_v20, %v802_v19 }
 0x105   : > { %v981_v22 = vadd.f32 %v980_v60, %v892_v27 }
 0x107   : > { %v1043_v23 = vadd.f32 %v1042_v13, %v981_v22  ;;  %v1082_v24 = vmul.f32 %v981_v22, %v981_v22  ;;  %v1737_v25 = vpack.c.bf16 %v981_v22, %v979_v12  ;;  %v931_v26 = vpop.f32.mrf.mxu3 }
 0x108   : > { %v2140_v28 = vadd.f32 %v931_v26, %v2106_v56 }
 0x109   : > { %v1113_v29 = vadd.f32 %v1112_v17, %v1082_v24  ;;  %1793 = vst [vmem:[%s2088_s21 + $0x28] sm:$0xff] %v1737_v25   ;;  %v988_v30 = vpop.f32.mrf.mxu2  ;;  %v805_v31 = vpop.f32.mrf.mxu0 }
 0x10a   : > { %v894_v32 = vpop.f32.mrf.mxu1 }
 0x10b   : > { %v895_v39 = vadd.f32 %v894_v32, %v805_v31 }
 0x10d   : > { %v984_v34 = vadd.f32 %v983_v9, %v895_v39 }
 0x10f   : > { %v1044_v35 = vadd.f32 %v1043_v23, %v984_v34  ;;  %v1083_v36 = vmul.f32 %v984_v34, %v984_v34  ;;  %v934_v37 = vpop.f32.mrf.mxu3 }
 0x110   : > { %v935_v14 = vadd.f32 %v934_v37, %v2109_v3 }
 0x111   : > { %v1114_v38 = vadd.f32 %v1113_v29, %v1083_v36  ;;  %v990_v40 = vpop.f32.mrf.mxu2  ;;  %v807_v41 = vpop.f32.mrf.mxu0 }
 0x112   : > { %v896_v42 = vpop.f32.mrf.mxu1 }
 0x113   : > { %v897_v43 = vadd.f32 %v896_v42, %v807_v41 }
 0x115   : > { %v986_v44 = vadd.f32 %v985_v18, %v897_v43 }
 0x117   : > { %v2143_v45 = vadd.f32 %v1044_v35, %v986_v44  ;;  %v1084_v56 = vmul.f32 %v986_v44, %v986_v44  ;;  %v1742_v46 = vpack.c.bf16 %v986_v44, %v984_v34  ;;  %v936_v48 = vpop.f32.mrf.mxu3 }
 0x118   : > { %v937_v15 = vadd.f32 %v936_v48, %v2118_v21 }
 0x119   : > { %v2145_v49 = vadd.f32 %v1114_v38, %v1084_v56  ;;  %1794 = vst [vmem:[%s2088_s21 + $0x30] sm:$0xff] %v1742_v46   ;;  %v993_v50 = vpop.f32.mrf.mxu2  ;;  %v810_v51 = vpop.f32.mrf.mxu0 }
 0x11a   : > { %v899_v52 = vpop.f32.mrf.mxu1 }
 0x11b   : > { %v900_v54 = vadd.f32 %v899_v52, %v810_v51 }
 0x11d   : > { %v989_v61 = vadd.f32 %v988_v30, %v900_v54 }
 0x11f   : > { %v939_v53 = vpop.f32.mrf.mxu3 }
 0x120   : > { %v940_v39 = vadd.f32 %v939_v53, %v2121_v33 }
 0x121   : > { %v995_v55 = vpop.f32.mrf.mxu2  ;;  %v812_v57 = vpop.f32.mrf.mxu0 }
 0x122   : > { %v901_v59 = vpop.f32.mrf.mxu1 }
 0x123   : > { %v902_v60 = vadd.f32 %v901_v59, %v812_v57 }
 0x125   : > { %v991_v62 = vadd.f32 %v990_v40, %v902_v60 }
 0x127   : > { %v1747_v63 = vpack.c.bf16 %v991_v62, %v989_v61  ;;  %v941_v0 = vpop.f32.mrf.mxu3  ;;  %v1086_v51 = vmul.f32 %v991_v62, %v991_v62 }
 0x128   : > { %v942_v34 = vadd.f32 %v941_v0, %v2126_v47  ;;  %v1085_v47 = vmul.f32 %v989_v61, %v989_v61 }
 0x129   : > { %1795 = vst [vmem:[%s2088_s21 + $0x38] sm:$0xff] %v1747_v63   ;;  %v998_v1 = vpop.f32.mrf.mxu2  ;;  %v815_v2 = vpop.f32.mrf.mxu0 }
 0x12a   : > { %v904_v4 = vpop.f32.mrf.mxu1  ;;  %v1116_v54 = vadd.f32 %v2145_v49, %v1085_v47 }
 0x12b   : > { %v905_v8 = vadd.f32 %v904_v4, %v815_v2 }
 0x12c   : > { %v1117_v60 = vadd.f32 %v1116_v54, %v1086_v51 }
 0x12d   : > { %v994_v12 = vadd.f32 %v993_v50, %v905_v8  ;;  %v1046_v50 = vadd.f32 %v2143_v45, %v989_v61 }
 0x12f   : > { %v1023_v5 = vpop.f32.mrf.mxu3  ;;  %v1087_v57 = vmul.f32 %v994_v12, %v994_v12 }
 0x130   : > { %v2151_v19 = vadd.f32 %v1023_v5, %v935_v14 }
 0x131   : > { %v1000_v9 = vpop.f32.mrf.mxu2  ;;  %v817_v10 = vpop.f32.mrf.mxu0  ;;  %v1118_v5 = vadd.f32 %v1117_v60, %v1087_v57 }
 0x132   : > { %v906_v11 = vpop.f32.mrf.mxu1  ;;  %v1099_v54 = vmul.f32 %v2151_v19, %v2151_v19 }
 0x133   : > { %v907_v7 = vadd.f32 %v906_v11, %v817_v10 }
 0x135   : > { %v996_v13 = vadd.f32 %v995_v55, %v907_v7  ;;  %v1047_v55 = vadd.f32 %v1046_v50, %v991_v62 }
 0x137   : > { %v1752_v17 = vpack.c.bf16 %v996_v13, %v994_v12  ;;  %v1025_v18 = vpop.f32.mrf.mxu3  ;;  %v1048_v63 = vadd.f32 %v1047_v55, %v994_v12  ;;  %v1088_v0 = vmul.f32 %v996_v13, %v996_v13 }
 0x138   : > { %v2153_v20 = vadd.f32 %v1025_v18, %v937_v15 }
 0x139   : > { %1796 = vst [vmem:[%s2088_s21 + $0x40] sm:$0xff] %v1752_v17   ;;  %v1003_v27 = vpop.f32.mrf.mxu2  ;;  %v820_v22 = vpop.f32.mrf.mxu0  ;;  %v1049_v8 = vadd.f32 %v1048_v63, %v996_v13  ;;  %v1119_v45 = vadd.f32 %v1118_v5, %v1088_v0 }
 0x13a   : > { %v1782_v23 = vpack.c.bf16 %v2153_v20, %v2151_v19  ;;  %v909_v24 = vpop.f32.mrf.mxu1  ;;  %v1100_v57 = vmul.f32 %v2153_v20, %v2153_v20 }
 0x13b   : > { %v910_v26 = vadd.f32 %v909_v24, %v820_v22 }
 0x13c   : > { %1802 = vst [vmem:[%s2088_s21 + $0x70] sm:$0xff] %v1782_v23  }
 0x13d   : > { %v999_v31 = vadd.f32 %v998_v1, %v910_v26 }
 0x13f   : > { %v1028_v25 = vpop.f32.mrf.mxu3  ;;  %v1050_v61 = vadd.f32 %v1049_v8, %v999_v31 }
 0x140   : > { %v2161_v37 = vadd.f32 %v1028_v25, %v940_v39 }
 0x141   : > { %v1005_v3 = vpop.f32.mrf.mxu2  ;;  %v822_v29 = vpop.f32.mrf.mxu0 }
 0x142   : > { %v911_v21 = vpop.f32.mrf.mxu1 }
 0x143   : > { %v912_v30 = vadd.f32 %v911_v21, %v822_v29 }
 0x145   : > { %v1001_v32 = vadd.f32 %v1000_v9, %v912_v30  ;;  %v1089_v9 = vmul.f32 %v999_v31, %v999_v31 }
 0x147   : > { %v1757_v35 = vpack.c.bf16 %v1001_v32, %v999_v31  ;;  %v1030_v36 = vpop.f32.mrf.mxu3  ;;  %v1090_v11 = vmul.f32 %v1001_v32, %v1001_v32  ;;  %v1120_v7 = vadd.f32 %v1119_v45, %v1089_v9  ;;  %v1051_v14 = vadd.f32 %v1050_v61, %v1001_v32 }
 0x148   : > { %v2163_v38 = vadd.f32 %v1030_v36, %v942_v34 }
 0x149   : > { %1797 = vst [vmem:[%s2088_s21 + $0x48] sm:$0xff] %v1757_v35   ;;  %v1008_v40 = vpop.f32.mrf.mxu2  ;;  %v825_v41 = vpop.f32.mrf.mxu0  ;;  %v1121_v15 = vadd.f32 %v1120_v7, %v1090_v11 }
 0x14a   : > { %v1787_v42 = vpack.c.bf16 %v2163_v38, %v2161_v37  ;;  %v914_v43 = vpop.f32.mrf.mxu1 }
 0x14b   : > { %v915_v44 = vadd.f32 %v914_v43, %v825_v41 }
 0x14c   : > { %1803 = vst [vmem:[%s2088_s21 + $0x78] sm:$0xff] %v1787_v42  }
 0x14d   : > { %v1004_v52 = vadd.f32 %v1003_v27, %v915_v44 }
 0x14f   : > { %v1091_v49 = vmul.f32 %v1004_v52, %v1004_v52  ;;  %v1052_v17 = vadd.f32 %v1051_v14, %v1004_v52 }
 0x151   : > { %v1010_v56 = vpop.f32.mrf.mxu2  ;;  %v827_v33 = vpop.f32.mrf.mxu0  ;;  %v1122_v24 = vadd.f32 %v1121_v15, %v1091_v49 }
 0x152   : > { %v916_v46 = vpop.f32.mrf.mxu1 }
 0x153   : > { %v917_v48 = vadd.f32 %v916_v46, %v827_v33 }
 0x155   : > { %v1006_v53 = vadd.f32 %v1005_v3, %v917_v48 }
 0x157   : > { %v1762_v59 = vpack.c.bf16 %v1006_v53, %v1004_v52  ;;  %v1092_v12 = vmul.f32 %v1006_v53, %v1006_v53  ;;  %v1053_v25 = vadd.f32 %v1052_v17, %v1006_v53 }
 0x159   : > { %1798 = vst [vmem:[%s2088_s21 + $0x50] sm:$0xff] %v1762_v59   ;;  %v1013_v1 = vpop.f32.mrf.mxu2  ;;  %v830_v2 = vpop.f32.mrf.mxu0  ;;  %v1123_v21 = vadd.f32 %v1122_v24, %v1092_v12 }
 0x15a   : > { %v919_v4 = vpop.f32.mrf.mxu1  ;;  %v1014_v22 = vadd.f32 %v1013_v1, %v2130_v58  ;;  %v1102_v1 = vmul.f32 %v2163_v38, %v2163_v38 }
 0x15b   : > { %v920_v10 = vadd.f32 %v919_v4, %v830_v2 }
 0x15c   : > { %v1095_v36 = vmul.f32 %v1014_v22, %v1014_v22 }
 0x15d   : > { %v1009_v62 = vadd.f32 %v1008_v40, %v920_v10 }
 0x15f   : > { %v1093_v26 = vmul.f32 %v1009_v62, %v1009_v62  ;;  %v1054_v30 = vadd.f32 %v1053_v25, %v1009_v62 }
 0x161   : > { %v1015_v18 = vpop.f32.mrf.mxu2  ;;  %v832_v27 = vpop.f32.mrf.mxu0  ;;  %v1124_v32 = vadd.f32 %v1123_v21, %v1093_v26 }
 0x162   : > { %v1016_v23 = vadd.f32 %v1015_v18, %v2133_v6  ;;  %v921_v13 = vpop.f32.mrf.mxu1 }
 0x163   : > { %v922_v3 = vadd.f32 %v921_v13, %v832_v27 }
 0x164   : > { %v1772_v29 = vpack.c.bf16 %v1016_v23, %v1014_v22  ;;  %v1096_v42 = vmul.f32 %v1016_v23, %v1016_v23 }
 0x165   : > { %v1011_v31 = vadd.f32 %v1010_v56, %v922_v3 }
 0x166   : > { %1800 = vst [vmem:[%s2088_s21 + $0x60] sm:$0xff] %v1772_v29  }
 0x167   : > { %v1055_v39 = vadd.f32 %v1054_v30, %v1011_v31  ;;  %v1094_v34 = vmul.f32 %v1011_v31, %v1011_v31  ;;  %v1767_v35 = vpack.c.bf16 %v1011_v31, %v1009_v62 }
 0x169   : > { %v1125_v40 = vadd.f32 %v1124_v32, %v1094_v34  ;;  %1799 = vst [vmem:[%s2088_s21 + $0x58] sm:$0xff] %v1767_v35   ;;  %v1018_v58 = vpop.f32.mrf.mxu2  ;;  %v1056_v6 = vadd.f32 %v1055_v39, %v1014_v22 }
 0x16a   : > { %v1019_v41 = vadd.f32 %v1018_v58, %v2137_v16 }
 0x16b   : > { %v1057_v43 = vadd.f32 %v1056_v6, %v1016_v23  ;;  %v1126_v44 = vadd.f32 %v1125_v40, %v1095_v36 }
 0x16c   : > { %v1097_v33 = vmul.f32 %v1019_v41, %v1019_v41 }
 0x16d   : > { %v1058_v46 = vadd.f32 %v1057_v43, %v1019_v41  ;;  %v1127_v47 = vadd.f32 %v1126_v44, %v1096_v42 }
 0x16f   : > { %v1128_v56 = vadd.f32 %v1127_v47, %v1097_v33 }
 0x171   : > { %v1020_v48 = vpop.f32.mrf.mxu2 }
 0x172   : > { %v1021_v50 = vadd.f32 %v1020_v48, %v2140_v28  ;;  %v1101_v28 = vmul.f32 %v2161_v37, %v2161_v37 }
 0x174   : > { %v1059_v51 = vadd.f32 %v1058_v46, %v1021_v50  ;;  %v1098_v52 = vmul.f32 %v1021_v50, %v1021_v50  ;;  %v1777_v53 = vpack.c.bf16 %v1021_v50, %v1019_v41 }
 0x176   : > { %v1060_v16 = vadd.f32 %v1059_v51, %v2151_v19  ;;  %v1129_v55 = vadd.f32 %v1128_v56, %v1098_v52  ;;  %1801 = vst [vmem:[%s2088_s21 + $0x68] sm:$0xff] %v1777_v53  }
 0x178   : > { %v1061_v59 = vadd.f32 %v1060_v16, %v2153_v20  ;;  %v1130_v60 = vadd.f32 %v1129_v55, %v1099_v54 }
 0x17a   : > { %v1062_v63 = vadd.f32 %v1061_v59, %v2161_v37  ;;  %v1131_v0 = vadd.f32 %v1130_v60, %v1100_v57 }
 0x17c   : > { %v1063_v19 = vadd.f32 %v1062_v63, %v2163_v38  ;;  %v1132_v2 = vadd.f32 %v1131_v0, %v1101_v28 }
 0x17e   : > { %v1064_v4 = vrot.slane %v1063_v19, 4  ;;  %v1133_v5 = vadd.f32 %v1132_v2, %v1102_v1 }
 0x180   : > { %v1065_v8 = vadd.f32 %v1064_v4, %v1063_v19  ;;  %v1134_v9 = vrot.slane %v1133_v5, 4 }
 0x182   : > { %v1066_v10 = vrot.slane %v1065_v8, 2  ;;  %v1135_v20 = vadd.f32 %v1134_v9, %v1133_v5 }
 0x184   : > { %v1067_v45 = vadd.f32 %v1066_v10, %v1065_v8  ;;  %v1136_v61 = vrot.slane %v1135_v20, 2 }
 0x186   : > { %v1068_v11 = vrot.slane %v1067_v45, 1  ;;  %v1137_v7 = vadd.f32 %v1136_v61, %v1135_v20 }
 0x188   : > { %v1069_v37 = vadd.f32 %v1068_v11, %v1067_v45  ;;  %v1138_v14 = vrot.slane %v1137_v7, 1 }
 0x18a   : > { %1070 = vst [vmem:[%s261_s22] sm:$0x1] %v1069_v37  ;;  %v1139_v38 = vadd.f32 %v1138_v14, %v1137_v7 }
 0x18c   : > { %1140 = vst [vmem:[%s266_s26] sm:$0x1] %v1139_v38 }
 0x18d PF: > { %s15_s17 = sadd.s32 1, %s1869_s17   ;;  %s2213_s15 = smov %s1865_s16 }
 0x18e   : > { %p12_p6 = scmp.ge.s32.totalorder %s15_s17, 4   ;;  %s2214_s16 = smov %s2216_s18 }
 0x190   :  { %14 = sbr.rel (!%p12_p6) target bundleno = 2 (0x2), region = 85 }

// kernel: apply_unet.11
= control target key start
LH: loop header
LB: loop body
LE: loop exit
PB: predicated region body
PF: predicated region fallthrough
CT: control target
= control target key end

     0   :  { %s1941_s12 = smov 0   ;;  %s1943_s13 = smov 0   ;;  %s2383_s0 = inlined_call_operand.vmem [shape: bf16[2048,144], index: 0, kind: input, shape index: {}]   ;;  %s2384_s1 = inlined_call_operand.vmem [shape: bf16[144,128], index: 1, kind: input, shape index: {}]   ;;  %s2385_s2 = inlined_call_operand.vmem [shape: f32[1,128], index: 2, kind: input, shape index: {}]   ;;  %s2386_s3 = inlined_call_operand.vmem [shape: f32[2048,128], index: 3, kind: output, shape index: {}]  }
   0x1   :  { %s1945_s14 = smov 0  }
   0x2 LB: > { %s25_s15 = sadd.s32 1, %s1915_s13  ;;  %p1328_p0 = scmp.ge.s32.totalorder %s1919_s14, 1  ;;  %s1919_s14 = sphi %s1945_s14, %s13_s14   ;;  %s1915_s13 = sphi %s1943_s13, %s2388_s13   ;;  %s1911_s12 = sphi %s1941_s12, %s2387_s12  }
   0x3   : > { %p27_p1 = scmp.ge.s32.totalorder %s25_s15, 4  ;;  %p170_p2 = scmp.lt.s32.totalorder %s1919_s14, 5 }
   0x5   : > { %s2390_s15 = smov (%p27_p1, %s25_s15), 0  ;;  %p171_p3 = pnand %p1328_p0, %p170_p2 }
   0x6   : > { %s1329_s20 = sshll.u32 (!%p171_p3), %s1911_s12, 6 }
   0x7   : > { %174 = sbr.rel (%p171_p3) target bundleno = 436 (0x1b4), region = 32  ;;  %p206_p4 = scmp.lt.s32.totalorder (!%p171_p3), %s1329_s20, 255 }
   0xc   : > { %v1732_v0 = vld [vmem:[%s2384_s1 + $0x38] sm:$0xff]  ;;  %v1733_v1 = vld [vmem:[%s2384_s1 + $0x40] sm:$0xff]  ;;  %v1731_v2 = vld [vmem:[%s2384_s1 + $0x30] sm:$0xff]  ;;  %s2392_s20 = smov (!%p206_p4, %s1329_s20), 255  ;;  %vm657_vm0 = vcmask 130048  }
   0xd   : > { %754 = vmatpush.bf16.msra.mxu0 %v1732_v0  ;;  %1734 = vmatpush.bf16.msra.mxu2 %v1732_v0  ;;  %s1660_s23 = sshll.u32 %s2392_s20, 3  ;;  %v1730_v3 = vld [vmem:[%s2384_s1 + $0x28] sm:$0xff]  ;;  %v1729_v7 = vld [vmem:[%s2384_s1 + $0x20] sm:$0xff]  ;;  %v1728_v11 = vld [vmem:[%s2384_s1 + $0x18] sm:$0xff] }
   0xe   : > { %930 = vmatpush.bf16.msra.mxu1 %v1733_v1  ;;  %1742 = vmatpush.bf16.msra.mxu3 %v1733_v1  ;;  %s1976_s26 = scalar_lea.vmem %s2383_s0, %s1660_s23  ;;  %v1727_v12 = vld [vmem:[%s2384_s1 + $0x10] sm:$0xff]  ;;  %v1726_v16 = vld [vmem:[%s2384_s1 + $0x8] sm:$0xff]  ;;  %v1725_v19 = vld [vmem:[%s2384_s1] sm:$0xff]  ;;  %s2113_s19 = scalar_lea.vmem %s2386_s3, %s1660_s23 }
   0xf   : > { %v1661_v4 = vld [vmem:[%s1976_s26 + $0x4] sm:$0xf]  ;;  %v1338_v5 = vld [vmem:[%s1976_s26 + $0x8] sm:$0xf0]  ;;  %v1695_v8 = vld [vmem:[%s1976_s26 + $0x114] sm:$0xf] }
  0x10   : > { %v1341_v6 = vor.u32 %v1661_v4, %v1338_v5  ;;  %v1474_v9 = vld [vmem:[%s1976_s26 + $0x118] sm:$0xf0]  ;;  %v1663_v13 = vld [vmem:[%s1976_s26 + $0x14] sm:$0xf]  ;;  %v1697_v17 = vld [vmem:[%s1976_s26 + $0x124] sm:$0xf] }
  0x11   : > { %755 = vmatpush.bf16.msra.mxu0 %v1731_v2  ;;  %1735 = vmatpush.bf16.msra.mxu2 %v1731_v2  ;;  %v1477_v10 = vor.u32 %v1695_v8, %v1474_v9  ;;  %v1346_v14 = vld [vmem:[%s1976_s26 + $0x18] sm:$0xf0]  ;;  %v1482_v18 = vld [vmem:[%s1976_s26 + $0x128] sm:$0xf0]  ;;  %v1336_v20 = vld [vmem:[%s1976_s26] sm:$0xf] }
  0x12   : > { %1626 = vmatmul.msk.bf16.vlgmr.msra.gmra.mxu1 %vm657_vm0, %v1341_v6  ;;  %v1349_v15 = vor.u32 %v1663_v13, %v1346_v14  ;;  %v1662_v21 = vld [vmem:[%s1976_s26 + $0x4] sm:$0xf0]  ;;  %v1485_v22 = vor.u32 %v1697_v17, %v1482_v18  ;;  %v1464_v23 = vld [vmem:[%s1976_s26 + $0x100] sm:$0xf]  ;;  %v1665_v27 = vld [vmem:[%s1976_s26 + $0x24] sm:$0xf] }
  0x13   : > { %1643 = vmatmul.msk.bf16.vlgmr.msra.gmra.mxu3 %vm657_vm0, %v1477_v10  ;;  %v1694_v24 = vld [vmem:[%s1976_s26 + $0x104] sm:$0xf0]  ;;  %v1337_v25 = vor.u32 %v1662_v21, %v1336_v20  ;;  %v1354_v28 = vld [vmem:[%s1976_s26 + $0x28] sm:$0xf0]  ;;  %v1699_v30 = vld [vmem:[%s1976_s26 + $0x134] sm:$0xf] }
  0x14   : > { %v1465_v26 = vor.u32 %v1694_v24, %v1464_v23  ;;  %v1357_v29 = vor.u32 %v1665_v27, %v1354_v28  ;;  %v1490_v31 = vld [vmem:[%s1976_s26 + $0x138] sm:$0xf0]  ;;  %v1344_v32 = vld [vmem:[%s1976_s26 + $0x10] sm:$0xf]  ;;  %v1664_v33 = vld [vmem:[%s1976_s26 + $0x14] sm:$0xf0] }
  0x15   : > { %756 = vmatpush.bf16.msra.mxu0 %v1730_v3  ;;  %1736 = vmatpush.bf16.msra.mxu2 %v1730_v3  ;;  %v1493_v34 = vor.u32 %v1699_v30, %v1490_v31  ;;  %v1472_v35 = vld [vmem:[%s1976_s26 + $0x110] sm:$0xf]  ;;  %v1696_v36 = vld [vmem:[%s1976_s26 + $0x114] sm:$0xf0]  ;;  %v1345_v37 = vor.u32 %v1664_v33, %v1344_v32  ;;  %v1667_v39 = vld [vmem:[%s1976_s26 + $0x34] sm:$0xf] }
  0x16   : > { %v1473_v38 = vor.u32 %v1696_v36, %v1472_v35  ;;  %v1362_v40 = vld [vmem:[%s1976_s26 + $0x38] sm:$0xf0]  ;;  %v1701_v42 = vld [vmem:[%s1976_s26 + $0x144] sm:$0xf]  ;;  %v1498_v43 = vld [vmem:[%s1976_s26 + $0x148] sm:$0xf0] }
  0x17   : > { %v1365_v41 = vor.u32 %v1667_v39, %v1362_v40  ;;  %v1352_v44 = vld [vmem:[%s1976_s26 + $0x20] sm:$0xf]  ;;  %v1666_v45 = vld [vmem:[%s1976_s26 + $0x24] sm:$0xf0]  ;;  %v1501_v46 = vor.u32 %v1701_v42, %v1498_v43  ;;  %v1669_v51 = vld [vmem:[%s1976_s26 + $0x44] sm:$0xf] }
  0x18   : > { %v1480_v47 = vld [vmem:[%s1976_s26 + $0x120] sm:$0xf]  ;;  %v1698_v48 = vld [vmem:[%s1976_s26 + $0x124] sm:$0xf0]  ;;  %v1353_v49 = vor.u32 %v1666_v45, %v1352_v44  ;;  %v1370_v52 = vld [vmem:[%s1976_s26 + $0x48] sm:$0xf0] }
  0x19   : > { %757 = vmatpush.bf16.msra.mxu0 %v1729_v7  ;;  %1737 = vmatpush.bf16.msra.mxu2 %v1729_v7  ;;  %v1481_v50 = vor.u32 %v1698_v48, %v1480_v47  ;;  %v1373_v53 = vor.u32 %v1669_v51, %v1370_v52  ;;  %v1703_v54 = vld [vmem:[%s1976_s26 + $0x154] sm:$0xf]  ;;  %v1506_v55 = vld [vmem:[%s1976_s26 + $0x158] sm:$0xf0]  ;;  %v1360_v56 = vld [vmem:[%s1976_s26 + $0x30] sm:$0xf] }
  0x1a   : > { %v1668_v57 = vld [vmem:[%s1976_s26 + $0x34] sm:$0xf0]  ;;  %v1509_v58 = vor.u32 %v1703_v54, %v1506_v55  ;;  %v1488_v59 = vld [vmem:[%s1976_s26 + $0x130] sm:$0xf]  ;;  %v1671_v63 = vld [vmem:[%s1976_s26 + $0x54] sm:$0xf] }
  0x1b   : > { %v1700_v60 = vld [vmem:[%s1976_s26 + $0x134] sm:$0xf0]  ;;  %v1361_v61 = vor.u32 %v1668_v57, %v1360_v56  ;;  %v1378_v0 = vld [vmem:[%s1976_s26 + $0x58] sm:$0xf0]  ;;  %v1705_v2 = vld [vmem:[%s1976_s26 + $0x164] sm:$0xf] }
  0x1c   : > { %v1489_v62 = vor.u32 %v1700_v60, %v1488_v59  ;;  %v1381_v1 = vor.u32 %v1671_v63, %v1378_v0  ;;  %v1514_v3 = vld [vmem:[%s1976_s26 + $0x168] sm:$0xf0]  ;;  %v1368_v4 = vld [vmem:[%s1976_s26 + $0x40] sm:$0xf]  ;;  %v1670_v5 = vld [vmem:[%s1976_s26 + $0x44] sm:$0xf0] }
  0x1d   : > { %758 = vmatpush.bf16.msra.mxu0 %v1728_v11  ;;  %1738 = vmatpush.bf16.msra.mxu2 %v1728_v11  ;;  %v1517_v6 = vor.u32 %v1705_v2, %v1514_v3  ;;  %v1496_v7 = vld [vmem:[%s1976_s26 + $0x140] sm:$0xf]  ;;  %v1702_v8 = vld [vmem:[%s1976_s26 + $0x144] sm:$0xf0]  ;;  %v1369_v9 = vor.u32 %v1670_v5, %v1368_v4  ;;  %v1673_v11 = vld [vmem:[%s1976_s26 + $0x64] sm:$0xf] }
  0x1e   : > { %v1497_v10 = vor.u32 %v1702_v8, %v1496_v7  ;;  %v1707_v14 = vld [vmem:[%s1976_s26 + $0x174] sm:$0xf]  ;;  %v1672_v17 = vld [vmem:[%s1976_s26 + $0x54] sm:$0xf0]  ;;  %v1394_v24 = vld [vmem:[%s1976_s26 + $0x78] sm:$0xf0] }
  0x1f   : > { %v1704_v20 = vld [vmem:[%s1976_s26 + $0x154] sm:$0xf0]  ;;  %v1675_v23 = vld [vmem:[%s1976_s26 + $0x74] sm:$0xf]  ;;  %v1530_v27 = vld [vmem:[%s1976_s26 + $0x188] sm:$0xf0] }
  0x20   : > { %v1384_v28 = vld [vmem:[%s1976_s26 + $0x60] sm:$0xf]  ;;  %v1706_v32 = vld [vmem:[%s1976_s26 + $0x164] sm:$0xf0]  ;;  %v1677_v35 = vld [vmem:[%s1976_s26 + $0x84] sm:$0xf] }
  0x21   : > { %759 = vmatpush.bf16.msra.mxu0 %v1727_v12  ;;  %1739 = vmatpush.bf16.msra.mxu2 %v1727_v12  ;;  %v1386_v12 = vld [vmem:[%s1976_s26 + $0x68] sm:$0xf0]  ;;  %v1512_v31 = vld [vmem:[%s1976_s26 + $0x160] sm:$0xf]  ;;  %v1711_v39 = vld [vmem:[%s1976_s26 + $0x194] sm:$0xf] }
  0x22   : > { %1627 = vmatmul.msk.bf16.gmra.mxu1 %vm657_vm0, %v1349_v15  ;;  %v1389_v13 = vor.u32 %v1673_v11, %v1386_v12  ;;  %v1522_v15 = vld [vmem:[%s1976_s26 + $0x178] sm:$0xf0]  ;;  %v1402_v36 = vld [vmem:[%s1976_s26 + $0x88] sm:$0xf0]  ;;  %v1676_v42 = vld [vmem:[%s1976_s26 + $0x74] sm:$0xf0] }
  0x23   : > { %1644 = vmatmul.msk.bf16.gmra.mxu3 %vm657_vm0, %v1485_v22  ;;  %v1525_v18 = vor.u32 %v1707_v14, %v1522_v15  ;;  %v1538_v40 = vld [vmem:[%s1976_s26 + $0x198] sm:$0xf0]  ;;  %v1520_v44 = vld [vmem:[%s1976_s26 + $0x170] sm:$0xf]  ;;  %v1708_v45 = vld [vmem:[%s1976_s26 + $0x174] sm:$0xf0] }
  0x24   : > { %v1541_v43 = vor.u32 %v1711_v39, %v1538_v40  ;;  %v1521_v47 = vor.u32 %v1708_v45, %v1520_v44  ;;  %v1410_v51 = vld [vmem:[%s1976_s26 + $0x98] sm:$0xf0]  ;;  %v1713_v55 = vld [vmem:[%s1976_s26 + $0x1a4] sm:$0xf]  ;;  %v1546_v56 = vld [vmem:[%s1976_s26 + $0x1a8] sm:$0xf0] }
  0x25   : > { %760 = vmatpush.bf16.msra.mxu0 %v1726_v16  ;;  %1740 = vmatpush.bf16.msra.mxu2 %v1726_v16  ;;  %v1376_v16 = vld [vmem:[%s1976_s26 + $0x50] sm:$0xf]  ;;  %v1400_v57 = vld [vmem:[%s1976_s26 + $0x80] sm:$0xf]  ;;  %v1549_v59 = vor.u32 %v1713_v55, %v1546_v56  ;;  %v1418_v7 = vld [vmem:[%s1976_s26 + $0xa8] sm:$0xf0] }
  0x26   : > { %v1377_v21 = vor.u32 %v1672_v17, %v1376_v16  ;;  %v2096_v60 = vld [vmem:[%s2385_s2] ss:$0 sm:$0xff]  ;;  %v1715_v16 = vld [vmem:[%s1976_s26 + $0x1b4] sm:$0xf]  ;;  %v1554_v17 = vld [vmem:[%s1976_s26 + $0x1b8] sm:$0xf0] }
  0x27   : > { %v1717_v44 = vld [vmem:[%s1976_s26 + $0x1c4] sm:$0xf]  ;;  %v1562_v45 = vld [vmem:[%s1976_s26 + $0x1c8] sm:$0xf0] }
  0x29   : > { %761 = vmatpush.bf16.msra.mxu0 %v1725_v19  ;;  %1741 = vmatpush.bf16.msra.mxu2 %v1725_v19  ;;  %v1504_v19 = vld [vmem:[%s1976_s26 + $0x150] sm:$0xf] }
  0x2a   : > { %v1505_v22 = vor.u32 %v1704_v20, %v1504_v19  ;;  %v1680_v19 = vld [vmem:[%s1976_s26 + $0x94] sm:$0xf0]  ;;  %v1557_v20 = vor.u32 %v1715_v16, %v1554_v17  ;;  %v1719_v16 = vld [vmem:[%s1976_s26 + $0x1d4] sm:$0xf]  ;;  %v1570_v17 = vld [vmem:[%s1976_s26 + $0x1d8] sm:$0xf0] }
  0x2c   : > { %762 = vmatmul.bf16.vlgmr.msra.gmra.mxu0 %v1337_v25  ;;  %842 = vmatmul.bf16.vlgmr.msra.gmra.mxu2 %v1465_v26  ;;  %v1397_v25 = vor.u32 %v1675_v23, %v1394_v24  ;;  %v1709_v26 = vld [vmem:[%s1976_s26 + $0x184] sm:$0xf] }
  0x2d   : > { %v1533_v30 = vor.u32 %v1709_v26, %v1530_v27 }
  0x32   : > { %1628 = vmatmul.msk.bf16.gmra.mxu1 %vm657_vm0, %v1357_v29  ;;  %v1674_v29 = vld [vmem:[%s1976_s26 + $0x64] sm:$0xf0] }
  0x33   : > { %1645 = vmatmul.msk.bf16.gmra.mxu3 %vm657_vm0, %v1493_v34  ;;  %v1385_v33 = vor.u32 %v1674_v29, %v1384_v28  ;;  %v1513_v34 = vor.u32 %v1706_v32, %v1512_v31  ;;  %v1683_v32 = vld [vmem:[%s1976_s26 + $0xb4] sm:$0xf] }
  0x3c   : > { %767 = vmatmul.bf16.gmra.mxu0 %v1345_v37  ;;  %847 = vmatmul.bf16.gmra.mxu2 %v1473_v38  ;;  %v1405_v37 = vor.u32 %v1677_v35, %v1402_v36 }
  0x42   : > { %1629 = vmatmul.msk.bf16.gmra.mxu1 %vm657_vm0, %v1365_v41  ;;  %v1392_v41 = vld [vmem:[%s1976_s26 + $0x70] sm:$0xf] }
  0x43   : > { %1646 = vmatmul.msk.bf16.gmra.mxu3 %vm657_vm0, %v1501_v46  ;;  %v1393_v46 = vor.u32 %v1676_v42, %v1392_v41 }
  0x4c   : > { %772 = vmatmul.bf16.gmra.mxu0 %v1353_v49  ;;  %852 = vmatmul.bf16.gmra.mxu2 %v1481_v50  ;;  %v1679_v50 = vld [vmem:[%s1976_s26 + $0x94] sm:$0xf] }
  0x4d   : > { %v1413_v52 = vor.u32 %v1679_v50, %v1410_v51  ;;  %v1544_v50 = vld [vmem:[%s1976_s26 + $0x1a0] sm:$0xf]  ;;  %v1714_v51 = vld [vmem:[%s1976_s26 + $0x1a4] sm:$0xf0] }
  0x4e   : > { %v1545_v56 = vor.u32 %v1714_v51, %v1544_v50  ;;  %v1721_v50 = vld [vmem:[%s1976_s26 + $0x1e4] sm:$0xf]  ;;  %v1578_v51 = vld [vmem:[%s1976_s26 + $0x1e8] sm:$0xf0] }
  0x52   : > { %1630 = vmatmul.msk.bf16.gmra.mxu1 %vm657_vm0, %v1373_v53 }
  0x53   : > { %1647 = vmatmul.msk.bf16.gmra.mxu3 %vm657_vm0, %v1509_v58  ;;  %v1678_v58 = vld [vmem:[%s1976_s26 + $0x84] sm:$0xf0] }
  0x54   : > { %v1401_v63 = vor.u32 %v1678_v58, %v1400_v57 }
  0x5c   : > { %777 = vmatmul.bf16.gmra.mxu0 %v1361_v61  ;;  %857 = vmatmul.bf16.gmra.mxu2 %v1489_v62  ;;  %v1528_v61 = vld [vmem:[%s1976_s26 + $0x180] sm:$0xf]  ;;  %v1710_v62 = vld [vmem:[%s1976_s26 + $0x184] sm:$0xf0] }
  0x62   : > { %1631 = vmatmul.msk.bf16.gmra.mxu1 %vm657_vm0, %v1381_v1  ;;  %v1529_v1 = vor.u32 %v1710_v62, %v1528_v61 }
  0x63   : > { %1648 = vmatmul.msk.bf16.gmra.mxu3 %vm657_vm0, %v1517_v6  ;;  %v1681_v6 = vld [vmem:[%s1976_s26 + $0xa4] sm:$0xf] }
  0x6c   : > { %782 = vmatmul.bf16.gmra.mxu0 %v1369_v9  ;;  %862 = vmatmul.bf16.gmra.mxu2 %v1497_v10  ;;  %v1421_v10 = vor.u32 %v1681_v6, %v1418_v7 }
  0x72   : > { %1632 = vmatmul.msk.bf16.gmra.mxu1 %vm657_vm0, %v1389_v13 }
  0x73   : > { %1649 = vmatmul.msk.bf16.gmra.mxu3 %vm657_vm0, %v1525_v18  ;;  %v1408_v18 = vld [vmem:[%s1976_s26 + $0x90] sm:$0xf] }
  0x74   : > { %v1409_v24 = vor.u32 %v1680_v19, %v1408_v18  ;;  %v1424_v18 = vld [vmem:[%s1976_s26 + $0xb0] sm:$0xf]  ;;  %v1684_v19 = vld [vmem:[%s1976_s26 + $0xb4] sm:$0xf0] }
  0x7c   : > { %787 = vmatmul.bf16.gmra.mxu0 %v1377_v21  ;;  %867 = vmatmul.bf16.gmra.mxu2 %v1505_v22  ;;  %v1536_v21 = vld [vmem:[%s1976_s26 + $0x190] sm:$0xf]  ;;  %v1712_v22 = vld [vmem:[%s1976_s26 + $0x194] sm:$0xf0] }
  0x7d   : > { %v1537_v26 = vor.u32 %v1712_v22, %v1536_v21  ;;  %v1552_v21 = vld [vmem:[%s1976_s26 + $0x1b0] sm:$0xf]  ;;  %v1716_v22 = vld [vmem:[%s1976_s26 + $0x1b4] sm:$0xf0] }
  0x82   : > { %1633 = vmatmul.msk.bf16.gmra.mxu1 %vm657_vm0, %v1397_v25 }
  0x83   : > { %1650 = vmatmul.msk.bf16.gmra.mxu3 %vm657_vm0, %v1533_v30 }
  0x8c   : > { %792 = vmatmul.bf16.gmra.mxu0 %v1385_v33  ;;  %872 = vmatmul.bf16.gmra.mxu2 %v1513_v34  ;;  %v1426_v33 = vld [vmem:[%s1976_s26 + $0xb8] sm:$0xf0] }
  0x8f   : > { %v932_v38 = vpop.f32.mrf.mxu1 }
  0x92   : > { %1634 = vmatmul.msk.bf16.gmra.mxu1 %vm657_vm0, %v1405_v37  ;;  %v1429_v37 = vor.u32 %v1683_v32, %v1426_v33 }
  0x93   : > { %1651 = vmatmul.msk.bf16.gmra.mxu3 %vm657_vm0, %v1541_v43 }
  0x96   : > { %v2082_v49 = vpop.f32.mrf.mxu3 }
  0x97   : > { %v934_v48 = vpop.f32.mrf.mxu1 }
  0x9c   : > { %797 = vmatmul.bf16.gmra.mxu0 %v1393_v46  ;;  %877 = vmatmul.bf16.gmra.mxu2 %v1521_v47  ;;  %v1416_v46 = vld [vmem:[%s1976_s26 + $0xa0] sm:$0xf]  ;;  %v1682_v47 = vld [vmem:[%s1976_s26 + $0xa4] sm:$0xf0] }
  0x9e   : > { %v2086_v54 = vpop.f32.mrf.mxu3 }
  0x9f   : > { %v937_v53 = vpop.f32.mrf.mxu1 }
  0xa2   : > { %1635 = vmatmul.msk.bf16.gmra.mxu1 %vm657_vm0, %v1413_v52 }
  0xa3   : > { %1652 = vmatmul.msk.bf16.gmra.mxu3 %vm657_vm0, %v1549_v59 }
  0xa6   : > { %v2102_v4 = vpop.f32.mrf.mxu3 }
  0xa7   : > { %v939_v3 = vpop.f32.mrf.mxu1 }
  0xa9   : > { %v763_v0 = vpop.f32.mrf.mxu0 }
  0xaa   : > { %v764_v2 = vadd.f32 %v2096_v60, %v763_v0 }
  0xac   : > { %v933_v5 = vadd.f32 %v932_v38, %v764_v2  ;;  %802 = vmatmul.bf16.gmra.mxu0 %v1401_v63  ;;  %882 = vmatmul.bf16.gmra.mxu2 %v1529_v1  ;;  %v1685_v1 = vld [vmem:[%s1976_s26 + $0xc4] sm:$0xf]  ;;  %v1434_v2 = vld [vmem:[%s1976_s26 + $0xc8] sm:$0xf0] }
  0xad   : > { %v1437_v6 = vor.u32 %v1685_v1, %v1434_v2 }
  0xae   : > { %1768 = vtanh.f32 %v933_v5  ;;  %v2118_v13 = vpop.f32.mrf.mxu3 }
  0xaf   : > { %v2106_v8 = vpop.f32.mrf.mxu2  ;;  %v2116_v12 = vpop.f32.mrf.mxu1 }
  0xb1   : > { %v765_v9 = vpop.f32.mrf.mxu0 }
  0xb2   : > { %v766_v11 = vadd.f32 %v2096_v60, %v765_v9  ;;  %1636 = vmatmul.msk.bf16.gmra.mxu1 %vm657_vm0, %v1421_v10 }
  0xb3   : > { %1653 = vmatmul.msk.bf16.gmra.mxu3 %vm657_vm0, %v1557_v20  ;;  %v1573_v20 = vor.u32 %v1719_v16, %v1570_v17 }
  0xb4   : > { %v1769_v14 = vpop.eup %1768  ;;  %v935_v15 = vadd.f32 %v934_v48, %v766_v11  ;;  %v1565_v48 = vor.u32 %v1717_v44, %v1562_v45 }
  0xb5   : > { %1156 = vst [vmem:[%s2113_s19] sm:$0xff] %v1769_v14 }
  0xb6   : > { %1770 = vtanh.f32 %v935_v15  ;;  %v2134_v29 = vpop.f32.mrf.mxu3 }
  0xb7   : > { %v2128_v23 = vpop.f32.mrf.mxu2  ;;  %v2132_v28 = vpop.f32.mrf.mxu1 }
  0xb9   : > { %v768_v25 = vpop.f32.mrf.mxu0 }
  0xba   : > { %v769_v27 = vadd.f32 %v2096_v60, %v768_v25 }
  0xbc   : > { %v1771_v30 = vpop.eup %1770  ;;  %v938_v31 = vadd.f32 %v937_v53, %v769_v27  ;;  %807 = vmatmul.bf16.gmra.mxu0 %v1409_v24  ;;  %887 = vmatmul.bf16.gmra.mxu2 %v1537_v26  ;;  %v1425_v24 = vor.u32 %v1684_v19, %v1424_v18  ;;  %v1553_v27 = vor.u32 %v1716_v22, %v1552_v21  ;;  %v1586_v21 = vld [vmem:[%s1976_s26 + $0x1f8] sm:$0xf0]  ;;  %v1440_v22 = vld [vmem:[%s1976_s26 + $0xd0] sm:$0xf] }
  0xbd   : > { %1157 = vst [vmem:[%s2113_s19 + $0x8] sm:$0xff] %v1771_v30 }
  0xbe   : > { %1772 = vtanh.f32 %v938_v31  ;;  %v2144_v41 = vpop.f32.mrf.mxu3 }
  0xbf   : > { %v848_v34 = vpop.f32.mrf.mxu2  ;;  %v2141_v39 = vpop.f32.mrf.mxu1 }
  0xc0   : > { %v849_v35 = vadd.f32 %v2096_v60, %v848_v34 }
  0xc1   : > { %v770_v36 = vpop.f32.mrf.mxu0 }
  0xc2   : > { %v771_v38 = vadd.f32 %v2096_v60, %v770_v36  ;;  %v1018_v40 = vadd.f32 %v2082_v49, %v849_v35  ;;  %1637 = vmatmul.msk.bf16.gmra.mxu1 %vm657_vm0, %v1429_v37  ;;  %v1417_v49 = vor.u32 %v1682_v47, %v1416_v46  ;;  %v1687_v36 = vld [vmem:[%s1976_s26 + $0xd4] sm:$0xf]  ;;  %v1442_v37 = vld [vmem:[%s1976_s26 + $0xd8] sm:$0xf0] }
  0xc3   : > { %1654 = vmatmul.msk.bf16.gmra.mxu3 %vm657_vm0, %v1565_v48 }
  0xc4   : > { %v1773_v42 = vpop.eup %1772  ;;  %v940_v43 = vadd.f32 %v939_v3, %v771_v38  ;;  %1774 = vtanh.f32 %v1018_v40 }
  0xc5   : > { %1158 = vst [vmem:[%s2113_s19 + $0x10] sm:$0xff] %v1773_v42  ;;  %v1445_v42 = vor.u32 %v1687_v36, %v1442_v37 }
  0xc6   : > { %1776 = vtanh.f32 %v940_v43  ;;  %v2160_v62 = vpop.f32.mrf.mxu3 }
  0xc7   : > { %v850_v52 = vpop.f32.mrf.mxu2  ;;  %v2157_v58 = vpop.f32.mrf.mxu1 }
  0xc8   : > { %v851_v53 = vadd.f32 %v2096_v60, %v850_v52  ;;  %v1432_v52 = vld [vmem:[%s1976_s26 + $0xc0] sm:$0xf] }
  0xc9   : > { %v773_v55 = vpop.f32.mrf.mxu0 }
  0xca   : > { %v774_v57 = vadd.f32 %v2096_v60, %v773_v55  ;;  %v1775_v59 = vpop.eup %1774  ;;  %v1020_v61 = vadd.f32 %v2086_v54, %v851_v53  ;;  %v1581_v53 = vor.u32 %v1721_v50, %v1578_v51  ;;  %v1560_v55 = vld [vmem:[%s1976_s26 + $0x1c0] sm:$0xf] }
  0xcb   : > { %1190 = vst [vmem:[%s2113_s19 + $0x110] sm:$0xff] %v1775_v59 }
  0xcc   : > { %v1777_v63 = vpop.eup %1776  ;;  %v943_v0 = vadd.f32 %v2116_v12, %v774_v57  ;;  %812 = vmatmul.bf16.gmra.mxu0 %v1417_v49  ;;  %1778 = vtanh.f32 %v1020_v61  ;;  %892 = vmatmul.bf16.gmra.mxu2 %v1545_v56  ;;  %v1686_v49 = vld [vmem:[%s1976_s26 + $0xc4] sm:$0xf0] }
  0xcd   : > { %1159 = vst [vmem:[%s2113_s19 + $0x18] sm:$0xff] %v1777_v63  ;;  %v1718_v56 = vld [vmem:[%s1976_s26 + $0x1c4] sm:$0xf0]  ;;  %v1433_v57 = vor.u32 %v1686_v49, %v1432_v52 }
  0xce   : > { %1780 = vtanh.f32 %v943_v0  ;;  %v2172_v12 = vpop.f32.mrf.mxu3  ;;  %v1561_v61 = vor.u32 %v1718_v56, %v1560_v55  ;;  %v1690_v55 = vld [vmem:[%s1976_s26 + $0xe4] sm:$0xf0]  ;;  %v1576_v56 = vld [vmem:[%s1976_s26 + $0x1e0] sm:$0xf] }
  0xcf   : > { %v853_v3 = vpop.f32.mrf.mxu2  ;;  %v2169_v9 = vpop.f32.mrf.mxu1 }
  0xd0   : > { %v854_v54 = vadd.f32 %v2096_v60, %v853_v3 }
  0xd1   : > { %v775_v5 = vpop.f32.mrf.mxu0 }
  0xd2   : > { %v776_v7 = vadd.f32 %v2096_v60, %v775_v5  ;;  %v1779_v10 = vpop.eup %1778  ;;  %v1023_v11 = vadd.f32 %v2102_v4, %v854_v54  ;;  %1638 = vmatmul.msk.bf16.gmra.mxu1 %vm657_vm0, %v1437_v6  ;;  %v1689_v6 = vld [vmem:[%s1976_s26 + $0xe4] sm:$0xf] }
  0xd3   : > { %1191 = vst [vmem:[%s2113_s19 + $0x118] sm:$0xff] %v1779_v10  ;;  %1655 = vmatmul.msk.bf16.gmra.mxu3 %vm657_vm0, %v1573_v20  ;;  %v1723_v20 = vld [vmem:[%s1976_s26 + $0x1f4] sm:$0xf] }
  0xd4   : > { %v1781_v14 = vpop.eup %1780  ;;  %v945_v15 = vadd.f32 %v2132_v28, %v776_v7  ;;  %1782 = vtanh.f32 %v1023_v11  ;;  %v1450_v7 = vld [vmem:[%s1976_s26 + $0xe8] sm:$0xf0] }
  0xd5   : > { %1160 = vst [vmem:[%s2113_s19 + $0x20] sm:$0xff] %v1781_v14 }
  0xd6   : > { %1784 = vtanh.f32 %v945_v15  ;;  %v2190_v33 = vpop.f32.mrf.mxu3 }
  0xd7   : > { %v855_v4 = vpop.f32.mrf.mxu2  ;;  %v2187_v30 = vpop.f32.mrf.mxu1 }
  0xd8   : > { %v856_v25 = vadd.f32 %v2096_v60, %v855_v4  ;;  %v1688_v4 = vld [vmem:[%s1976_s26 + $0xd4] sm:$0xf0] }
  0xd9   : > { %v778_v26 = vpop.f32.mrf.mxu0 }
  0xda   : > { %v779_v28 = vadd.f32 %v2096_v60, %v778_v26  ;;  %v1783_v31 = vpop.eup %1782  ;;  %v1025_v32 = vadd.f32 %v2118_v13, %v856_v25  ;;  %v1568_v25 = vld [vmem:[%s1976_s26 + $0x1d0] sm:$0xf]  ;;  %v1720_v26 = vld [vmem:[%s1976_s26 + $0x1d4] sm:$0xf0] }
  0xdb   : > { %1192 = vst [vmem:[%s2113_s19 + $0x120] sm:$0xff] %v1783_v31 }
  0xdc   : > { %v1785_v34 = vpop.eup %1784  ;;  %v948_v35 = vadd.f32 %v2141_v39, %v779_v28  ;;  %817 = vmatmul.bf16.gmra.mxu0 %v1425_v24  ;;  %1786 = vtanh.f32 %v1025_v32  ;;  %897 = vmatmul.bf16.gmra.mxu2 %v1553_v27  ;;  %v1589_v24 = vor.u32 %v1723_v20, %v1586_v21  ;;  %v1441_v28 = vor.u32 %v1688_v4, %v1440_v22  ;;  %v1456_v21 = vld [vmem:[%s1976_s26 + $0xf0] sm:$0xf]  ;;  %v1692_v22 = vld [vmem:[%s1976_s26 + $0xf4] sm:$0xf0] }
  0xdd   : > { %1161 = vst [vmem:[%s2113_s19 + $0x28] sm:$0xff] %v1785_v34  ;;  %v1569_v32 = vor.u32 %v1720_v26, %v1568_v25  ;;  %v1584_v4 = vld [vmem:[%s1976_s26 + $0x1f0] sm:$0xf]  ;;  %v1457_v26 = vor.u32 %v1692_v22, %v1456_v21 }
  0xde   : > { %1788 = vtanh.f32 %v948_v35  ;;  %v2202_v46 = vpop.f32.mrf.mxu3 }
  0xdf   : > { %v858_v38 = vpop.f32.mrf.mxu2  ;;  %v2199_v43 = vpop.f32.mrf.mxu1 }
  0xe0   : > { %v859_v13 = vadd.f32 %v2096_v60, %v858_v38 }
  0xe1   : > { %v780_v40 = vpop.f32.mrf.mxu0 }
  0xe2   : > { %v781_v39 = vadd.f32 %v2096_v60, %v780_v40  ;;  %v1787_v44 = vpop.eup %1786  ;;  %v1028_v45 = vadd.f32 %v2134_v29, %v859_v13  ;;  %1639 = vmatmul.msk.bf16.gmra.mxu1 %vm657_vm0, %v1445_v42  ;;  %v1691_v40 = vld [vmem:[%s1976_s26 + $0xf4] sm:$0xf]  ;;  %v1458_v42 = vld [vmem:[%s1976_s26 + $0xf8] sm:$0xf0] }
  0xe3   : > { %1193 = vst [vmem:[%s2113_s19 + $0x128] sm:$0xff] %v1787_v44  ;;  %1656 = vmatmul.msk.bf16.gmra.mxu3 %vm657_vm0, %v1581_v53  ;;  %v1448_v53 = vld [vmem:[%s1976_s26 + $0xe0] sm:$0xf] }
  0xe4   : > { %v1789_v47 = vpop.eup %1788  ;;  %v950_v48 = vadd.f32 %v2157_v58, %v781_v39  ;;  %1790 = vtanh.f32 %v1028_v45 }
  0xe5   : > { %1162 = vst [vmem:[%s2113_s19 + $0x30] sm:$0xff] %v1789_v47 }
  0xe6   : > { %1792 = vtanh.f32 %v950_v48  ;;  %v2222_v5 = vpop.f32.mrf.mxu3 }
  0xe7   : > { %v860_v29 = vpop.f32.mrf.mxu2  ;;  %v2217_v0 = vpop.f32.mrf.mxu1 }
  0xe8   : > { %v861_v58 = vadd.f32 %v2096_v60, %v860_v29  ;;  %v1722_v29 = vld [vmem:[%s1976_s26 + $0x1e4] sm:$0xf0] }
  0xe9   : > { %v783_v59 = vpop.f32.mrf.mxu0 }
  0xea   : > { %v784_v63 = vadd.f32 %v2096_v60, %v783_v59  ;;  %v1791_v1 = vpop.eup %1790  ;;  %v1030_v2 = vadd.f32 %v2144_v41, %v861_v58  ;;  %v1449_v58 = vor.u32 %v1690_v55, %v1448_v53 }
  0xeb   : > { %1194 = vst [vmem:[%s2113_s19 + $0x130] sm:$0xff] %v1791_v1 }
  0xec   : > { %v1793_v3 = vpop.eup %1792  ;;  %v953_v54 = vadd.f32 %v2169_v9, %v784_v63  ;;  %822 = vmatmul.bf16.gmra.mxu0 %v1433_v57  ;;  %1794 = vtanh.f32 %v1030_v2  ;;  %902 = vmatmul.bf16.gmra.mxu2 %v1561_v61  ;;  %v1453_v9 = vor.u32 %v1689_v6, %v1450_v7  ;;  %v1577_v61 = vor.u32 %v1722_v29, %v1576_v56  ;;  %v1693_v7 = vld [vmem:[%s1976_s26 + $0x104] sm:$0xf] }
  0xed   : > { %1163 = vst [vmem:[%s2113_s19 + $0x38] sm:$0xff] %v1793_v3 }
  0xee   : > { %1796 = vtanh.f32 %v953_v54  ;;  %v2242_v27 = vpop.f32.mrf.mxu3 }
  0xef   : > { %v863_v10 = vpop.f32.mrf.mxu2  ;;  %v2229_v15 = vpop.f32.mrf.mxu1 }
  0xf0   : > { %v864_v41 = vadd.f32 %v2096_v60, %v863_v10  ;;  %v1466_v10 = vld [vmem:[%s1976_s26 + $0x108] sm:$0xf0] }
  0xf1   : > { %v785_v11 = vpop.f32.mrf.mxu0 }
  0xf2   : > { %v786_v14 = vadd.f32 %v2096_v60, %v785_v11  ;;  %v1795_v16 = vpop.eup %1794  ;;  %v1033_v17 = vadd.f32 %v2160_v62, %v864_v41  ;;  %1640 = vmatmul.msk.bf16.gmra.mxu1 %vm657_vm0, %v1453_v9 }
  0xf3   : > { %1195 = vst [vmem:[%s2113_s19 + $0x138] sm:$0xff] %v1795_v16  ;;  %1657 = vmatmul.msk.bf16.gmra.mxu3 %vm657_vm0, %v1589_v24  ;;  %v1724_v24 = vld [vmem:[%s1976_s26 + $0x1f4] sm:$0xf0] }
  0xf4   : > { %v1797_v18 = vpop.eup %1796  ;;  %v955_v19 = vadd.f32 %v2187_v30, %v786_v14  ;;  %1798 = vtanh.f32 %v1033_v17 }
  0xf5   : > { %1164 = vst [vmem:[%s2113_s19 + $0x40] sm:$0xff] %v1797_v18 }
  0xf6   : > { %1800 = vtanh.f32 %v955_v19  ;;  %v2255_v44 = vpop.f32.mrf.mxu3 }
  0xf7   : > { %v865_v62 = vpop.f32.mrf.mxu2  ;;  %v2247_v35 = vpop.f32.mrf.mxu1 }
  0xf8   : > { %v866_v30 = vadd.f32 %v2096_v60, %v865_v62 }
  0xf9   : > { %v788_v31 = vpop.f32.mrf.mxu0 }
  0xfa   : > { %v789_v34 = vadd.f32 %v2096_v60, %v788_v31  ;;  %v1799_v36 = vpop.eup %1798  ;;  %v1035_v37 = vadd.f32 %v2172_v12, %v866_v30 }
  0xfb   : > { %1196 = vst [vmem:[%s2113_s19 + $0x140] sm:$0xff] %v1799_v36 }
  0xfc   : > { %v1801_v38 = vpop.eup %1800  ;;  %v958_v13 = vadd.f32 %v2199_v43, %v789_v34  ;;  %827 = vmatmul.bf16.gmra.mxu0 %v1441_v28  ;;  %1802 = vtanh.f32 %v1035_v37  ;;  %907 = vmatmul.bf16.gmra.mxu2 %v1569_v32  ;;  %v1461_v43 = vor.u32 %v1691_v40, %v1458_v42  ;;  %v1585_v28 = vor.u32 %v1724_v24, %v1584_v4 }
  0xfd   : > { %1165 = vst [vmem:[%s2113_s19 + $0x48] sm:$0xff] %v1801_v38 }
  0xfe   : > { %1804 = vtanh.f32 %v958_v13  ;;  %v2272_v1 = vpop.f32.mrf.mxu3 }
  0xff   : > { %v868_v39 = vpop.f32.mrf.mxu2  ;;  %v2259_v48 = vpop.f32.mrf.mxu1 }
 0x100   : > { %v869_v12 = vadd.f32 %v2096_v60, %v868_v39 }
 0x101   : > { %v790_v45 = vpop.f32.mrf.mxu0 }
 0x102   : > { %v791_v47 = vadd.f32 %v2096_v60, %v790_v45  ;;  %v1803_v50 = vpop.eup %1802  ;;  %v1038_v51 = vadd.f32 %v2190_v33, %v869_v12  ;;  %1641 = vmatmul.msk.bf16.gmra.mxu1 %vm657_vm0, %v1461_v43 }
 0x103   : > { %1197 = vst [vmem:[%s2113_s19 + $0x148] sm:$0xff] %v1803_v50 }
 0x104   : > { %v1805_v52 = vpop.eup %1804  ;;  %v960_v49 = vadd.f32 %v2217_v0, %v791_v47  ;;  %1806 = vtanh.f32 %v1038_v51 }
 0x105   : > { %1166 = vst [vmem:[%s2113_s19 + $0x50] sm:$0xff] %v1805_v52 }
 0x106   : > { %1808 = vtanh.f32 %v960_v49  ;;  %v1052_v20 = vpop.f32.mrf.mxu3 }
 0x107   : > { %v870_v57 = vpop.f32.mrf.mxu2  ;;  %v969_v0 = vpop.f32.mrf.mxu1 }
 0x108   : > { %v871_v59 = vadd.f32 %v2096_v60, %v870_v57 }
 0x109   : > { %v793_v33 = vpop.f32.mrf.mxu0 }
 0x10a   : > { %v794_v63 = vadd.f32 %v2096_v60, %v793_v33  ;;  %v1807_v2 = vpop.eup %1806  ;;  %v1040_v3 = vadd.f32 %v2202_v46, %v871_v59  ;;  %v1469_v46 = vor.u32 %v1693_v7, %v1466_v10 }
 0x10b   : > { %1198 = vst [vmem:[%s2113_s19 + $0x150] sm:$0xff] %v1807_v2 }
 0x10c   : > { %v1809_v54 = vpop.eup %1808  ;;  %v963_v6 = vadd.f32 %v2229_v15, %v794_v63  ;;  %832 = vmatmul.bf16.gmra.mxu0 %v1449_v58  ;;  %1810 = vtanh.f32 %v1040_v3  ;;  %912 = vmatmul.bf16.gmra.mxu2 %v1577_v61 }
 0x10d   : > { %1167 = vst [vmem:[%s2113_s19 + $0x58] sm:$0xff] %v1809_v54 }
 0x10e   : > { %1812 = vtanh.f32 %v963_v6  ;;  %v1054_v37 = vpop.f32.mrf.mxu3 }
 0x10f   : > { %v873_v41 = vpop.f32.mrf.mxu2  ;;  %v972_v15 = vpop.f32.mrf.mxu1 }
 0x110   : > { %v874_v11 = vadd.f32 %v2096_v60, %v873_v41 }
 0x111   : > { %v795_v9 = vpop.f32.mrf.mxu0 }
 0x112   : > { %v796_v14 = vadd.f32 %v2096_v60, %v795_v9  ;;  %v1811_v16 = vpop.eup %1810  ;;  %v1043_v17 = vadd.f32 %v2222_v5, %v874_v11  ;;  %1642 = vmatmul.msk.bf16.gmra.mxu1 %vm657_vm0, %v1469_v46 }
 0x113   : > { %1199 = vst [vmem:[%s2113_s19 + $0x158] sm:$0xff] %v1811_v16 }
 0x114   : > { %v1813_v18 = vpop.eup %1812  ;;  %v965_v19 = vadd.f32 %v2247_v35, %v796_v14  ;;  %1814 = vtanh.f32 %v1043_v17 }
 0x115   : > { %1168 = vst [vmem:[%s2113_s19 + $0x60] sm:$0xff] %v1813_v18 }
 0x116   : > { %1816 = vtanh.f32 %v965_v19 }
 0x117   : > { %v875_v25 = vpop.f32.mrf.mxu2  ;;  %v974_v31 = vpop.f32.mrf.mxu1 }
 0x118   : > { %v876_v5 = vadd.f32 %v2096_v60, %v875_v25 }
 0x119   : > { %v798_v62 = vpop.f32.mrf.mxu0 }
 0x11a   : > { %v799_v30 = vadd.f32 %v2096_v60, %v798_v62  ;;  %v1815_v32 = vpop.eup %1814  ;;  %v1045_v34 = vadd.f32 %v2242_v27, %v876_v5 }
 0x11b   : > { %1200 = vst [vmem:[%s2113_s19 + $0x160] sm:$0xff] %v1815_v32 }
 0x11c   : > { %v1817_v35 = vpop.eup %1816  ;;  %v968_v36 = vadd.f32 %v2259_v48, %v799_v30  ;;  %837 = vmatmul.bf16.gmra.mxu0 %v1457_v26  ;;  %1818 = vtanh.f32 %v1045_v34  ;;  %917 = vmatmul.bf16.gmra.mxu2 %v1585_v28  ;;  %v1057_v48 = vpop.f32.mrf.mxu3 }
 0x11d   : > { %1169 = vst [vmem:[%s2113_s19 + $0x68] sm:$0xff] %v1817_v35 }
 0x11e   : > { %1820 = vtanh.f32 %v968_v36 }
 0x11f   : > { %v878_v38 = vpop.f32.mrf.mxu2  ;;  %v977_v39 = vpop.f32.mrf.mxu1 }
 0x120   : > { %v879_v13 = vadd.f32 %v2096_v60, %v878_v38 }
 0x121   : > { %v800_v40 = vpop.f32.mrf.mxu0 }
 0x122   : > { %v801_v42 = vadd.f32 %v2096_v60, %v800_v40  ;;  %v1819_v27 = vpop.eup %1818  ;;  %v1048_v12 = vadd.f32 %v2255_v44, %v879_v13 }
 0x123   : > { %1201 = vst [vmem:[%s2113_s19 + $0x168] sm:$0xff] %v1819_v27 }
 0x124   : > { %v1821_v45 = vpop.eup %1820  ;;  %v970_v43 = vadd.f32 %v969_v0, %v801_v42  ;;  %1822 = vtanh.f32 %v1048_v12  ;;  %v1059_v61 = vpop.f32.mrf.mxu3 }
 0x125   : > { %1170 = vst [vmem:[%s2113_s19 + $0x70] sm:$0xff] %v1821_v45 }
 0x126   : > { %1824 = vtanh.f32 %v970_v43 }
 0x127   : > { %v880_v47 = vpop.f32.mrf.mxu2  ;;  %v979_v49 = vpop.f32.mrf.mxu1 }
 0x128   : > { %v881_v50 = vadd.f32 %v2096_v60, %v880_v47 }
 0x129   : > { %v803_v51 = vpop.f32.mrf.mxu0 }
 0x12a   : > { %v804_v52 = vadd.f32 %v2096_v60, %v803_v51  ;;  %v1823_v53 = vpop.eup %1822  ;;  %v1050_v55 = vadd.f32 %v2272_v1, %v881_v50 }
 0x12b   : > { %1202 = vst [vmem:[%s2113_s19 + $0x170] sm:$0xff] %v1823_v53 }
 0x12c   : > { %v1825_v44 = vpop.eup %1824  ;;  %v973_v56 = vadd.f32 %v972_v15, %v804_v52  ;;  %1826 = vtanh.f32 %v1050_v55  ;;  %v1062_v14 = vpop.f32.mrf.mxu3 }
 0x12d   : > { %1171 = vst [vmem:[%s2113_s19 + $0x78] sm:$0xff] %v1825_v44 }
 0x12e   : > { %1828 = vtanh.f32 %v973_v56 }
 0x12f   : > { %v883_v29 = vpop.f32.mrf.mxu2  ;;  %v982_v33 = vpop.f32.mrf.mxu1 }
 0x130   : > { %v884_v57 = vadd.f32 %v2096_v60, %v883_v29 }
 0x131   : > { %v805_v58 = vpop.f32.mrf.mxu0 }
 0x132   : > { %v806_v59 = vadd.f32 %v2096_v60, %v805_v58  ;;  %v1827_v63 = vpop.eup %1826  ;;  %v1053_v0 = vadd.f32 %v1052_v20, %v884_v57 }
 0x133   : > { %1203 = vst [vmem:[%s2113_s19 + $0x178] sm:$0xff] %v1827_v63 }
 0x134   : > { %v1829_v1 = vpop.eup %1828  ;;  %v975_v2 = vadd.f32 %v974_v31, %v806_v59  ;;  %1830 = vtanh.f32 %v1053_v0  ;;  %v1064_v24 = vpop.f32.mrf.mxu3 }
 0x135   : > { %1172 = vst [vmem:[%s2113_s19 + $0x80] sm:$0xff] %v1829_v1 }
 0x136   : > { %1832 = vtanh.f32 %v975_v2 }
 0x137   : > { %v885_v3 = vpop.f32.mrf.mxu2  ;;  %v984_v10 = vpop.f32.mrf.mxu1 }
 0x138   : > { %v886_v54 = vadd.f32 %v2096_v60, %v885_v3 }
 0x139   : > { %v808_v6 = vpop.f32.mrf.mxu0 }
 0x13a   : > { %v809_v7 = vadd.f32 %v2096_v60, %v808_v6  ;;  %v1831_v41 = vpop.eup %1830  ;;  %v1055_v11 = vadd.f32 %v1054_v37, %v886_v54 }
 0x13b   : > { %1204 = vst [vmem:[%s2113_s19 + $0x180] sm:$0xff] %v1831_v41 }
 0x13c   : > { %v1833_v9 = vpop.eup %1832  ;;  %v978_v46 = vadd.f32 %v977_v39, %v809_v7  ;;  %1834 = vtanh.f32 %v1055_v11  ;;  %v1067_v36 = vpop.f32.mrf.mxu3 }
 0x13d   : > { %1173 = vst [vmem:[%s2113_s19 + $0x88] sm:$0xff] %v1833_v9 }
 0x13e   : > { %1836 = vtanh.f32 %v978_v46 }
 0x13f   : > { %v888_v15 = vpop.f32.mrf.mxu2  ;;  %v987_v19 = vpop.f32.mrf.mxu1 }
 0x140   : > { %v889_v16 = vadd.f32 %v2096_v60, %v888_v15 }
 0x141   : > { %v810_v17 = vpop.f32.mrf.mxu0 }
 0x142   : > { %v811_v18 = vadd.f32 %v2096_v60, %v810_v17  ;;  %v1835_v20 = vpop.eup %1834  ;;  %v1058_v21 = vadd.f32 %v1057_v48, %v889_v16 }
 0x143   : > { %1205 = vst [vmem:[%s2113_s19 + $0x188] sm:$0xff] %v1835_v20 }
 0x144   : > { %v1837_v22 = vpop.eup %1836  ;;  %v980_v4 = vadd.f32 %v979_v49, %v811_v18  ;;  %1838 = vtanh.f32 %v1058_v21  ;;  %v1069_v51 = vpop.f32.mrf.mxu3 }
 0x145   : > { %1174 = vst [vmem:[%s2113_s19 + $0x90] sm:$0xff] %v1837_v22 }
 0x146   : > { %1840 = vtanh.f32 %v980_v4 }
 0x147   : > { %v890_v25 = vpop.f32.mrf.mxu2  ;;  %v989_v28 = vpop.f32.mrf.mxu1 }
 0x148   : > { %v891_v26 = vadd.f32 %v2096_v60, %v890_v25 }
 0x149   : > { %v813_v5 = vpop.f32.mrf.mxu0 }
 0x14a   : > { %v814_v62 = vadd.f32 %v2096_v60, %v813_v5  ;;  %v1839_v30 = vpop.eup %1838  ;;  %v1060_v31 = vadd.f32 %v1059_v61, %v891_v26 }
 0x14b   : > { %1206 = vst [vmem:[%s2113_s19 + $0x190] sm:$0xff] %v1839_v30 }
 0x14c   : > { %v1841_v32 = vpop.eup %1840  ;;  %v983_v34 = vadd.f32 %v982_v33, %v814_v62  ;;  %1842 = vtanh.f32 %v1060_v31  ;;  %v1072_v0 = vpop.f32.mrf.mxu3 }
 0x14d   : > { %1175 = vst [vmem:[%s2113_s19 + $0x98] sm:$0xff] %v1841_v32 }
 0x14e   : > { %1844 = vtanh.f32 %v983_v34 }
 0x14f   : > { %v893_v35 = vpop.f32.mrf.mxu2  ;;  %v992_v40 = vpop.f32.mrf.mxu1 }
 0x150   : > { %v894_v37 = vadd.f32 %v2096_v60, %v893_v35 }
 0x151   : > { %v815_v38 = vpop.f32.mrf.mxu0 }
 0x152   : > { %v816_v13 = vadd.f32 %v2096_v60, %v815_v38  ;;  %v1843_v42 = vpop.eup %1842  ;;  %v1063_v39 = vadd.f32 %v1062_v14, %v894_v37 }
 0x153   : > { %1207 = vst [vmem:[%s2113_s19 + $0x198] sm:$0xff] %v1843_v42 }
 0x154   : > { %v1845_v27 = vpop.eup %1844  ;;  %v985_v12 = vadd.f32 %v984_v10, %v816_v13  ;;  %1846 = vtanh.f32 %v1063_v39  ;;  %v1074_v9 = vpop.f32.mrf.mxu3 }
 0x155   : > { %1176 = vst [vmem:[%s2113_s19 + $0xa0] sm:$0xff] %v1845_v27 }
 0x156   : > { %1848 = vtanh.f32 %v985_v12 }
 0x157   : > { %v895_v45 = vpop.f32.mrf.mxu2  ;;  %v994_v50 = vpop.f32.mrf.mxu1 }
 0x158   : > { %v896_v43 = vadd.f32 %v2096_v60, %v895_v45 }
 0x159   : > { %v818_v47 = vpop.f32.mrf.mxu0 }
 0x15a   : > { %v819_v48 = vadd.f32 %v2096_v60, %v818_v47  ;;  %v1847_v52 = vpop.eup %1846  ;;  %v1065_v49 = vadd.f32 %v1064_v24, %v896_v43 }
 0x15b   : > { %1208 = vst [vmem:[%s2113_s19 + $0x1a0] sm:$0xff] %v1847_v52 }
 0x15c   : > { %v1849_v53 = vpop.eup %1848  ;;  %v988_v55 = vadd.f32 %v987_v19, %v819_v48  ;;  %1850 = vtanh.f32 %v1065_v49  ;;  %v1077_v4 = vpop.f32.mrf.mxu3 }
 0x15d   : > { %1177 = vst [vmem:[%s2113_s19 + $0xa8] sm:$0xff] %v1849_v53 }
 0x15e   : > { %1852 = vtanh.f32 %v988_v55  ;;  %v844_v55 = vadd.f32 %v2096_v60, %v2106_v8 }
 0x15f   : > { %v898_v44 = vpop.f32.mrf.mxu2  ;;  %v997_v58 = vpop.f32.mrf.mxu1 }
 0x160   : > { %v899_v56 = vadd.f32 %v2096_v60, %v898_v44 }
 0x161   : > { %v820_v29 = vpop.f32.mrf.mxu0 }
 0x162   : > { %v821_v57 = vadd.f32 %v2096_v60, %v820_v29  ;;  %v1851_v59 = vpop.eup %1850  ;;  %v1068_v33 = vadd.f32 %v1067_v36, %v899_v56 }
 0x163   : > { %1209 = vst [vmem:[%s2113_s19 + $0x1a8] sm:$0xff] %v1851_v59 }
 0x164   : > { %v1853_v61 = vpop.eup %1852  ;;  %v990_v63 = vadd.f32 %v989_v28, %v821_v57  ;;  %1854 = vtanh.f32 %v1068_v33  ;;  %v1079_v38 = vpop.f32.mrf.mxu3 }
 0x165   : > { %1178 = vst [vmem:[%s2113_s19 + $0xb0] sm:$0xff] %v1853_v61 }
 0x166   : > { %1856 = vtanh.f32 %v990_v63 }
 0x167   : > { %v900_v1 = vpop.f32.mrf.mxu2  ;;  %v999_v6 = vpop.f32.mrf.mxu1 }
 0x168   : > { %v901_v2 = vadd.f32 %v2096_v60, %v900_v1 }
 0x169   : > { %v823_v3 = vpop.f32.mrf.mxu0 }
 0x16a   : > { %v824_v54 = vadd.f32 %v2096_v60, %v823_v3  ;;  %v1855_v7 = vpop.eup %1854  ;;  %v1070_v10 = vadd.f32 %v1069_v51, %v901_v2 }
 0x16b   : > { %1210 = vst [vmem:[%s2113_s19 + $0x1b0] sm:$0xff] %v1855_v7 }
 0x16c   : > { %v1857_v41 = vpop.eup %1856  ;;  %v993_v11 = vadd.f32 %v992_v40, %v824_v54  ;;  %1858 = vtanh.f32 %v1070_v10  ;;  %v1082_v49 = vpop.f32.mrf.mxu3 }
 0x16d   : > { %1179 = vst [vmem:[%s2113_s19 + $0xb8] sm:$0xff] %v1857_v41 }
 0x16e   : > { %1860 = vtanh.f32 %v993_v11 }
 0x16f   : > { %v903_v46 = vpop.f32.mrf.mxu2  ;;  %v1002_v17 = vpop.f32.mrf.mxu1 }
 0x170   : > { %v904_v14 = vadd.f32 %v2096_v60, %v903_v46 }
 0x171   : > { %v825_v15 = vpop.f32.mrf.mxu0 }
 0x172   : > { %v826_v16 = vadd.f32 %v2096_v60, %v825_v15  ;;  %v1859_v18 = vpop.eup %1858  ;;  %v1073_v19 = vadd.f32 %v1072_v0, %v904_v14 }
 0x173   : > { %1211 = vst [vmem:[%s2113_s19 + $0x1b8] sm:$0xff] %v1859_v18 }
 0x174   : > { %v1861_v20 = vpop.eup %1860  ;;  %v995_v21 = vadd.f32 %v994_v50, %v826_v16  ;;  %1862 = vtanh.f32 %v1073_v19  ;;  %v1084_v0 = vpop.f32.mrf.mxu3 }
 0x175   : > { %1180 = vst [vmem:[%s2113_s19 + $0xc0] sm:$0xff] %v1861_v20 }
 0x176   : > { %1864 = vtanh.f32 %v995_v21 }
 0x177   : > { %v905_v22 = vpop.f32.mrf.mxu2  ;;  %v1004_v5 = vpop.f32.mrf.mxu1 }
 0x178   : > { %v906_v24 = vadd.f32 %v2096_v60, %v905_v22 }
 0x179   : > { %v828_v25 = vpop.f32.mrf.mxu0 }
 0x17a   : > { %v829_v26 = vadd.f32 %v2096_v60, %v828_v25  ;;  %v1863_v62 = vpop.eup %1862  ;;  %v1075_v28 = vadd.f32 %v1074_v9, %v906_v24 }
 0x17b   : > { %1212 = vst [vmem:[%s2113_s19 + $0x1c0] sm:$0xff] %v1863_v62 }
 0x17c   : > { %v1865_v30 = vpop.eup %1864  ;;  %v998_v31 = vadd.f32 %v997_v58, %v829_v26  ;;  %1866 = vtanh.f32 %v1075_v28 }
 0x17d   : > { %1181 = vst [vmem:[%s2113_s19 + $0xc8] sm:$0xff] %v1865_v30 }
 0x17e   : > { %1868 = vtanh.f32 %v998_v31 }
 0x17f   : > { %v908_v32 = vpop.f32.mrf.mxu2  ;;  %v1007_v37 = vpop.f32.mrf.mxu1 }
 0x180   : > { %v909_v34 = vadd.f32 %v2096_v60, %v908_v32 }
 0x181   : > { %v830_v35 = vpop.f32.mrf.mxu0 }
 0x182   : > { %v831_v36 = vadd.f32 %v2096_v60, %v830_v35  ;;  %v1867_v13 = vpop.eup %1866  ;;  %v1078_v40 = vadd.f32 %v1077_v4, %v909_v34 }
 0x183   : > { %1213 = vst [vmem:[%s2113_s19 + $0x1c8] sm:$0xff] %v1867_v13 }
 0x184   : > { %v1869_v42 = vpop.eup %1868  ;;  %v1000_v39 = vadd.f32 %v999_v6, %v831_v36  ;;  %1870 = vtanh.f32 %v1078_v40 }
 0x185   : > { %1182 = vst [vmem:[%s2113_s19 + $0xd0] sm:$0xff] %v1869_v42 }
 0x186   : > { %1872 = vtanh.f32 %v1000_v39 }
 0x187   : > { %v910_v27 = vpop.f32.mrf.mxu2  ;;  %v1009_v47 = vpop.f32.mrf.mxu1 }
 0x188   : > { %v911_v12 = vadd.f32 %v2096_v60, %v910_v27 }
 0x189   : > { %v833_v45 = vpop.f32.mrf.mxu0 }
 0x18a   : > { %v834_v43 = vadd.f32 %v2096_v60, %v833_v45  ;;  %v1871_v48 = vpop.eup %1870  ;;  %v1080_v50 = vadd.f32 %v1079_v38, %v911_v12 }
 0x18b   : > { %1214 = vst [vmem:[%s2113_s19 + $0x1d0] sm:$0xff] %v1871_v48 }
 0x18c   : > { %v1873_v51 = vpop.eup %1872  ;;  %v1003_v52 = vadd.f32 %v1002_v17, %v834_v43  ;;  %1874 = vtanh.f32 %v1080_v50 }
 0x18d   : > { %1183 = vst [vmem:[%s2113_s19 + $0xd8] sm:$0xff] %v1873_v51 }
 0x18e   : > { %1876 = vtanh.f32 %v1003_v52 }
 0x18f   : > { %v913_v53 = vpop.f32.mrf.mxu2  ;;  %v1012_v57 = vpop.f32.mrf.mxu1 }
 0x190   : > { %v914_v44 = vadd.f32 %v2096_v60, %v913_v53  ;;  %v1013_v33 = vadd.f32 %v1012_v57, %v844_v55 }
 0x191   : > { %v835_v56 = vpop.f32.mrf.mxu0 }
 0x192   : > { %v836_v29 = vadd.f32 %v2096_v60, %v835_v56  ;;  %v1875_v58 = vpop.eup %1874  ;;  %v1083_v59 = vadd.f32 %v1082_v49, %v914_v44  ;;  %v1896_v60 = vld [vmem:[%s2385_s2] ss:$0 sm:$0xff] }
 0x193   : > { %1215 = vst [vmem:[%s2113_s19 + $0x1d8] sm:$0xff] %v1875_v58  ;;  %v846_v1 = vadd.f32 %v1896_v60, %v2128_v23  ;;  %v1087_v23 = vpop.f32.mrf.mxu3 }
 0x194   : > { %v1877_v61 = vpop.eup %1876  ;;  %v1005_v63 = vadd.f32 %v1004_v5, %v836_v29  ;;  %1878 = vtanh.f32 %v1083_v59 }
 0x195   : > { %1184 = vst [vmem:[%s2113_s19 + $0xe0] sm:$0xff] %v1877_v61 }
 0x196   : > { %1880 = vtanh.f32 %v1005_v63 }
 0x197   : > { %1882 = vtanh.f32 %v1013_v33  ;;  %v915_v8 = vpop.f32.mrf.mxu2  ;;  %v1014_v6 = vpop.f32.mrf.mxu1 }
 0x198   : > { %v916_v2 = vadd.f32 %v1896_v60, %v915_v8  ;;  %v1015_v41 = vadd.f32 %v1014_v6, %v846_v1 }
 0x199   : > { %v838_v3 = vpop.f32.mrf.mxu0 }
 0x19a   : > { %v839_v54 = vadd.f32 %v1896_v60, %v838_v3  ;;  %v1879_v7 = vpop.eup %1878  ;;  %v1085_v10 = vadd.f32 %v1084_v0, %v916_v2 }
 0x19b   : > { %1216 = vst [vmem:[%s2113_s19 + $0x1e0] sm:$0xff] %v1879_v7  ;;  %v1089_v25 = vpop.f32.mrf.mxu3 }
 0x19c   : > { %v1881_v11 = vpop.eup %1880  ;;  %v1008_v9 = vadd.f32 %v1007_v37, %v839_v54  ;;  %1884 = vtanh.f32 %v1085_v10 }
 0x19d   : > { %v1883_v46 = vpop.eup %1882  ;;  %1185 = vst [vmem:[%s2113_s19 + $0xe8] sm:$0xff] %v1881_v11 }
 0x19e   : > { %1188 = vst [vmem:[%s2113_s19 + $0x100] sm:$0xff] %v1883_v46  ;;  %1886 = vtanh.f32 %v1008_v9 }
 0x19f   : > { %1888 = vtanh.f32 %v1015_v41  ;;  %v918_v14 = vpop.f32.mrf.mxu2 }
 0x1a0   : > { %v919_v15 = vadd.f32 %v1896_v60, %v918_v14 }
 0x1a1   : > { %v840_v16 = vpop.f32.mrf.mxu0 }
 0x1a2   : > { %v841_v17 = vadd.f32 %v1896_v60, %v840_v16  ;;  %v1885_v18 = vpop.eup %1884  ;;  %v1088_v19 = vadd.f32 %v1087_v23, %v919_v15 }
 0x1a3   : > { %1217 = vst [vmem:[%s2113_s19 + $0x1e8] sm:$0xff] %v1885_v18 }
 0x1a4   : > { %v1887_v20 = vpop.eup %1886  ;;  %v1010_v21 = vadd.f32 %v1009_v47, %v841_v17  ;;  %1890 = vtanh.f32 %v1088_v19 }
 0x1a5   : > { %v1889_v22 = vpop.eup %1888  ;;  %1186 = vst [vmem:[%s2113_s19 + $0xf0] sm:$0xff] %v1887_v20 }
 0x1a6   : > { %1189 = vst [vmem:[%s2113_s19 + $0x108] sm:$0xff] %v1889_v22  ;;  %1892 = vtanh.f32 %v1010_v21 }
 0x1a7   : > { %v920_v4 = vpop.f32.mrf.mxu2 }
 0x1a8   : > { %v921_v24 = vadd.f32 %v1896_v60, %v920_v4 }
 0x1aa   : > { %v1891_v26 = vpop.eup %1890  ;;  %v1090_v5 = vadd.f32 %v1089_v25, %v921_v24 }
 0x1ab   : > { %1218 = vst [vmem:[%s2113_s19 + $0x1f0] sm:$0xff] %v1891_v26 }
 0x1ac   : > { %v1893_v62 = vpop.eup %1892  ;;  %1894 = vtanh.f32 %v1090_v5 }
 0x1ad   : > { %1187 = vst [vmem:[%s2113_s19 + $0xf8] sm:$0xff] %v1893_v62 }
 0x1b2   : > { %v1895_v28 = vpop.eup %1894 }
 0x1b3   : > { %1219 = vst [vmem:[%s2113_s19 + $0x1f8] sm:$0xff] %v1895_v28 }
 0x1b4 PF: > { %s13_s14 = sadd.s32 1, %s1919_s14   ;;  %s2387_s12 = smov %s1915_s13 }
 0x1b5   : > { %p10_p5 = scmp.ge.s32.totalorder %s13_s14, 6   ;;  %s2388_s13 = smov %s2390_s15 }
 0x1b7   :  { %12 = sbr.rel (!%p10_p5) target bundleno = 2 (0x2), region = 68 }

</bundles_post_ra>
